<compile_context>
chip_gen: v6e
topology: v6e:2x2x1
jax: 0.10.0
libtpu: 0.0.40
codegen_flags: <defaults>
</compile_context>

<pallas_src>
import jax
import jax.numpy as jnp
from jax.experimental import pallas as pl
from jax.experimental.pallas import tpu as pltpu

KERNEL_SIZE = 7
PAD = 3  # padding for kernel_size == 7


def cbam_spatial_kernel(w_ref, x_ref, o_ref, pad_ref):
    """One grid step = NB batch elements.

    w_ref   : SMEM (2*7*7,) conv weights (scalar prefetch, f32)
    x_ref   : VMEM (NB, C, H, W) input block
    o_ref   : VMEM (NB, 1, H, W) output block
    pad_ref : VMEM (2, H+6, W+6) zero-padded [avg; max] maps (reused per image)
    """
    NB, C, H, W = x_ref.shape

    # All 98 weights once from SMEM, hoisted out of the nb loop (nb-invariant;
    # they stay scalar operands of the vector multiplies).
    wv = [w_ref[i] for i in range(2 * KERNEL_SIZE * KERNEL_SIZE)]

    # Zero the padded scratch once per grid step: only the PAD-wide border must
    # be zero; the interior is overwritten for every batch element below.
    pad_ref[...] = jnp.zeros_like(pad_ref)

    # Channel-reduction chunking (bounds vreg pressure for large C).
    CC = C if C <= 8 else 8
    n_full = C // CC
    rem = C - n_full * CC
    inv_c = 1.0 / C

    @pl.loop(0, NB)
    def _per_image(nb):
        # ---- chunked channel mean / max (running f32 accumulators) ----
        def c_chunk(ci, carry):
            s, m = carry
            chunk = x_ref[nb, pl.ds(ci * CC, CC)].astype(jnp.float32)  # (CC,H,W)
            return (s + jnp.sum(chunk, axis=0),
                    jnp.maximum(m, jnp.max(chunk, axis=0)))

        carry = (jnp.zeros((H, W), jnp.float32),
                 jnp.full((H, W), -jnp.inf, jnp.float32))
        if n_full <= 8:   # short trip count: unroll (static slice starts)
            for ci in range(n_full):
                carry = c_chunk(ci, carry)
        else:
            carry = jax.lax.fori_loop(0, n_full, c_chunk, carry)
        ssum, smax = carry
        if rem:
            tail = x_ref[nb, pl.ds(n_full * CC, rem)].astype(jnp.float32)
            ssum = ssum + jnp.sum(tail, axis=0)
            smax = jnp.maximum(smax, jnp.max(tail, axis=0))

        # Interior of the zero-padded [avg; max] maps (border stays zero).
        pad_ref[0, PAD:PAD + H, PAD:PAD + W] = ssum * inv_c
        pad_ref[1, PAD:PAD + H, PAD:PAD + W] = smax

        # ---- 7x7 conv (2 -> 1 channels, no bias) ----
        # Lane (kw) shifts hoisted: 7 lane-offset reads per channel; the kh
        # offsets are in-register sublane slices (no VMEM shift-slab round
        # trip). 4 independent partial accumulators expose VALU ILP.
        parts = [jnp.zeros((H, W), jnp.float32) for _ in range(4)]
        for c in range(2):
            slabs = [pad_ref[c, :, kw:kw + W] for kw in range(KERNEL_SIZE)]
            for kh in range(KERNEL_SIZE):
                j = 2 * c + (kh & 1)
                for kw in range(KERNEL_SIZE):
                    w_s = wv[(c * KERNEL_SIZE + kh) * KERNEL_SIZE + kw]
                    parts[j] = parts[j] + slabs[kw][kh:kh + H, :] * w_s
        acc = (parts[0] + parts[1]) + (parts[2] + parts[3])

        o_ref[nb] = jax.nn.sigmoid(acc)[None].astype(o_ref.dtype)


def _vmem_capacity_bytes():
    """Physical per-core VMEM (128 MiB on v5e/v6e, 64 MiB on v7x)."""
    try:
        cap = int(pltpu.get_tpu_info().vmem_capacity_bytes)
        if cap > 0:
            return cap
    except Exception:
        pass
    return 64 << 20  # conservative fallback (v7x-sized VMEM)


def _pick_block_n(N, vmem_need, budget):
    """Largest divisor of N whose double-buffered block + scratch fits the
    generation-aware VMEM budget, while keeping the grid >= 2 steps (preferably
    even) so both v7x TensorCores get work and the DMA pipeline overlaps."""
    divisors = [d for d in range(1, N + 1) if N % d == 0]
    feasible = [d for d in divisors if vmem_need(d) <= budget] or [1]
    multi = [d for d in feasible if N // d >= 2]
    if multi:
        feasible = multi
    even = [d for d in feasible if (N // d) % 2 == 0]
    return max(even or feasible)


def cbam_spatial_attention(x, weight, *, block_n=None):
    """x: (N, C, H, W); weight: (1, 2, 7, 7) OIHW, bias-free. Returns (N, 1, H, W)."""
    N, C, H, W = x.shape
    assert weight.shape == (1, 2, KERNEL_SIZE, KERNEL_SIZE), weight.shape
    Hpad, Wpad = H + 2 * PAD, W + 2 * PAD
    in_item = jnp.dtype(x.dtype).itemsize
    out_item = in_item

    capacity = _vmem_capacity_bytes()
    budget = (capacity * 72) // 100          # ~92 MiB v5e/v6e, ~46 MiB v7x

    def vmem_need(nb):
        return (2 * nb * C * H * W * in_item      # double-buffered input block
                + 2 * nb * H * W * out_item       # double-buffered output block
                + 2 * Hpad * Wpad * 4)            # padded [avg; max] scratch

    nb = block_n if block_n is not None else _pick_block_n(N, vmem_need, budget)
    assert N % nb == 0, (N, nb)

    w_flat = weight.reshape(-1).astype(jnp.float32)   # -> SMEM via scalar prefetch

    # Scheduling hint: HBM-bound streaming x (C channels in, 1 map out).
    cost = pl.CostEstimate(
        flops=N * H * W * (2 * C + 4 * KERNEL_SIZE * KERNEL_SIZE),
        transcendentals=N * H * W,                    # sigmoid
        bytes_accessed=(N * C * H * W * in_item + N * H * W * out_item
                        + w_flat.size * 4),
    )

    # Scoped-VMEM limit: at least the 32 MiB default, never above physical
    # VMEM minus headroom (v7x only has 64 MiB per TensorCore).
    hard_cap = capacity - max(capacity // 8, 8 << 20)
    vmem_limit = int(min(max(vmem_need(nb) * 5 // 4, 32 << 20), hard_cap))

    return pl.pallas_call(
        cbam_spatial_kernel,
        out_shape=jax.ShapeDtypeStruct((N, 1, H, W), x.dtype),
        grid_spec=pltpu.PrefetchScalarGridSpec(
            num_scalar_prefetch=1,                    # w_flat lands in SMEM
            grid=(N // nb,),
            in_specs=[pl.BlockSpec((nb, C, H, W), lambda n, w: (n, 0, 0, 0))],
            out_specs=pl.BlockSpec((nb, 1, H, W), lambda n, w: (n, 0, 0, 0)),
            scratch_shapes=[pltpu.VMEM((2, Hpad, Wpad), jnp.float32)],
        ),
        compiler_params=pltpu.CompilerParams(
            dimension_semantics=("parallel",),
            vmem_limit_bytes=vmem_limit,
        ),
        cost_estimate=cost,
    )(w_flat, x)


def cbam_spatial_attention_ref(x, weight):
    """Pure-JAX reference matching the PyTorch forward."""
    avg_out = jnp.mean(x, axis=1, keepdims=True)
    max_out = jnp.max(x, axis=1, keepdims=True)
    feat = jnp.concatenate([avg_out, max_out], axis=1)
    y = jax.lax.conv_general_dilated(
        feat, weight,
        window_strides=(1, 1),
        padding=((PAD, PAD), (PAD, PAD)),
        dimension_numbers=("NCHW", "OIHW", "NCHW"),
    )
    return jax.nn.sigmoid(y)


if __name__ == "__main__":
    key = jax.random.PRNGKey(0)
    kx, kw = jax.random.split(key)

    # Small deterministic example consistent with the module: NCHW input.
    N, C, H, W = 2, 4, 16, 16
    x = jax.random.normal(kx, (N, C, H, W), dtype=jnp.float32)

    # Conv2d(2, 1, 7, bias=False) weight: (1, 2, 7, 7).
    fan_in = 2 * KERNEL_SIZE * KERNEL_SIZE
    bound = 1.0 / (fan_in ** 0.5)
    weight = jax.random.uniform(
        kw, (1, 2, KERNEL_SIZE, KERNEL_SIZE),
        minval=-bound, maxval=bound, dtype=jnp.float32,
    )

    out = jax.block_until_ready(cbam_spatial_attention(x, weight))
    ref = cbam_spatial_attention_ref(x, weight)

    assert out.shape == (N, 1, H, W), out.shape
    assert jnp.allclose(out, ref, atol=1e-5, rtol=1e-5), "mismatch vs JAX reference"

    print("KERNEL_OK")
</pallas_src>

<mosaic_0001>
module attributes {stable_mosaic.version = 11 : i64} {
  func.func @cbam_spatial_kernel(%arg0: i32, %arg1: memref<98xf32, #tpu.memory_space<smem>>, %arg2: memref<1x4x16x16xf32, #tpu.memory_space<vmem>>, %arg3: memref<1x1x16x16xf32, #tpu.memory_space<vmem>>, %arg4: memref<2x22x22xf32, #tpu.memory_space<vmem>>) attributes {dimension_semantics = [#tpu.dimension_semantics<parallel>], iteration_bounds = array<i64: 2>, scalar_prefetch = 1 : i64, scratch_operands = 1 : i64, tpu.core_type = #tpu.core_type<tc>, window_params = [{transform_indices = @transform_0, window_bounds = array<i64: 1, 4, 16, 16>}, {transform_indices = @transform_1, window_bounds = array<i64: 1, 1, 16, 16>}]} {
    %c0 = arith.constant 0 : index
    %0 = memref.load %arg1[%c0] : memref<98xf32, #tpu.memory_space<smem>>
    %c1 = arith.constant 1 : index
    %1 = memref.load %arg1[%c1] : memref<98xf32, #tpu.memory_space<smem>>
    %c2 = arith.constant 2 : index
    %2 = memref.load %arg1[%c2] : memref<98xf32, #tpu.memory_space<smem>>
    %c3 = arith.constant 3 : index
    %3 = memref.load %arg1[%c3] : memref<98xf32, #tpu.memory_space<smem>>
    %c4 = arith.constant 4 : index
    %4 = memref.load %arg1[%c4] : memref<98xf32, #tpu.memory_space<smem>>
    %c5 = arith.constant 5 : index
    %5 = memref.load %arg1[%c5] : memref<98xf32, #tpu.memory_space<smem>>
    %c6 = arith.constant 6 : index
    %6 = memref.load %arg1[%c6] : memref<98xf32, #tpu.memory_space<smem>>
    %c7 = arith.constant 7 : index
    %7 = memref.load %arg1[%c7] : memref<98xf32, #tpu.memory_space<smem>>
    %c8 = arith.constant 8 : index
    %8 = memref.load %arg1[%c8] : memref<98xf32, #tpu.memory_space<smem>>
    %c9 = arith.constant 9 : index
    %9 = memref.load %arg1[%c9] : memref<98xf32, #tpu.memory_space<smem>>
    %c10 = arith.constant 10 : index
    %10 = memref.load %arg1[%c10] : memref<98xf32, #tpu.memory_space<smem>>
    %c11 = arith.constant 11 : index
    %11 = memref.load %arg1[%c11] : memref<98xf32, #tpu.memory_space<smem>>
    %c12 = arith.constant 12 : index
    %12 = memref.load %arg1[%c12] : memref<98xf32, #tpu.memory_space<smem>>
    %c13 = arith.constant 13 : index
    %13 = memref.load %arg1[%c13] : memref<98xf32, #tpu.memory_space<smem>>
    %c14 = arith.constant 14 : index
    %14 = memref.load %arg1[%c14] : memref<98xf32, #tpu.memory_space<smem>>
    %c15 = arith.constant 15 : index
    %15 = memref.load %arg1[%c15] : memref<98xf32, #tpu.memory_space<smem>>
    %c16 = arith.constant 16 : index
    %16 = memref.load %arg1[%c16] : memref<98xf32, #tpu.memory_space<smem>>
    %c17 = arith.constant 17 : index
    %17 = memref.load %arg1[%c17] : memref<98xf32, #tpu.memory_space<smem>>
    %c18 = arith.constant 18 : index
    %18 = memref.load %arg1[%c18] : memref<98xf32, #tpu.memory_space<smem>>
    %c19 = arith.constant 19 : index
    %19 = memref.load %arg1[%c19] : memref<98xf32, #tpu.memory_space<smem>>
    %c20 = arith.constant 20 : index
    %20 = memref.load %arg1[%c20] : memref<98xf32, #tpu.memory_space<smem>>
    %c21 = arith.constant 21 : index
    %21 = memref.load %arg1[%c21] : memref<98xf32, #tpu.memory_space<smem>>
    %c22 = arith.constant 22 : index
    %22 = memref.load %arg1[%c22] : memref<98xf32, #tpu.memory_space<smem>>
    %c23 = arith.constant 23 : index
    %23 = memref.load %arg1[%c23] : memref<98xf32, #tpu.memory_space<smem>>
    %c24 = arith.constant 24 : index
    %24 = memref.load %arg1[%c24] : memref<98xf32, #tpu.memory_space<smem>>
    %c25 = arith.constant 25 : index
    %25 = memref.load %arg1[%c25] : memref<98xf32, #tpu.memory_space<smem>>
    %c26 = arith.constant 26 : index
    %26 = memref.load %arg1[%c26] : memref<98xf32, #tpu.memory_space<smem>>
    %c27 = arith.constant 27 : index
    %27 = memref.load %arg1[%c27] : memref<98xf32, #tpu.memory_space<smem>>
    %c28 = arith.constant 28 : index
    %28 = memref.load %arg1[%c28] : memref<98xf32, #tpu.memory_space<smem>>
    %c29 = arith.constant 29 : index
    %29 = memref.load %arg1[%c29] : memref<98xf32, #tpu.memory_space<smem>>
    %c30 = arith.constant 30 : index
    %30 = memref.load %arg1[%c30] : memref<98xf32, #tpu.memory_space<smem>>
    %c31 = arith.constant 31 : index
    %31 = memref.load %arg1[%c31] : memref<98xf32, #tpu.memory_space<smem>>
    %c32 = arith.constant 32 : index
    %32 = memref.load %arg1[%c32] : memref<98xf32, #tpu.memory_space<smem>>
    %c33 = arith.constant 33 : index
    %33 = memref.load %arg1[%c33] : memref<98xf32, #tpu.memory_space<smem>>
    %c34 = arith.constant 34 : index
    %34 = memref.load %arg1[%c34] : memref<98xf32, #tpu.memory_space<smem>>
    %c35 = arith.constant 35 : index
    %35 = memref.load %arg1[%c35] : memref<98xf32, #tpu.memory_space<smem>>
    %c36 = arith.constant 36 : index
    %36 = memref.load %arg1[%c36] : memref<98xf32, #tpu.memory_space<smem>>
    %c37 = arith.constant 37 : index
    %37 = memref.load %arg1[%c37] : memref<98xf32, #tpu.memory_space<smem>>
    %c38 = arith.constant 38 : index
    %38 = memref.load %arg1[%c38] : memref<98xf32, #tpu.memory_space<smem>>
    %c39 = arith.constant 39 : index
    %39 = memref.load %arg1[%c39] : memref<98xf32, #tpu.memory_space<smem>>
    %c40 = arith.constant 40 : index
    %40 = memref.load %arg1[%c40] : memref<98xf32, #tpu.memory_space<smem>>
    %c41 = arith.constant 41 : index
    %41 = memref.load %arg1[%c41] : memref<98xf32, #tpu.memory_space<smem>>
    %c42 = arith.constant 42 : index
    %42 = memref.load %arg1[%c42] : memref<98xf32, #tpu.memory_space<smem>>
    %c43 = arith.constant 43 : index
    %43 = memref.load %arg1[%c43] : memref<98xf32, #tpu.memory_space<smem>>
    %c44 = arith.constant 44 : index
    %44 = memref.load %arg1[%c44] : memref<98xf32, #tpu.memory_space<smem>>
    %c45 = arith.constant 45 : index
    %45 = memref.load %arg1[%c45] : memref<98xf32, #tpu.memory_space<smem>>
    %c46 = arith.constant 46 : index
    %46 = memref.load %arg1[%c46] : memref<98xf32, #tpu.memory_space<smem>>
    %c47 = arith.constant 47 : index
    %47 = memref.load %arg1[%c47] : memref<98xf32, #tpu.memory_space<smem>>
    %c48 = arith.constant 48 : index
    %48 = memref.load %arg1[%c48] : memref<98xf32, #tpu.memory_space<smem>>
    %c49 = arith.constant 49 : index
    %49 = memref.load %arg1[%c49] : memref<98xf32, #tpu.memory_space<smem>>
    %c50 = arith.constant 50 : index
    %50 = memref.load %arg1[%c50] : memref<98xf32, #tpu.memory_space<smem>>
    %c51 = arith.constant 51 : index
    %51 = memref.load %arg1[%c51] : memref<98xf32, #tpu.memory_space<smem>>
    %c52 = arith.constant 52 : index
    %52 = memref.load %arg1[%c52] : memref<98xf32, #tpu.memory_space<smem>>
    %c53 = arith.constant 53 : index
    %53 = memref.load %arg1[%c53] : memref<98xf32, #tpu.memory_space<smem>>
    %c54 = arith.constant 54 : index
    %54 = memref.load %arg1[%c54] : memref<98xf32, #tpu.memory_space<smem>>
    %c55 = arith.constant 55 : index
    %55 = memref.load %arg1[%c55] : memref<98xf32, #tpu.memory_space<smem>>
    %c56 = arith.constant 56 : index
    %56 = memref.load %arg1[%c56] : memref<98xf32, #tpu.memory_space<smem>>
    %c57 = arith.constant 57 : index
    %57 = memref.load %arg1[%c57] : memref<98xf32, #tpu.memory_space<smem>>
    %c58 = arith.constant 58 : index
    %58 = memref.load %arg1[%c58] : memref<98xf32, #tpu.memory_space<smem>>
    %c59 = arith.constant 59 : index
    %59 = memref.load %arg1[%c59] : memref<98xf32, #tpu.memory_space<smem>>
    %c60 = arith.constant 60 : index
    %60 = memref.load %arg1[%c60] : memref<98xf32, #tpu.memory_space<smem>>
    %c61 = arith.constant 61 : index
    %61 = memref.load %arg1[%c61] : memref<98xf32, #tpu.memory_space<smem>>
    %c62 = arith.constant 62 : index
    %62 = memref.load %arg1[%c62] : memref<98xf32, #tpu.memory_space<smem>>
    %c63 = arith.constant 63 : index
    %63 = memref.load %arg1[%c63] : memref<98xf32, #tpu.memory_space<smem>>
    %c64 = arith.constant 64 : index
    %64 = memref.load %arg1[%c64] : memref<98xf32, #tpu.memory_space<smem>>
    %c65 = arith.constant 65 : index
    %65 = memref.load %arg1[%c65] : memref<98xf32, #tpu.memory_space<smem>>
    %c66 = arith.constant 66 : index
    %66 = memref.load %arg1[%c66] : memref<98xf32, #tpu.memory_space<smem>>
    %c67 = arith.constant 67 : index
    %67 = memref.load %arg1[%c67] : memref<98xf32, #tpu.memory_space<smem>>
    %c68 = arith.constant 68 : index
    %68 = memref.load %arg1[%c68] : memref<98xf32, #tpu.memory_space<smem>>
    %c69 = arith.constant 69 : index
    %69 = memref.load %arg1[%c69] : memref<98xf32, #tpu.memory_space<smem>>
    %c70 = arith.constant 70 : index
    %70 = memref.load %arg1[%c70] : memref<98xf32, #tpu.memory_space<smem>>
    %c71 = arith.constant 71 : index
    %71 = memref.load %arg1[%c71] : memref<98xf32, #tpu.memory_space<smem>>
    %c72 = arith.constant 72 : index
    %72 = memref.load %arg1[%c72] : memref<98xf32, #tpu.memory_space<smem>>
    %c73 = arith.constant 73 : index
    %73 = memref.load %arg1[%c73] : memref<98xf32, #tpu.memory_space<smem>>
    %c74 = arith.constant 74 : index
    %74 = memref.load %arg1[%c74] : memref<98xf32, #tpu.memory_space<smem>>
    %c75 = arith.constant 75 : index
    %75 = memref.load %arg1[%c75] : memref<98xf32, #tpu.memory_space<smem>>
    %c76 = arith.constant 76 : index
    %76 = memref.load %arg1[%c76] : memref<98xf32, #tpu.memory_space<smem>>
    %c77 = arith.constant 77 : index
    %77 = memref.load %arg1[%c77] : memref<98xf32, #tpu.memory_space<smem>>
    %c78 = arith.constant 78 : index
    %78 = memref.load %arg1[%c78] : memref<98xf32, #tpu.memory_space<smem>>
    %c79 = arith.constant 79 : index
    %79 = memref.load %arg1[%c79] : memref<98xf32, #tpu.memory_space<smem>>
    %c80 = arith.constant 80 : index
    %80 = memref.load %arg1[%c80] : memref<98xf32, #tpu.memory_space<smem>>
    %c81 = arith.constant 81 : index
    %81 = memref.load %arg1[%c81] : memref<98xf32, #tpu.memory_space<smem>>
    %c82 = arith.constant 82 : index
    %82 = memref.load %arg1[%c82] : memref<98xf32, #tpu.memory_space<smem>>
    %c83 = arith.constant 83 : index
    %83 = memref.load %arg1[%c83] : memref<98xf32, #tpu.memory_space<smem>>
    %c84 = arith.constant 84 : index
    %84 = memref.load %arg1[%c84] : memref<98xf32, #tpu.memory_space<smem>>
    %c85 = arith.constant 85 : index
    %85 = memref.load %arg1[%c85] : memref<98xf32, #tpu.memory_space<smem>>
    %c86 = arith.constant 86 : index
    %86 = memref.load %arg1[%c86] : memref<98xf32, #tpu.memory_space<smem>>
    %c87 = arith.constant 87 : index
    %87 = memref.load %arg1[%c87] : memref<98xf32, #tpu.memory_space<smem>>
    %c88 = arith.constant 88 : index
    %88 = memref.load %arg1[%c88] : memref<98xf32, #tpu.memory_space<smem>>
    %c89 = arith.constant 89 : index
    %89 = memref.load %arg1[%c89] : memref<98xf32, #tpu.memory_space<smem>>
    %c90 = arith.constant 90 : index
    %90 = memref.load %arg1[%c90] : memref<98xf32, #tpu.memory_space<smem>>
    %c91 = arith.constant 91 : index
    %91 = memref.load %arg1[%c91] : memref<98xf32, #tpu.memory_space<smem>>
    %c92 = arith.constant 92 : index
    %92 = memref.load %arg1[%c92] : memref<98xf32, #tpu.memory_space<smem>>
    %c93 = arith.constant 93 : index
    %93 = memref.load %arg1[%c93] : memref<98xf32, #tpu.memory_space<smem>>
    %c94 = arith.constant 94 : index
    %94 = memref.load %arg1[%c94] : memref<98xf32, #tpu.memory_space<smem>>
    %c95 = arith.constant 95 : index
    %95 = memref.load %arg1[%c95] : memref<98xf32, #tpu.memory_space<smem>>
    %c96 = arith.constant 96 : index
    %96 = memref.load %arg1[%c96] : memref<98xf32, #tpu.memory_space<smem>>
    %c97 = arith.constant 97 : index
    %97 = memref.load %arg1[%c97] : memref<98xf32, #tpu.memory_space<smem>>
    %cst = arith.constant 0.000000e+00 : f32
    %98 = vector.broadcast %cst : f32 to vector<2x22x22xf32>
    %c0_0 = arith.constant 0 : index
    %c0_1 = arith.constant 0 : index
    %c0_2 = arith.constant 0 : index
    %99 = vector.load %arg4[%c0_0, %c0_1, %c0_2] : memref<2x22x22xf32, #tpu.memory_space<vmem>>, vector<2x22x22xf32>
    tpu.vector_store %arg4[%c0_0, %c0_1, %c0_2], %98 {strides = array<i32>} : memref<2x22x22xf32, #tpu.memory_space<vmem>>, vector<2x22x22xf32>,
    %c0_i32 = arith.constant 0 : i32
    %c1_i32 = arith.constant 1 : i32
    %100 = arith.muli %c0_i32, %c1_i32 : i32
    %c0_i32_3 = arith.constant 0 : i32
    %101 = arith.addi %c0_i32_3, %100 : i32
    %cst_4 = arith.constant 0.000000e+00 : f32
    %102 = vector.broadcast %cst_4 : f32 to vector<16x16xf32>
    %cst_5 = arith.constant 0xFF800000 : f32
    %103 = vector.broadcast %cst_5 : f32 to vector<16x16xf32>
    %104 = arith.index_cast %101 : i32 to index
    %c0_6 = arith.constant 0 : index
    %c0_7 = arith.constant 0 : index
    %c0_8 = arith.constant 0 : index
    %105 = vector.load %arg2[%104, %c0_6, %c0_7, %c0_8] : memref<1x4x16x16xf32, #tpu.memory_space<vmem>>, vector<1x4x16x16xf32>
    %106 = vector.shape_cast %105 : vector<1x4x16x16xf32> to vector<4x16x16xf32>
    %cst_9 = arith.constant dense<0.000000e+00> : vector<16x16xf32>
    %107 = vector.multi_reduction <add>, %106, %cst_9 [0] : vector<4x16x16xf32> to vector<16x16xf32>
    %108 = arith.addf %102, %107 : vector<16x16xf32>
    %cst_10 = arith.constant dense<0xFF800000> : vector<16x16xf32>
    %109 = vector.multi_reduction <maximumf>, %106, %cst_10 [0] : vector<4x16x16xf32> to vector<16x16xf32>
    %110 = arith.maximumf %103, %109 : vector<16x16xf32>
    %cst_11 = arith.constant 2.500000e-01 : f32
    %111 = vector.broadcast %cst_11 : f32 to vector<16x16xf32>
    %112 = arith.mulf %108, %111 : vector<16x16xf32>
    %c0_12 = arith.constant 0 : index
    %c3_13 = arith.constant 3 : index
    %c3_14 = arith.constant 3 : index
    %113 = vector.load %arg4[%c0_12, %c3_13, %c3_14] : memref<2x22x22xf32, #tpu.memory_space<vmem>>, vector<1x16x16xf32>
    %114 = vector.shape_cast %113 : vector<1x16x16xf32> to vector<16x16xf32>
    %115 = vector.shape_cast %112 : vector<16x16xf32> to vector<1x16x16xf32>
    tpu.vector_store %arg4[%c0_12, %c3_13, %c3_14], %115 {strides = array<i32>} : memref<2x22x22xf32, #tpu.memory_space<vmem>>, vector<1x16x16xf32>,
    %c1_15 = arith.constant 1 : index
    %c3_16 = arith.constant 3 : index
    %c3_17 = arith.constant 3 : index
    %116 = vector.load %arg4[%c1_15, %c3_16, %c3_17] : memref<2x22x22xf32, #tpu.memory_space<vmem>>, vector<1x16x16xf32>
    %117 = vector.shape_cast %116 : vector<1x16x16xf32> to vector<16x16xf32>
    %118 = vector.shape_cast %110 : vector<16x16xf32> to vector<1x16x16xf32>
    tpu.vector_store %arg4[%c1_15, %c3_16, %c3_17], %118 {strides = array<i32>} : memref<2x22x22xf32, #tpu.memory_space<vmem>>, vector<1x16x16xf32>,
    %cst_18 = arith.constant 0.000000e+00 : f32
    %119 = vector.broadcast %cst_18 : f32 to vector<16x16xf32>
    %cst_19 = arith.constant 0.000000e+00 : f32
    %120 = vector.broadcast %cst_19 : f32 to vector<16x16xf32>
    %cst_20 = arith.constant 0.000000e+00 : f32
    %121 = vector.broadcast %cst_20 : f32 to vector<16x16xf32>
    %cst_21 = arith.constant 0.000000e+00 : f32
    %122 = vector.broadcast %cst_21 : f32 to vector<16x16xf32>
    %c0_22 = arith.constant 0 : index
    %c0_23 = arith.constant 0 : index
    %c0_24 = arith.constant 0 : index
    %123 = vector.load %arg4[%c0_22, %c0_23, %c0_24] : memref<2x22x22xf32, #tpu.memory_space<vmem>>, vector<1x22x16xf32>
    %124 = vector.shape_cast %123 : vector<1x22x16xf32> to vector<22x16xf32>
    %c0_25 = arith.constant 0 : index
    %c0_26 = arith.constant 0 : index
    %c1_27 = arith.constant 1 : index
    %125 = vector.load %arg4[%c0_25, %c0_26, %c1_27] : memref<2x22x22xf32, #tpu.memory_space<vmem>>, vector<1x22x16xf32>
    %126 = vector.shape_cast %125 : vector<1x22x16xf32> to vector<22x16xf32>
    %c0_28 = arith.constant 0 : index
    %c0_29 = arith.constant 0 : index
    %c2_30 = arith.constant 2 : index
    %127 = vector.load %arg4[%c0_28, %c0_29, %c2_30] : memref<2x22x22xf32, #tpu.memory_space<vmem>>, vector<1x22x16xf32>
    %128 = vector.shape_cast %127 : vector<1x22x16xf32> to vector<22x16xf32>
    %c0_31 = arith.constant 0 : index
    %c0_32 = arith.constant 0 : index
    %c3_33 = arith.constant 3 : index
    %129 = vector.load %arg4[%c0_31, %c0_32, %c3_33] : memref<2x22x22xf32, #tpu.memory_space<vmem>>, vector<1x22x16xf32>
    %130 = vector.shape_cast %129 : vector<1x22x16xf32> to vector<22x16xf32>
    %c0_34 = arith.constant 0 : index
    %c0_35 = arith.constant 0 : index
    %c4_36 = arith.constant 4 : index
    %131 = vector.load %arg4[%c0_34, %c0_35, %c4_36] : memref<2x22x22xf32, #tpu.memory_space<vmem>>, vector<1x22x16xf32>
    %132 = vector.shape_cast %131 : vector<1x22x16xf32> to vector<22x16xf32>
    %c0_37 = arith.constant 0 : index
    %c0_38 = arith.constant 0 : index
    %c5_39 = arith.constant 5 : index
    %133 = vector.load %arg4[%c0_37, %c0_38, %c5_39] : memref<2x22x22xf32, #tpu.memory_space<vmem>>, vector<1x22x16xf32>
    %134 = vector.shape_cast %133 : vector<1x22x16xf32> to vector<22x16xf32>
    %c0_40 = arith.constant 0 : index
    %c0_41 = arith.constant 0 : index
    %c6_42 = arith.constant 6 : index
    %135 = vector.load %arg4[%c0_40, %c0_41, %c6_42] : memref<2x22x22xf32, #tpu.memory_space<vmem>>, vector<1x22x16xf32>
    %136 = vector.shape_cast %135 : vector<1x22x16xf32> to vector<22x16xf32>
    %137 = vector.extract_strided_slice %124 {offsets = [0, 0], sizes = [16, 16], strides = [1, 1]} : vector<22x16xf32> to vector<16x16xf32>
    %138 = vector.broadcast %0 : f32 to vector<16x16xf32>
    %139 = arith.mulf %137, %138 : vector<16x16xf32>
    %140 = arith.addf %119, %139 : vector<16x16xf32>
    %141 = vector.extract_strided_slice %126 {offsets = [0, 0], sizes = [16, 16], strides = [1, 1]} : vector<22x16xf32> to vector<16x16xf32>
    %142 = vector.broadcast %1 : f32 to vector<16x16xf32>
    %143 = arith.mulf %141, %142 : vector<16x16xf32>
    %144 = arith.addf %140, %143 : vector<16x16xf32>
    %145 = vector.extract_strided_slice %128 {offsets = [0, 0], sizes = [16, 16], strides = [1, 1]} : vector<22x16xf32> to vector<16x16xf32>
    %146 = vector.broadcast %2 : f32 to vector<16x16xf32>
    %147 = arith.mulf %145, %146 : vector<16x16xf32>
    %148 = arith.addf %144, %147 : vector<16x16xf32>
    %149 = vector.extract_strided_slice %130 {offsets = [0, 0], sizes = [16, 16], strides = [1, 1]} : vector<22x16xf32> to vector<16x16xf32>
    %150 = vector.broadcast %3 : f32 to vector<16x16xf32>
    %151 = arith.mulf %149, %150 : vector<16x16xf32>
    %152 = arith.addf %148, %151 : vector<16x16xf32>
    %153 = vector.extract_strided_slice %132 {offsets = [0, 0], sizes = [16, 16], strides = [1, 1]} : vector<22x16xf32> to vector<16x16xf32>
    %154 = vector.broadcast %4 : f32 to vector<16x16xf32>
    %155 = arith.mulf %153, %154 : vector<16x16xf32>
    %156 = arith.addf %152, %155 : vector<16x16xf32>
    %157 = vector.extract_strided_slice %134 {offsets = [0, 0], sizes = [16, 16], strides = [1, 1]} : vector<22x16xf32> to vector<16x16xf32>
    %158 = vector.broadcast %5 : f32 to vector<16x16xf32>
    %159 = arith.mulf %157, %158 : vector<16x16xf32>
    %160 = arith.addf %156, %159 : vector<16x16xf32>
    %161 = vector.extract_strided_slice %136 {offsets = [0, 0], sizes = [16, 16], strides = [1, 1]} : vector<22x16xf32> to vector<16x16xf32>
    %162 = vector.broadcast %6 : f32 to vector<16x16xf32>
    %163 = arith.mulf %161, %162 : vector<16x16xf32>
    %164 = arith.addf %160, %163 : vector<16x16xf32>
    %165 = vector.extract_strided_slice %124 {offsets = [1, 0], sizes = [16, 16], strides = [1, 1]} : vector<22x16xf32> to vector<16x16xf32>
    %166 = vector.broadcast %7 : f32 to vector<16x16xf32>
    %167 = arith.mulf %165, %166 : vector<16x16xf32>
    %168 = arith.addf %120, %167 : vector<16x16xf32>
    %169 = vector.extract_strided_slice %126 {offsets = [1, 0], sizes = [16, 16], strides = [1, 1]} : vector<22x16xf32> to vector<16x16xf32>
    %170 = vector.broadcast %8 : f32 to vector<16x16xf32>
    %171 = arith.mulf %169, %170 : vector<16x16xf32>
    %172 = arith.addf %168, %171 : vector<16x16xf32>
    %173 = vector.extract_strided_slice %128 {offsets = [1, 0], sizes = [16, 16], strides = [1, 1]} : vector<22x16xf32> to vector<16x16xf32>
    %174 = vector.broadcast %9 : f32 to vector<16x16xf32>
    %175 = arith.mulf %173, %174 : vector<16x16xf32>
    %176 = arith.addf %172, %175 : vector<16x16xf32>
    %177 = vector.extract_strided_slice %130 {offsets = [1, 0], sizes = [16, 16], strides = [1, 1]} : vector<22x16xf32> to vector<16x16xf32>
    %178 = vector.broadcast %10 : f32 to vector<16x16xf32>
    %179 = arith.mulf %177, %178 : vector<16x16xf32>
    %180 = arith.addf %176, %179 : vector<16x16xf32>
    %181 = vector.extract_strided_slice %132 {offsets = [1, 0], sizes = [16, 16], strides = [1, 1]} : vector<22x16xf32> to vector<16x16xf32>
    %182 = vector.broadcast %11 : f32 to vector<16x16xf32>
    %183 = arith.mulf %181, %182 : vector<16x16xf32>
    %184 = arith.addf %180, %183 : vector<16x16xf32>
    %185 = vector.extract_strided_slice %134 {offsets = [1, 0], sizes = [16, 16], strides = [1, 1]} : vector<22x16xf32> to vector<16x16xf32>
    %186 = vector.broadcast %12 : f32 to vector<16x16xf32>
    %187 = arith.mulf %185, %186 : vector<16x16xf32>
    %188 = arith.addf %184, %187 : vector<16x16xf32>
    %189 = vector.extract_strided_slice %136 {offsets = [1, 0], sizes = [16, 16], strides = [1, 1]} : vector<22x16xf32> to vector<16x16xf32>
    %190 = vector.broadcast %13 : f32 to vector<16x16xf32>
    %191 = arith.mulf %189, %190 : vector<16x16xf32>
    %192 = arith.addf %188, %191 : vector<16x16xf32>
    %193 = vector.extract_strided_slice %124 {offsets = [2, 0], sizes = [16, 16], strides = [1, 1]} : vector<22x16xf32> to vector<16x16xf32>
    %194 = vector.broadcast %14 : f32 to vector<16x16xf32>
    %195 = arith.mulf %193, %194 : vector<16x16xf32>
    %196 = arith.addf %164, %195 : vector<16x16xf32>
    %197 = vector.extract_strided_slice %126 {offsets = [2, 0], sizes = [16, 16], strides = [1, 1]} : vector<22x16xf32> to vector<16x16xf32>
    %198 = vector.broadcast %15 : f32 to vector<16x16xf32>
    %199 = arith.mulf %197, %198 : vector<16x16xf32>
    %200 = arith.addf %196, %199 : vector<16x16xf32>
    %201 = vector.extract_strided_slice %128 {offsets = [2, 0], sizes = [16, 16], strides = [1, 1]} : vector<22x16xf32> to vector<16x16xf32>
    %202 = vector.broadcast %16 : f32 to vector<16x16xf32>
    %203 = arith.mulf %201, %202 : vector<16x16xf32>
    %204 = arith.addf %200, %203 : vector<16x16xf32>
    %205 = vector.extract_strided_slice %130 {offsets = [2, 0], sizes = [16, 16], strides = [1, 1]} : vector<22x16xf32> to vector<16x16xf32>
    %206 = vector.broadcast %17 : f32 to vector<16x16xf32>
    %207 = arith.mulf %205, %206 : vector<16x16xf32>
    %208 = arith.addf %204, %207 : vector<16x16xf32>
    %209 = vector.extract_strided_slice %132 {offsets = [2, 0], sizes = [16, 16], strides = [1, 1]} : vector<22x16xf32> to vector<16x16xf32>
    %210 = vector.broadcast %18 : f32 to vector<16x16xf32>
    %211 = arith.mulf %209, %210 : vector<16x16xf32>
    %212 = arith.addf %208, %211 : vector<16x16xf32>
    %213 = vector.extract_strided_slice %134 {offsets = [2, 0], sizes = [16, 16], strides = [1, 1]} : vector<22x16xf32> to vector<16x16xf32>
    %214 = vector.broadcast %19 : f32 to vector<16x16xf32>
    %215 = arith.mulf %213, %214 : vector<16x16xf32>
    %216 = arith.addf %212, %215 : vector<16x16xf32>
    %217 = vector.extract_strided_slice %136 {offsets = [2, 0], sizes = [16, 16], strides = [1, 1]} : vector<22x16xf32> to vector<16x16xf32>
    %218 = vector.broadcast %20 : f32 to vector<16x16xf32>
    %219 = arith.mulf %217, %218 : vector<16x16xf32>
    %220 = arith.addf %216, %219 : vector<16x16xf32>
    %221 = vector.extract_strided_slice %124 {offsets = [3, 0], sizes = [16, 16], strides = [1, 1]} : vector<22x16xf32> to vector<16x16xf32>
    %222 = vector.broadcast %21 : f32 to vector<16x16xf32>
    %223 = arith.mulf %221, %222 : vector<16x16xf32>
    %224 = arith.addf %192, %223 : vector<16x16xf32>
    %225 = vector.extract_strided_slice %126 {offsets = [3, 0], sizes = [16, 16], strides = [1, 1]} : vector<22x16xf32> to vector<16x16xf32>
    %226 = vector.broadcast %22 : f32 to vector<16x16xf32>
    %227 = arith.mulf %225, %226 : vector<16x16xf32>
    %228 = arith.addf %224, %227 : vector<16x16xf32>
    %229 = vector.extract_strided_slice %128 {offsets = [3, 0], sizes = [16, 16], strides = [1, 1]} : vector<22x16xf32> to vector<16x16xf32>
    %230 = vector.broadcast %23 : f32 to vector<16x16xf32>
    %231 = arith.mulf %229, %230 : vector<16x16xf32>
    %232 = arith.addf %228, %231 : vector<16x16xf32>
    %233 = vector.extract_strided_slice %130 {offsets = [3, 0], sizes = [16, 16], strides = [1, 1]} : vector<22x16xf32> to vector<16x16xf32>
    %234 = vector.broadcast %24 : f32 to vector<16x16xf32>
    %235 = arith.mulf %233, %234 : vector<16x16xf32>
    %236 = arith.addf %232, %235 : vector<16x16xf32>
    %237 = vector.extract_strided_slice %132 {offsets = [3, 0], sizes = [16, 16], strides = [1, 1]} : vector<22x16xf32> to vector<16x16xf32>
    %238 = vector.broadcast %25 : f32 to vector<16x16xf32>
    %239 = arith.mulf %237, %238 : vector<16x16xf32>
    %240 = arith.addf %236, %239 : vector<16x16xf32>
    %241 = vector.extract_strided_slice %134 {offsets = [3, 0], sizes = [16, 16], strides = [1, 1]} : vector<22x16xf32> to vector<16x16xf32>
    %242 = vector.broadcast %26 : f32 to vector<16x16xf32>
    %243 = arith.mulf %241, %242 : vector<16x16xf32>
    %244 = arith.addf %240, %243 : vector<16x16xf32>
    %245 = vector.extract_strided_slice %136 {offsets = [3, 0], sizes = [16, 16], strides = [1, 1]} : vector<22x16xf32> to vector<16x16xf32>
    %246 = vector.broadcast %27 : f32 to vector<16x16xf32>
    %247 = arith.mulf %245, %246 : vector<16x16xf32>
    %248 = arith.addf %244, %247 : vector<16x16xf32>
    %249 = vector.extract_strided_slice %124 {offsets = [4, 0], sizes = [16, 16], strides = [1, 1]} : vector<22x16xf32> to vector<16x16xf32>
    %250 = vector.broadcast %28 : f32 to vector<16x16xf32>
    %251 = arith.mulf %249, %250 : vector<16x16xf32>
    %252 = arith.addf %220, %251 : vector<16x16xf32>
    %253 = vector.extract_strided_slice %126 {offsets = [4, 0], sizes = [16, 16], strides = [1, 1]} : vector<22x16xf32> to vector<16x16xf32>
    %254 = vector.broadcast %29 : f32 to vector<16x16xf32>
    %255 = arith.mulf %253, %254 : vector<16x16xf32>
    %256 = arith.addf %252, %255 : vector<16x16xf32>
    %257 = vector.extract_strided_slice %128 {offsets = [4, 0], sizes = [16, 16], strides = [1, 1]} : vector<22x16xf32> to vector<16x16xf32>
    %258 = vector.broadcast %30 : f32 to vector<16x16xf32>
    %259 = arith.mulf %257, %258 : vector<16x16xf32>
    %260 = arith.addf %256, %259 : vector<16x16xf32>
    %261 = vector.extract_strided_slice %130 {offsets = [4, 0], sizes = [16, 16], strides = [1, 1]} : vector<22x16xf32> to vector<16x16xf32>
    %262 = vector.broadcast %31 : f32 to vector<16x16xf32>
    %263 = arith.mulf %261, %262 : vector<16x16xf32>
    %264 = arith.addf %260, %263 : vector<16x16xf32>
    %265 = vector.extract_strided_slice %132 {offsets = [4, 0], sizes = [16, 16], strides = [1, 1]} : vector<22x16xf32> to vector<16x16xf32>
    %266 = vector.broadcast %32 : f32 to vector<16x16xf32>
    %267 = arith.mulf %265, %266 : vector<16x16xf32>
    %268 = arith.addf %264, %267 : vector<16x16xf32>
    %269 = vector.extract_strided_slice %134 {offsets = [4, 0], sizes = [16, 16], strides = [1, 1]} : vector<22x16xf32> to vector<16x16xf32>
    %270 = vector.broadcast %33 : f32 to vector<16x16xf32>
    %271 = arith.mulf %269, %270 : vector<16x16xf32>
    %272 = arith.addf %268, %271 : vector<16x16xf32>
    %273 = vector.extract_strided_slice %136 {offsets = [4, 0], sizes = [16, 16], strides = [1, 1]} : vector<22x16xf32> to vector<16x16xf32>
    %274 = vector.broadcast %34 : f32 to vector<16x16xf32>
    %275 = arith.mulf %273, %274 : vector<16x16xf32>
    %276 = arith.addf %272, %275 : vector<16x16xf32>
    %277 = vector.extract_strided_slice %124 {offsets = [5, 0], sizes = [16, 16], strides = [1, 1]} : vector<22x16xf32> to vector<16x16xf32>
    %278 = vector.broadcast %35 : f32 to vector<16x16xf32>
    %279 = arith.mulf %277, %278 : vector<16x16xf32>
    %280 = arith.addf %248, %279 : vector<16x16xf32>
    %281 = vector.extract_strided_slice %126 {offsets = [5, 0], sizes = [16, 16], strides = [1, 1]} : vector<22x16xf32> to vector<16x16xf32>
    %282 = vector.broadcast %36 : f32 to vector<16x16xf32>
    %283 = arith.mulf %281, %282 : vector<16x16xf32>
    %284 = arith.addf %280, %283 : vector<16x16xf32>
    %285 = vector.extract_strided_slice %128 {offsets = [5, 0], sizes = [16, 16], strides = [1, 1]} : vector<22x16xf32> to vector<16x16xf32>
    %286 = vector.broadcast %37 : f32 to vector<16x16xf32>
    %287 = arith.mulf %285, %286 : vector<16x16xf32>
    %288 = arith.addf %284, %287 : vector<16x16xf32>
    %289 = vector.extract_strided_slice %130 {offsets = [5, 0], sizes = [16, 16], strides = [1, 1]} : vector<22x16xf32> to vector<16x16xf32>
    %290 = vector.broadcast %38 : f32 to vector<16x16xf32>
    %291 = arith.mulf %289, %290 : vector<16x16xf32>
    %292 = arith.addf %288, %291 : vector<16x16xf32>
    %293 = vector.extract_strided_slice %132 {offsets = [5, 0], sizes = [16, 16], strides = [1, 1]} : vector<22x16xf32> to vector<16x16xf32>
    %294 = vector.broadcast %39 : f32 to vector<16x16xf32>
    %295 = arith.mulf %293, %294 : vector<16x16xf32>
    %296 = arith.addf %292, %295 : vector<16x16xf32>
    %297 = vector.extract_strided_slice %134 {offsets = [5, 0], sizes = [16, 16], strides = [1, 1]} : vector<22x16xf32> to vector<16x16xf32>
    %298 = vector.broadcast %40 : f32 to vector<16x16xf32>
    %299 = arith.mulf %297, %298 : vector<16x16xf32>
    %300 = arith.addf %296, %299 : vector<16x16xf32>
    %301 = vector.extract_strided_slice %136 {offsets = [5, 0], sizes = [16, 16], strides = [1, 1]} : vector<22x16xf32> to vector<16x16xf32>
    %302 = vector.broadcast %41 : f32 to vector<16x16xf32>
    %303 = arith.mulf %301, %302 : vector<16x16xf32>
    %304 = arith.addf %300, %303 : vector<16x16xf32>
    %305 = vector.extract_strided_slice %124 {offsets = [6, 0], sizes = [16, 16], strides = [1, 1]} : vector<22x16xf32> to vector<16x16xf32>
    %306 = vector.broadcast %42 : f32 to vector<16x16xf32>
    %307 = arith.mulf %305, %306 : vector<16x16xf32>
    %308 = arith.addf %276, %307 : vector<16x16xf32>
    %309 = vector.extract_strided_slice %126 {offsets = [6, 0], sizes = [16, 16], strides = [1, 1]} : vector<22x16xf32> to vector<16x16xf32>
    %310 = vector.broadcast %43 : f32 to vector<16x16xf32>
    %311 = arith.mulf %309, %310 : vector<16x16xf32>
    %312 = arith.addf %308, %311 : vector<16x16xf32>
    %313 = vector.extract_strided_slice %128 {offsets = [6, 0], sizes = [16, 16], strides = [1, 1]} : vector<22x16xf32> to vector<16x16xf32>
    %314 = vector.broadcast %44 : f32 to vector<16x16xf32>
    %315 = arith.mulf %313, %314 : vector<16x16xf32>
    %316 = arith.addf %312, %315 : vector<16x16xf32>
    %317 = vector.extract_strided_slice %130 {offsets = [6, 0], sizes = [16, 16], strides = [1, 1]} : vector<22x16xf32> to vector<16x16xf32>
    %318 = vector.broadcast %45 : f32 to vector<16x16xf32>
    %319 = arith.mulf %317, %318 : vector<16x16xf32>
    %320 = arith.addf %316, %319 : vector<16x16xf32>
    %321 = vector.extract_strided_slice %132 {offsets = [6, 0], sizes = [16, 16], strides = [1, 1]} : vector<22x16xf32> to vector<16x16xf32>
    %322 = vector.broadcast %46 : f32 to vector<16x16xf32>
    %323 = arith.mulf %321, %322 : vector<16x16xf32>
    %324 = arith.addf %320, %323 : vector<16x16xf32>
    %325 = vector.extract_strided_slice %134 {offsets = [6, 0], sizes = [16, 16], strides = [1, 1]} : vector<22x16xf32> to vector<16x16xf32>
    %326 = vector.broadcast %47 : f32 to vector<16x16xf32>
    %327 = arith.mulf %325, %326 : vector<16x16xf32>
    %328 = arith.addf %324, %327 : vector<16x16xf32>
    %329 = vector.extract_strided_slice %136 {offsets = [6, 0], sizes = [16, 16], strides = [1, 1]} : vector<22x16xf32> to vector<16x16xf32>
    %330 = vector.broadcast %48 : f32 to vector<16x16xf32>
    %331 = arith.mulf %329, %330 : vector<16x16xf32>
    %332 = arith.addf %328, %331 : vector<16x16xf32>
    %c1_43 = arith.constant 1 : index
    %c0_44 = arith.constant 0 : index
    %c0_45 = arith.constant 0 : index
    %333 = vector.load %arg4[%c1_43, %c0_44, %c0_45] : memref<2x22x22xf32, #tpu.memory_space<vmem>>, vector<1x22x16xf32>
    %334 = vector.shape_cast %333 : vector<1x22x16xf32> to vector<22x16xf32>
    %c1_46 = arith.constant 1 : index
    %c0_47 = arith.constant 0 : index
    %c1_48 = arith.constant 1 : index
    %335 = vector.load %arg4[%c1_46, %c0_47, %c1_48] : memref<2x22x22xf32, #tpu.memory_space<vmem>>, vector<1x22x16xf32>
    %336 = vector.shape_cast %335 : vector<1x22x16xf32> to vector<22x16xf32>
    %c1_49 = arith.constant 1 : index
    %c0_50 = arith.constant 0 : index
    %c2_51 = arith.constant 2 : index
    %337 = vector.load %arg4[%c1_49, %c0_50, %c2_51] : memref<2x22x22xf32, #tpu.memory_space<vmem>>, vector<1x22x16xf32>
    %338 = vector.shape_cast %337 : vector<1x22x16xf32> to vector<22x16xf32>
    %c1_52 = arith.constant 1 : index
    %c0_53 = arith.constant 0 : index
    %c3_54 = arith.constant 3 : index
    %339 = vector.load %arg4[%c1_52, %c0_53, %c3_54] : memref<2x22x22xf32, #tpu.memory_space<vmem>>, vector<1x22x16xf32>
    %340 = vector.shape_cast %339 : vector<1x22x16xf32> to vector<22x16xf32>
    %c1_55 = arith.constant 1 : index
    %c0_56 = arith.constant 0 : index
    %c4_57 = arith.constant 4 : index
    %341 = vector.load %arg4[%c1_55, %c0_56, %c4_57] : memref<2x22x22xf32, #tpu.memory_space<vmem>>, vector<1x22x16xf32>
    %342 = vector.shape_cast %341 : vector<1x22x16xf32> to vector<22x16xf32>
    %c1_58 = arith.constant 1 : index
    %c0_59 = arith.constant 0 : index
    %c5_60 = arith.constant 5 : index
    %343 = vector.load %arg4[%c1_58, %c0_59, %c5_60] : memref<2x22x22xf32, #tpu.memory_space<vmem>>, vector<1x22x16xf32>
    %344 = vector.shape_cast %343 : vector<1x22x16xf32> to vector<22x16xf32>
    %c1_61 = arith.constant 1 : index
    %c0_62 = arith.constant 0 : index
    %c6_63 = arith.constant 6 : index
    %345 = vector.load %arg4[%c1_61, %c0_62, %c6_63] : memref<2x22x22xf32, #tpu.memory_space<vmem>>, vector<1x22x16xf32>
    %346 = vector.shape_cast %345 : vector<1x22x16xf32> to vector<22x16xf32>
    %347 = vector.extract_strided_slice %334 {offsets = [0, 0], sizes = [16, 16], strides = [1, 1]} : vector<22x16xf32> to vector<16x16xf32>
    %348 = vector.broadcast %49 : f32 to vector<16x16xf32>
    %349 = arith.mulf %347, %348 : vector<16x16xf32>
    %350 = arith.addf %121, %349 : vector<16x16xf32>
    %351 = vector.extract_strided_slice %336 {offsets = [0, 0], sizes = [16, 16], strides = [1, 1]} : vector<22x16xf32> to vector<16x16xf32>
    %352 = vector.broadcast %50 : f32 to vector<16x16xf32>
    %353 = arith.mulf %351, %352 : vector<16x16xf32>
    %354 = arith.addf %350, %353 : vector<16x16xf32>
    %355 = vector.extract_strided_slice %338 {offsets = [0, 0], sizes = [16, 16], strides = [1, 1]} : vector<22x16xf32> to vector<16x16xf32>
    %356 = vector.broadcast %51 : f32 to vector<16x16xf32>
    %357 = arith.mulf %355, %356 : vector<16x16xf32>
    %358 = arith.addf %354, %357 : vector<16x16xf32>
    %359 = vector.extract_strided_slice %340 {offsets = [0, 0], sizes = [16, 16], strides = [1, 1]} : vector<22x16xf32> to vector<16x16xf32>
    %360 = vector.broadcast %52 : f32 to vector<16x16xf32>
    %361 = arith.mulf %359, %360 : vector<16x16xf32>
    %362 = arith.addf %358, %361 : vector<16x16xf32>
    %363 = vector.extract_strided_slice %342 {offsets = [0, 0], sizes = [16, 16], strides = [1, 1]} : vector<22x16xf32> to vector<16x16xf32>
    %364 = vector.broadcast %53 : f32 to vector<16x16xf32>
    %365 = arith.mulf %363, %364 : vector<16x16xf32>
    %366 = arith.addf %362, %365 : vector<16x16xf32>
    %367 = vector.extract_strided_slice %344 {offsets = [0, 0], sizes = [16, 16], strides = [1, 1]} : vector<22x16xf32> to vector<16x16xf32>
    %368 = vector.broadcast %54 : f32 to vector<16x16xf32>
    %369 = arith.mulf %367, %368 : vector<16x16xf32>
    %370 = arith.addf %366, %369 : vector<16x16xf32>
    %371 = vector.extract_strided_slice %346 {offsets = [0, 0], sizes = [16, 16], strides = [1, 1]} : vector<22x16xf32> to vector<16x16xf32>
    %372 = vector.broadcast %55 : f32 to vector<16x16xf32>
    %373 = arith.mulf %371, %372 : vector<16x16xf32>
    %374 = arith.addf %370, %373 : vector<16x16xf32>
    %375 = vector.extract_strided_slice %334 {offsets = [1, 0], sizes = [16, 16], strides = [1, 1]} : vector<22x16xf32> to vector<16x16xf32>
    %376 = vector.broadcast %56 : f32 to vector<16x16xf32>
    %377 = arith.mulf %375, %376 : vector<16x16xf32>
    %378 = arith.addf %122, %377 : vector<16x16xf32>
    %379 = vector.extract_strided_slice %336 {offsets = [1, 0], sizes = [16, 16], strides = [1, 1]} : vector<22x16xf32> to vector<16x16xf32>
    %380 = vector.broadcast %57 : f32 to vector<16x16xf32>
    %381 = arith.mulf %379, %380 : vector<16x16xf32>
    %382 = arith.addf %378, %381 : vector<16x16xf32>
    %383 = vector.extract_strided_slice %338 {offsets = [1, 0], sizes = [16, 16], strides = [1, 1]} : vector<22x16xf32> to vector<16x16xf32>
    %384 = vector.broadcast %58 : f32 to vector<16x16xf32>
    %385 = arith.mulf %383, %384 : vector<16x16xf32>
    %386 = arith.addf %382, %385 : vector<16x16xf32>
    %387 = vector.extract_strided_slice %340 {offsets = [1, 0], sizes = [16, 16], strides = [1, 1]} : vector<22x16xf32> to vector<16x16xf32>
    %388 = vector.broadcast %59 : f32 to vector<16x16xf32>
    %389 = arith.mulf %387, %388 : vector<16x16xf32>
    %390 = arith.addf %386, %389 : vector<16x16xf32>
    %391 = vector.extract_strided_slice %342 {offsets = [1, 0], sizes = [16, 16], strides = [1, 1]} : vector<22x16xf32> to vector<16x16xf32>
    %392 = vector.broadcast %60 : f32 to vector<16x16xf32>
    %393 = arith.mulf %391, %392 : vector<16x16xf32>
    %394 = arith.addf %390, %393 : vector<16x16xf32>
    %395 = vector.extract_strided_slice %344 {offsets = [1, 0], sizes = [16, 16], strides = [1, 1]} : vector<22x16xf32> to vector<16x16xf32>
    %396 = vector.broadcast %61 : f32 to vector<16x16xf32>
    %397 = arith.mulf %395, %396 : vector<16x16xf32>
    %398 = arith.addf %394, %397 : vector<16x16xf32>
    %399 = vector.extract_strided_slice %346 {offsets = [1, 0], sizes = [16, 16], strides = [1, 1]} : vector<22x16xf32> to vector<16x16xf32>
    %400 = vector.broadcast %62 : f32 to vector<16x16xf32>
    %401 = arith.mulf %399, %400 : vector<16x16xf32>
    %402 = arith.addf %398, %401 : vector<16x16xf32>
    %403 = vector.extract_strided_slice %334 {offsets = [2, 0], sizes = [16, 16], strides = [1, 1]} : vector<22x16xf32> to vector<16x16xf32>
    %404 = vector.broadcast %63 : f32 to vector<16x16xf32>
    %405 = arith.mulf %403, %404 : vector<16x16xf32>
    %406 = arith.addf %374, %405 : vector<16x16xf32>
    %407 = vector.extract_strided_slice %336 {offsets = [2, 0], sizes = [16, 16], strides = [1, 1]} : vector<22x16xf32> to vector<16x16xf32>
    %408 = vector.broadcast %64 : f32 to vector<16x16xf32>
    %409 = arith.mulf %407, %408 : vector<16x16xf32>
    %410 = arith.addf %406, %409 : vector<16x16xf32>
    %411 = vector.extract_strided_slice %338 {offsets = [2, 0], sizes = [16, 16], strides = [1, 1]} : vector<22x16xf32> to vector<16x16xf32>
    %412 = vector.broadcast %65 : f32 to vector<16x16xf32>
    %413 = arith.mulf %411, %412 : vector<16x16xf32>
    %414 = arith.addf %410, %413 : vector<16x16xf32>
    %415 = vector.extract_strided_slice %340 {offsets = [2, 0], sizes = [16, 16], strides = [1, 1]} : vector<22x16xf32> to vector<16x16xf32>
    %416 = vector.broadcast %66 : f32 to vector<16x16xf32>
    %417 = arith.mulf %415, %416 : vector<16x16xf32>
    %418 = arith.addf %414, %417 : vector<16x16xf32>
    %419 = vector.extract_strided_slice %342 {offsets = [2, 0], sizes = [16, 16], strides = [1, 1]} : vector<22x16xf32> to vector<16x16xf32>
    %420 = vector.broadcast %67 : f32 to vector<16x16xf32>
    %421 = arith.mulf %419, %420 : vector<16x16xf32>
    %422 = arith.addf %418, %421 : vector<16x16xf32>
    %423 = vector.extract_strided_slice %344 {offsets = [2, 0], sizes = [16, 16], strides = [1, 1]} : vector<22x16xf32> to vector<16x16xf32>
    %424 = vector.broadcast %68 : f32 to vector<16x16xf32>
    %425 = arith.mulf %423, %424 : vector<16x16xf32>
    %426 = arith.addf %422, %425 : vector<16x16xf32>
    %427 = vector.extract_strided_slice %346 {offsets = [2, 0], sizes = [16, 16], strides = [1, 1]} : vector<22x16xf32> to vector<16x16xf32>
    %428 = vector.broadcast %69 : f32 to vector<16x16xf32>
    %429 = arith.mulf %427, %428 : vector<16x16xf32>
    %430 = arith.addf %426, %429 : vector<16x16xf32>
    %431 = vector.extract_strided_slice %334 {offsets = [3, 0], sizes = [16, 16], strides = [1, 1]} : vector<22x16xf32> to vector<16x16xf32>
    %432 = vector.broadcast %70 : f32 to vector<16x16xf32>
    %433 = arith.mulf %431, %432 : vector<16x16xf32>
    %434 = arith.addf %402, %433 : vector<16x16xf32>
    %435 = vector.extract_strided_slice %336 {offsets = [3, 0], sizes = [16, 16], strides = [1, 1]} : vector<22x16xf32> to vector<16x16xf32>
    %436 = vector.broadcast %71 : f32 to vector<16x16xf32>
    %437 = arith.mulf %435, %436 : vector<16x16xf32>
    %438 = arith.addf %434, %437 : vector<16x16xf32>
    %439 = vector.extract_strided_slice %338 {offsets = [3, 0], sizes = [16, 16], strides = [1, 1]} : vector<22x16xf32> to vector<16x16xf32>
    %440 = vector.broadcast %72 : f32 to vector<16x16xf32>
    %441 = arith.mulf %439, %440 : vector<16x16xf32>
    %442 = arith.addf %438, %441 : vector<16x16xf32>
    %443 = vector.extract_strided_slice %340 {offsets = [3, 0], sizes = [16, 16], strides = [1, 1]} : vector<22x16xf32> to vector<16x16xf32>
    %444 = vector.broadcast %73 : f32 to vector<16x16xf32>
    %445 = arith.mulf %443, %444 : vector<16x16xf32>
    %446 = arith.addf %442, %445 : vector<16x16xf32>
    %447 = vector.extract_strided_slice %342 {offsets = [3, 0], sizes = [16, 16], strides = [1, 1]} : vector<22x16xf32> to vector<16x16xf32>
    %448 = vector.broadcast %74 : f32 to vector<16x16xf32>
    %449 = arith.mulf %447, %448 : vector<16x16xf32>
    %450 = arith.addf %446, %449 : vector<16x16xf32>
    %451 = vector.extract_strided_slice %344 {offsets = [3, 0], sizes = [16, 16], strides = [1, 1]} : vector<22x16xf32> to vector<16x16xf32>
    %452 = vector.broadcast %75 : f32 to vector<16x16xf32>
    %453 = arith.mulf %451, %452 : vector<16x16xf32>
    %454 = arith.addf %450, %453 : vector<16x16xf32>
    %455 = vector.extract_strided_slice %346 {offsets = [3, 0], sizes = [16, 16], strides = [1, 1]} : vector<22x16xf32> to vector<16x16xf32>
    %456 = vector.broadcast %76 : f32 to vector<16x16xf32>
    %457 = arith.mulf %455, %456 : vector<16x16xf32>
    %458 = arith.addf %454, %457 : vector<16x16xf32>
    %459 = vector.extract_strided_slice %334 {offsets = [4, 0], sizes = [16, 16], strides = [1, 1]} : vector<22x16xf32> to vector<16x16xf32>
    %460 = vector.broadcast %77 : f32 to vector<16x16xf32>
    %461 = arith.mulf %459, %460 : vector<16x16xf32>
    %462 = arith.addf %430, %461 : vector<16x16xf32>
    %463 = vector.extract_strided_slice %336 {offsets = [4, 0], sizes = [16, 16], strides = [1, 1]} : vector<22x16xf32> to vector<16x16xf32>
    %464 = vector.broadcast %78 : f32 to vector<16x16xf32>
    %465 = arith.mulf %463, %464 : vector<16x16xf32>
    %466 = arith.addf %462, %465 : vector<16x16xf32>
    %467 = vector.extract_strided_slice %338 {offsets = [4, 0], sizes = [16, 16], strides = [1, 1]} : vector<22x16xf32> to vector<16x16xf32>
    %468 = vector.broadcast %79 : f32 to vector<16x16xf32>
    %469 = arith.mulf %467, %468 : vector<16x16xf32>
    %470 = arith.addf %466, %469 : vector<16x16xf32>
    %471 = vector.extract_strided_slice %340 {offsets = [4, 0], sizes = [16, 16], strides = [1, 1]} : vector<22x16xf32> to vector<16x16xf32>
    %472 = vector.broadcast %80 : f32 to vector<16x16xf32>
    %473 = arith.mulf %471, %472 : vector<16x16xf32>
    %474 = arith.addf %470, %473 : vector<16x16xf32>
    %475 = vector.extract_strided_slice %342 {offsets = [4, 0], sizes = [16, 16], strides = [1, 1]} : vector<22x16xf32> to vector<16x16xf32>
    %476 = vector.broadcast %81 : f32 to vector<16x16xf32>
    %477 = arith.mulf %475, %476 : vector<16x16xf32>
    %478 = arith.addf %474, %477 : vector<16x16xf32>
    %479 = vector.extract_strided_slice %344 {offsets = [4, 0], sizes = [16, 16], strides = [1, 1]} : vector<22x16xf32> to vector<16x16xf32>
    %480 = vector.broadcast %82 : f32 to vector<16x16xf32>
    %481 = arith.mulf %479, %480 : vector<16x16xf32>
    %482 = arith.addf %478, %481 : vector<16x16xf32>
    %483 = vector.extract_strided_slice %346 {offsets = [4, 0], sizes = [16, 16], strides = [1, 1]} : vector<22x16xf32> to vector<16x16xf32>
    %484 = vector.broadcast %83 : f32 to vector<16x16xf32>
    %485 = arith.mulf %483, %484 : vector<16x16xf32>
    %486 = arith.addf %482, %485 : vector<16x16xf32>
    %487 = vector.extract_strided_slice %334 {offsets = [5, 0], sizes = [16, 16], strides = [1, 1]} : vector<22x16xf32> to vector<16x16xf32>
    %488 = vector.broadcast %84 : f32 to vector<16x16xf32>
    %489 = arith.mulf %487, %488 : vector<16x16xf32>
    %490 = arith.addf %458, %489 : vector<16x16xf32>
    %491 = vector.extract_strided_slice %336 {offsets = [5, 0], sizes = [16, 16], strides = [1, 1]} : vector<22x16xf32> to vector<16x16xf32>
    %492 = vector.broadcast %85 : f32 to vector<16x16xf32>
    %493 = arith.mulf %491, %492 : vector<16x16xf32>
    %494 = arith.addf %490, %493 : vector<16x16xf32>
    %495 = vector.extract_strided_slice %338 {offsets = [5, 0], sizes = [16, 16], strides = [1, 1]} : vector<22x16xf32> to vector<16x16xf32>
    %496 = vector.broadcast %86 : f32 to vector<16x16xf32>
    %497 = arith.mulf %495, %496 : vector<16x16xf32>
    %498 = arith.addf %494, %497 : vector<16x16xf32>
    %499 = vector.extract_strided_slice %340 {offsets = [5, 0], sizes = [16, 16], strides = [1, 1]} : vector<22x16xf32> to vector<16x16xf32>
    %500 = vector.broadcast %87 : f32 to vector<16x16xf32>
    %501 = arith.mulf %499, %500 : vector<16x16xf32>
    %502 = arith.addf %498, %501 : vector<16x16xf32>
    %503 = vector.extract_strided_slice %342 {offsets = [5, 0], sizes = [16, 16], strides = [1, 1]} : vector<22x16xf32> to vector<16x16xf32>
    %504 = vector.broadcast %88 : f32 to vector<16x16xf32>
    %505 = arith.mulf %503, %504 : vector<16x16xf32>
    %506 = arith.addf %502, %505 : vector<16x16xf32>
    %507 = vector.extract_strided_slice %344 {offsets = [5, 0], sizes = [16, 16], strides = [1, 1]} : vector<22x16xf32> to vector<16x16xf32>
    %508 = vector.broadcast %89 : f32 to vector<16x16xf32>
    %509 = arith.mulf %507, %508 : vector<16x16xf32>
    %510 = arith.addf %506, %509 : vector<16x16xf32>
    %511 = vector.extract_strided_slice %346 {offsets = [5, 0], sizes = [16, 16], strides = [1, 1]} : vector<22x16xf32> to vector<16x16xf32>
    %512 = vector.broadcast %90 : f32 to vector<16x16xf32>
    %513 = arith.mulf %511, %512 : vector<16x16xf32>
    %514 = arith.addf %510, %513 : vector<16x16xf32>
    %515 = vector.extract_strided_slice %334 {offsets = [6, 0], sizes = [16, 16], strides = [1, 1]} : vector<22x16xf32> to vector<16x16xf32>
    %516 = vector.broadcast %91 : f32 to vector<16x16xf32>
    %517 = arith.mulf %515, %516 : vector<16x16xf32>
    %518 = arith.addf %486, %517 : vector<16x16xf32>
    %519 = vector.extract_strided_slice %336 {offsets = [6, 0], sizes = [16, 16], strides = [1, 1]} : vector<22x16xf32> to vector<16x16xf32>
    %520 = vector.broadcast %92 : f32 to vector<16x16xf32>
    %521 = arith.mulf %519, %520 : vector<16x16xf32>
    %522 = arith.addf %518, %521 : vector<16x16xf32>
    %523 = vector.extract_strided_slice %338 {offsets = [6, 0], sizes = [16, 16], strides = [1, 1]} : vector<22x16xf32> to vector<16x16xf32>
    %524 = vector.broadcast %93 : f32 to vector<16x16xf32>
    %525 = arith.mulf %523, %524 : vector<16x16xf32>
    %526 = arith.addf %522, %525 : vector<16x16xf32>
    %527 = vector.extract_strided_slice %340 {offsets = [6, 0], sizes = [16, 16], strides = [1, 1]} : vector<22x16xf32> to vector<16x16xf32>
    %528 = vector.broadcast %94 : f32 to vector<16x16xf32>
    %529 = arith.mulf %527, %528 : vector<16x16xf32>
    %530 = arith.addf %526, %529 : vector<16x16xf32>
    %531 = vector.extract_strided_slice %342 {offsets = [6, 0], sizes = [16, 16], strides = [1, 1]} : vector<22x16xf32> to vector<16x16xf32>
    %532 = vector.broadcast %95 : f32 to vector<16x16xf32>
    %533 = arith.mulf %531, %532 : vector<16x16xf32>
    %534 = arith.addf %530, %533 : vector<16x16xf32>
    %535 = vector.extract_strided_slice %344 {offsets = [6, 0], sizes = [16, 16], strides = [1, 1]} : vector<22x16xf32> to vector<16x16xf32>
    %536 = vector.broadcast %96 : f32 to vector<16x16xf32>
    %537 = arith.mulf %535, %536 : vector<16x16xf32>
    %538 = arith.addf %534, %537 : vector<16x16xf32>
    %539 = vector.extract_strided_slice %346 {offsets = [6, 0], sizes = [16, 16], strides = [1, 1]} : vector<22x16xf32> to vector<16x16xf32>
    %540 = vector.broadcast %97 : f32 to vector<16x16xf32>
    %541 = arith.mulf %539, %540 : vector<16x16xf32>
    %542 = arith.addf %538, %541 : vector<16x16xf32>
    %543 = arith.addf %332, %304 : vector<16x16xf32>
    %544 = arith.addf %542, %514 : vector<16x16xf32>
    %545 = arith.addf %543, %544 : vector<16x16xf32>
    %546 = arith.negf %545 : vector<16x16xf32>
    %547 = math.exp %546 : vector<16x16xf32>
    %cst_64 = arith.constant 1.000000e+00 : f32
    %548 = vector.broadcast %cst_64 : f32 to vector<16x16xf32>
    %549 = arith.addf %548, %547 : vector<16x16xf32>
    %550 = arith.divf %548, %549 : vector<16x16xf32>
    %551 = vector.shape_cast %550 : vector<16x16xf32> to vector<1x16x16xf32>
    %552 = arith.index_cast %101 : i32 to index
    %c0_65 = arith.constant 0 : index
    %c0_66 = arith.constant 0 : index
    %c0_67 = arith.constant 0 : index
    %553 = vector.load %arg3[%552, %c0_65, %c0_66, %c0_67] : memref<1x1x16x16xf32, #tpu.memory_space<vmem>>, vector<1x1x16x16xf32>
    %554 = vector.shape_cast %553 : vector<1x1x16x16xf32> to vector<1x16x16xf32>
    %555 = vector.shape_cast %551 : vector<1x16x16xf32> to vector<1x1x16x16xf32>
    tpu.vector_store %arg3[%552, %c0_65, %c0_66, %c0_67], %555 {strides = array<i32>} : memref<1x1x16x16xf32, #tpu.memory_space<vmem>>, vector<1x1x16x16xf32>,
    %c1_i32_68 = arith.constant 1 : i32
    return
  }
  func.func @transform_0(%arg0: i32, %arg1: memref<98xf32, #tpu.memory_space<smem>>) -> (i32, i32, i32, i32) {
    %c0_i32 = arith.constant 0 : i32
    %c0_i32_0 = arith.constant 0 : i32
    %c0_i32_1 = arith.constant 0 : i32
    %c0_i32_2 = arith.constant 0 : i32
    return %arg0, %c0_i32, %c0_i32_0, %c0_i32_1 : i32, i32, i32, i32
  }
  func.func @transform_1(%arg0: i32, %arg1: memref<98xf32, #tpu.memory_space<smem>>) -> (i32, i32, i32, i32) {
    %c0_i32 = arith.constant 0 : i32
    %c0_i32_0 = arith.constant 0 : i32
    %c0_i32_1 = arith.constant 0 : i32
    %c0_i32_2 = arith.constant 0 : i32
    return %arg0, %c0_i32, %c0_i32_0, %c0_i32_1 : i32, i32, i32, i32
  }
}

</mosaic_0001>

<bundles_post_ra>
// kernel: tpu_custom_call.1
= control target key start
LH: loop header
LB: loop body
LE: loop exit
PB: predicated region body
PF: predicated region fallthrough
CT: control target
= control target key end

     0   :  { %s2610_s9 = smov [#allocation4]   ;;  %s4030_s0 = inlined_call_operand.hbm [shape: f32[98], index: 0, kind: input, shape index: {}]   ;;  %s4031_s1 = inlined_call_operand.hbm [shape: f32[2,4,16,16], index: 1, kind: input, shape index: {}]   ;;  %s4032_s2 = inlined_call_operand.hbm [shape: f32[2,1,16,16], index: 2, kind: output, shape index: {}]  }
   0x1   :  { %8 = dma.hbm_to_smem %s4030_s0, 16, %s2610_s9, [#allocation3] }
   0x2   :  { %2584 = dma.done.wait [#allocation3], 16 }
   0x3   :  { %2585 = vsyncadd [#allocation3], 4294967280 }
   0x4   :  { %10 = sfence }
   0x5   :  { %11 = vsyncpa [#allocation6], 0 }
   0x6   :  { %13 = vsyncpa [#allocation6 + $0x1], 0 }
   0x7   :  { %14 = vsyncpa [#allocation7], 0 }
   0x8   :  { %16 = vsyncpa [#allocation7 + $0x1], 0  ;;  %s2643_s12 = smov 0   ;;  %s2645_s13 = smov 0  }
   0x9   :  { %s2647_s14 = smov 0   ;;  %s2649_s15 = smov 0  }
   0xa LB: > { %s2664_s0 = sadd.s32 4294967295, %s2608_s15   ;;  %s2318_s16 = sadd.s32 4294967294, %s2608_s15   ;;  %s2608_s15 = sphi %s2649_s15, %s4199_s15   ;;  %s2604_s14 = sphi %s2647_s14, %s4198_s14   ;;  %s2600_s13 = sphi %s2645_s13, %s4197_s13   ;;  %s2596_s12 = sphi %s2643_s12, %s4196_s12  }
   0xb   : > { %s2668_s17 = sadd.s32 1, %s2608_s15   ;;  %s29_s18 = sadd.s32 1, %s2604_s14 }
   0xc   : > { %s26_s19 = ssub.s32 %s2608_s15, %s2668_s17  ;;  %p36_p0 = scmp.ne.s32.totalorder %s2604_s14, %s2600_s13 }
   0xd   : > { %p27_p1 = scmp.eq.s32.totalorder %s26_s19, 0  ;;  %p37_p2 = scmp.eq.s32.totalorder %s2608_s15, 0 }
   0xe   : > { %p42_p3 = scmp.ne.s32.totalorder %s2600_s13, %s2596_s12  ;;  %p43_p4 = scmp.eq.s32.totalorder %s2664_s0, 0 }
   0xf   : > { %s2680_s20 = scalar_select %p27_p1, %s2604_s14, %s29_s18  }
  0x10   : > { %p2682_p5 = por %p37_p2, %p36_p0  ;;  %p2686_p6 = por %p43_p4, %p42_p3 }
  0x11   : > { %p66_p7 = scmp.eq.s32.totalorder %s2664_s0, 1  ;;  %p72_p8 = scmp.eq.s32.totalorder %s2318_s16, 1 }
  0x12   : > { %s4037_s22 = scalar_select %p2686_p6, 1, 0 }
  0x13   : > { %p2445_p10 = scmp.lt.s32.totalorder %s2608_s15, 2  ;;  %p2693_p11 = por %p66_p7, %p36_p0 }
  0x14   : > { %p2697_p12 = por %p72_p8, %p42_p3  ;;  %s92_s25 = sand.u32 1, %s2604_s14  }
  0x15   : > { %s4038_s23 = scalar_select %p2693_p11, 1, 0 }
  0x16   : > { %s4039_s24 = scalar_select %p2697_p12, 1, 0 }
  0x17   : > { %s2431_s26 = sshll.u32 %s2608_s15, 10  ;;  %s2321_s27 = sshll.u32 %s92_s25, 6 }
  0x18   : > { %s2706_s30 = scalar_lea.hbm %s4031_s1, %s2431_s26  ;;  %s96_s3 = scalar_lea.vmem [#allocation5], %s2321_s27 }
  0x19   : > { %s103_s4 = sshll.u32 %s96_s3, 4  ;;  %p2710_p13 = pnand %p2445_p10, %p2682_p5  ;;  %s2714_s4 = int_to_ptr.vmem [resolvable:$true] %s103_s4 }
  0x1a   : > { %s2716_s6 = scalar_lea.sflag [#allocation6], %s92_s25  ;;  %s2514_s7 = scalar_lea.hbm %s2706_s30, 1024 }
  0x1b   : > { %p2515_p0 = scmp.ne.s32.totalorder %s2706_s30, %s2514_s7  ;;  %p2516_p1 = pneg %p2710_p13 }
  0x1c   : > { %s2519_s10 = scalar_lea.hbm %s4031_s1, 2048  ;;  %p2520_p4 = scmp.lt.s32.totalorder %s2706_s30, %s4031_s1 }
  0x1d   : > { %p2517_p2 = pnand %p2516_p1, %p2515_p0  ;;  %p2521_p5 = scmp.lt.s32.totalorder %s2519_s10, %s2514_s7 }
  0x1f   : > { %p2518_p3 = pneg %p2517_p2  ;;  %p2522_p7 = por %p2521_p5, %p2520_p4 }
  0x21   : > { %p2523_p8 = pnand %p2522_p7, %p2518_p3 }
  0x23   : > { %2526 = shalt.err (!%p2523_p8)
}
  0x24   : > { %s2527_s18 = scalar_lea.vmem %s2714_s4, 1024  ;;  %s2611_s19 = smov [#allocation5]  }
  0x25   : > { %p2528_p10 = scmp.ne.s32.totalorder %s2714_s4, %s2527_s18  ;;  %s2532_s21 = sshll.u32 %s2611_s19, 4  ;;  %s2533_s21 = int_to_ptr.vmem [resolvable:$false] %s2532_s21 }
  0x26   : > { %s2534_s25 = scalar_lea.vmem %s2533_s21, 2048  ;;  %p2535_p2 = scmp.lt.s32.totalorder %s2714_s4, %s2533_s21 }
  0x27   : > { %p2530_p9 = pnand %p2528_p10, %p2516_p1  ;;  %p2536_p12 = scmp.lt.s32.totalorder %s2534_s25, %s2527_s18 }
  0x29   : > { %p2531_p0 = pneg %p2530_p9  ;;  %p2537_p11 = por %p2536_p12, %p2535_p2 }
  0x2b   : > { %p2538_p6 = pnand %p2537_p11, %p2531_p0 }
  0x2d   : > { %2541 = shalt.err (!%p2538_p6)
}
  0x2e   : > { %s2612_s26 = smov 128   ;;  %s2613_s27 = smov 8  }
  0x2f   : > { %2440 = dma.hbm_to_vmem [thread:$0]  (!%p2710_p13), %s2706_s30, 1024, %s2714_s4, %s2716_s6, %s2612_s26, %s2612_s26, %s2613_s27  }
  0x30   : > { %p2324_p9 = scmp.ge.s32.totalorder %s2608_s15, 1  ;;  %p111_p1 = scmp.lt.s32.totalorder %s2608_s15, 3 }
  0x32   : > { %p112_p3 = pnand %p2324_p9, %p111_p1 }
  0x34   : > { %115 = sbr.rel (%p112_p3) target bundleno = 772 (0x304), region = 24 }
  0x39   : > { %s2740_s28 = sand.u32 1, %s2600_s13   ;;  %p4041_p6 = scmp.ne.s32.totalorder %s4037_s22, 0 }
  0x3a   : > { %s2325_s29 = sshll.u32 %s2740_s28, 6  ;;  %s118_s3 = scalar_lea.sflag [#allocation6], %s2740_s28 }
  0x3b   : > { %s121_s7 = scalar_lea.vmem [#allocation5], %s2325_s29 }
  0x3c   : > { %2587 = dma.done.wait (%p4041_p6), %s118_s3, 1024  }
  0x3d   : > { %2589 = vsyncadd (%p4041_p6), %s118_s3, 4294966272  ;;  %vm238_vm0 = vcmask 179200   ;;  %v2614_v0 = vmov 0.0   ;;  %vm254_vm1 = vcmask 130048   ;;  %vm241_vm2 = vcmask 177152   ;;  %v246_v1 = vld [vmem:[%s121_s7] sm:$0xff] }
  0x3e   : > { %239 = vst.msk [vmem:[#allocation2] sm:$0xff] %vm238_vm0, %v2614_v0  ;;  %240 = vst.msk [vmem:[#allocation2 + $0x8] sm:$0xff] %vm238_vm0, %v2614_v0  ;;  %v248_v2 = vld [vmem:[%s121_s7 + $0x10] sm:$0xff]  ;;  %v250_v3 = vld [vmem:[%s121_s7 + $0x20] sm:$0xff]  ;;  %v255_v5 = vsel %vm254_vm1, %v246_v1, 0.0  ;;  %v271_v19 = vsel %vm254_vm1, %v246_v1, -inf }
  0x3f   : > { %243 = vst.msk [vmem:[#allocation2 + $0x18] sm:$0xff] %vm238_vm0, %v2614_v0  ;;  %244 = vst.msk [vmem:[#allocation2 + $0x20] sm:$0xff] %vm238_vm0, %v2614_v0  ;;  %v252_v4 = vld [vmem:[%s121_s7 + $0x30] sm:$0xff]  ;;  %v256_v6 = vsel %vm254_vm1, %v248_v2, 0.0  ;;  %v258_v7 = vsel %vm254_vm1, %v250_v3, 0.0  ;;  %v247_v8 = vld [vmem:[%s121_s7 + $0x8] sm:$0xff] }
  0x40   : > { %242 = vst.msk [vmem:[#allocation2 + $0x10] sm:$0x3f] %vm241_vm2, %v2614_v0  ;;  %245 = vst.msk [vmem:[#allocation2 + $0x28] sm:$0x3f] %vm241_vm2, %v2614_v0  ;;  %v249_v9 = vld [vmem:[%s121_s7 + $0x18] sm:$0xff]  ;;  %v257_v10 = vadd.f32 %v256_v6, %v255_v5  ;;  %v260_v11 = vsel %vm254_vm1, %v252_v4, 0.0 }
  0x41   : > { %v251_v12 = vld [vmem:[%s121_s7 + $0x28] sm:$0xff]  ;;  %v253_v13 = vld [vmem:[%s121_s7 + $0x38] sm:$0xff]  ;;  %v262_v14 = vsel %vm254_vm1, %v247_v8, 0.0  ;;  %v263_v15 = vsel %vm254_vm1, %v249_v9, 0.0  ;;  %v272_v21 = vsel %vm254_vm1, %v248_v2, -inf  ;;  %v273_v22 = vsel %vm254_vm1, %v250_v3, -inf }
  0x42   : > { %v264_v16 = vadd.f32 %v263_v15, %v262_v14  ;;  %v265_v17 = vsel %vm254_vm1, %v251_v12, 0.0  ;;  %v267_v18 = vsel %vm254_vm1, %v253_v13, 0.0  ;;  %v259_v20 = vadd.f32 %v258_v7, %v257_v10  ;;  %s2615_s22 = smov 3   ;;  %s2327_s30 = sld [smem:[#allocation4 + $0x1]] }
  0x43   : > { %v275_v23 = vsel %vm254_vm1, %v252_v4, -inf  ;;  %v274_v25 = vmax.f32 %v271_v19, %v273_v22  ;;  %v278_v27 = vsel %vm254_vm1, %v247_v8, -inf  ;;  %v279_v29 = vsel %vm254_vm1, %v249_v9, -inf  ;;  %s2328_s4 = sld [smem:[#allocation4 + $0x2]]  ;;  %s2616_s8 = smov 127  }
  0x44   : > { %v266_v24 = vadd.f32 %v265_v17, %v264_v16  ;;  %v276_v26 = vmax.f32 %v272_v21, %v275_v23  ;;  %v261_v28 = vadd.f32 %v260_v11, %v259_v20  ;;  %v280_v30 = vsel %vm254_vm1, %v251_v12, -inf  ;;  %s2329_s5 = sld [smem:[#allocation4 + $0x3]]  ;;  %s2617_s10 = smov 126  }
  0x45   : > { %v282_v31 = vsel %vm254_vm1, %v253_v13, -inf  ;;  %v281_v34 = vmax.f32 %v278_v27, %v280_v30  ;;  %vm295_vm3 = vcmask 154648   ;;  %s2330_s6 = sld [smem:[#allocation4 + $0x4]]  ;;  %s2618_s16 = smov 125   ;;  %vm523_vm4 = vcmask 1045504  }
  0x46   : > { %v268_v32 = vadd.f32 %v267_v18, %v266_v24  ;;  %v277_v33 = vmax.f32 %v274_v25, %v276_v26  ;;  %v283_v35 = vmax.f32 %v279_v29, %v282_v31  ;;  %v285_v36 = vmul.f32 0.25, %v261_v28  ;;  %s2331_s9 = sld [smem:[#allocation4 + $0x5]]  ;;  %s2619_s19 = smov 124  }
  0x47   : > { %s2332_s11 = sld [smem:[#allocation4 + $0x6]]  ;;  %s2620_s21 = smov 123   ;;  %vm822_vm5 = vcmask 1043456   ;;  %vm1121_vm6 = vcmask 1041408   ;;  %vm2193_vm7 = vcmask 1046528  }
  0x48   : > { %300 = vrot.lane.b32.xlu1 %v277_v33, %s2615_s22  ;;  %v284_v37 = vmax.f32 %v281_v34, %v283_v35  ;;  %289 = vrot.lane.b32.xlu0 %v285_v36, %s2615_s22  ;;  %v286_v38 = vmul.f32 0.25, %v268_v32  ;;  %v317_v43 = vstv %s2327_s30  ;;  %s2334_s18 = sld [smem:[#allocation4 + $0x8]]  ;;  %s2621_s26 = smov 122  }
  0x49   : > { %v330_v46 = vstv %s2328_s4  ;;  %s2335_s25 = sld [smem:[#allocation4 + $0x9]]  ;;  %p4193_p12 = scmp.ne.s32.totalorder %s4038_s23, 0 }
  0x4a   : > { %v343_v50 = vstv %s2329_s5  ;;  %s2336_s27 = sld [smem:[#allocation4 + $0xa]] }
  0x4b   : > { %v356_v53 = vstv %s2330_s6  ;;  %s2337_s29 = sld [smem:[#allocation4 + $0xb]] }
  0x4c   : > { %302 = vrot.lane.b32.xlu1 %v284_v37, %s2615_s22  ;;  %291 = vrot.lane.b32.xlu0 %v286_v38, %s2615_s22  ;;  %v369_v56 = vstv %s2331_s9  ;;  %s2338_s3 = sld [smem:[#allocation4 + $0xc]] }
  0x4d   : > { %v382_v59 = vstv %s2332_s11  ;;  %s2339_s7 = sld [smem:[#allocation4 + $0xd]] }
  0x4e   : > { %v402_v62 = vstv %s2334_s18  ;;  %s2348_s22 = sld [smem:[#allocation4 + $0x16]] }
  0x4f   : > { %v421_v4 = vstv %s2335_s25  ;;  %s2349_s30 = sld [smem:[#allocation4 + $0x17]] }
  0x50   : > { %v440_v7 = vstv %s2336_s27  ;;  %s2350_s4 = sld [smem:[#allocation4 + $0x18]] }
  0x51   : > { %v459_v12 = vstv %s2337_s29  ;;  %s2351_s5 = sld [smem:[#allocation4 + $0x19]] }
  0x52   : > { %v478_v15 = vstv %s2338_s3  ;;  %s2352_s6 = sld [smem:[#allocation4 + $0x1a]] }
  0x53   : > { %v497_v20 = vstv %s2339_s7  ;;  %s2341_s9 = sld [smem:[#allocation4 + $0xf]] }
  0x54   : > { %v2824_v21 = vstv %s2348_s22  ;;  %s2353_s11 = sld [smem:[#allocation4 + $0x1b]] }
  0x55   : > { %v2834_v25 = vstv %s2349_s30  ;;  %s2342_s18 = sld [smem:[#allocation4 + $0x10]] }
  0x56   : > { %v2836_v26 = vstv %s2350_s4  ;;  %s2343_s25 = sld [smem:[#allocation4 + $0x11]] }
  0x57   : > { %v2852_v31 = vstv %s2351_s5  ;;  %s2344_s27 = sld [smem:[#allocation4 + $0x12]] }
  0x58   : > { %v2854_v32 = vstv %s2352_s6  ;;  %s2345_s29 = sld [smem:[#allocation4 + $0x13]] }
  0x59   : > { %v533_v33 = vstv %s2341_s9  ;;  %s2346_s3 = sld [smem:[#allocation4 + $0x14]] }
  0x5a   : > { %s2355_s7 = sld [smem:[#allocation4 + $0x1d]] }
  0x5b   : > { %s2356_s22 = sld [smem:[#allocation4 + $0x1e]] }
  0x5c   : > { %s2357_s30 = sld [smem:[#allocation4 + $0x1f]] }
  0x5d   : > { %s2358_s4 = sld [smem:[#allocation4 + $0x20]] }
  0x5e   : > { %s2359_s5 = sld [smem:[#allocation4 + $0x21]] }
  0x5f   : > { %s2360_s6 = sld [smem:[#allocation4 + $0x22]] }
  0x60   : > { %s2362_s9 = sld [smem:[#allocation4 + $0x24]] }
  0xba   : > { %v301_v39 = vpop.permute.xlu1 %300  ;;  %v290_v40 = vpop.permute.xlu0 %289 }
  0xbb   : > { %307 = vst.msk [vmem:[#allocation2 + $0x1b] sm:$0xff] %vm295_vm3, %v301_v39  ;;  %296 = vst.msk [vmem:[#allocation2 + $0x3] sm:$0xff] %vm295_vm3, %v290_v40  ;;  %v2873_v39 = vstv %s2353_s11  ;;  %s2363_s11 = sld [smem:[#allocation4 + $0x25]] }
  0xbe   : > { %v303_v41 = vpop.permute.xlu1 %302  ;;  %v292_v42 = vpop.permute.xlu0 %291 }
  0xbf   : > { %308 = vst.msk [vmem:[#allocation2 + $0x23] sm:$0xff] %vm295_vm3, %v303_v41  ;;  %297 = vst.msk [vmem:[#allocation2 + $0xb] sm:$0xff] %vm295_vm3, %v292_v42  ;;  %v553_v41 = vstv %s2342_s18  ;;  %s2364_s18 = sld [smem:[#allocation4 + $0x26]] }
  0xc2   : > { %v2764_v44 = vld [vmem:[#allocation2] sm:$0xff] }
  0xc3   : > { %v318_v45 = vmul.f32 %v317_v43, %v2764_v44  ;;  %v331_v49 = vmul.f32 %v330_v46, %v2764_v44  ;;  %v344_v52 = vmul.f32 %v343_v50, %v2764_v44  ;;  %v357_v55 = vmul.f32 %v356_v53, %v2764_v44 }
  0xc4   : > { %v370_v58 = vmul.f32 %v369_v56, %v2764_v44  ;;  %v383_v61 = vmul.f32 %v382_v59, %v2764_v44  ;;  %v403_v0 = vmul.f32 %v402_v62, %v2764_v44  ;;  %v422_v5 = vmul.f32 %v421_v4, %v2764_v44 }
  0xc5   : > { %322 = vrot.lane.b32.xlu0 %v318_v45, %s2616_s8  ;;  %v441_v9 = vmul.f32 %v440_v7, %v2764_v44  ;;  %v460_v13 = vmul.f32 %v459_v12, %v2764_v44  ;;  %v479_v17 = vmul.f32 %v478_v15, %v2764_v44  ;;  %v498_v22 = vmul.f32 %v497_v20, %v2764_v44 }
  0xc6   : > { %v2768_v47 = vld [vmem:[#allocation2 + $0x8] sm:$0xff]  ;;  %v2792_v1 = vld [vmem:[#allocation2 + $0x10] sm:$0x3f]  ;;  %v534_v40 = vmul.f32 %v533_v33, %v2764_v44 }
  0xc7   : > { %v319_v48 = vmul.f32 %v317_v43, %v2768_v47  ;;  %v332_v51 = vmul.f32 %v330_v46, %v2768_v47  ;;  %v345_v54 = vmul.f32 %v343_v50, %v2768_v47  ;;  %v358_v57 = vmul.f32 %v356_v53, %v2768_v47 }
  0xc8   : > { %v371_v60 = vmul.f32 %v369_v56, %v2768_v47  ;;  %v384_v63 = vmul.f32 %v382_v59, %v2768_v47  ;;  %v404_v2 = vmul.f32 %v402_v62, %v2768_v47  ;;  %v405_v3 = vmul.f32 %v402_v62, %v2792_v1 }
  0xc9   : > { %324 = vrot.lane.b32.xlu1 %v319_v48, %s2616_s8  ;;  %335 = vrot.lane.b32.xlu0 %v331_v49, %s2617_s10  ;;  %v423_v6 = vmul.f32 %v421_v4, %v2768_v47  ;;  %v424_v8 = vmul.f32 %v421_v4, %v2792_v1  ;;  %v442_v10 = vmul.f32 %v440_v7, %v2768_v47  ;;  %v540_v50 = vrot.slane %v534_v40, 2 }
  0xca   : > { %v443_v11 = vmul.f32 %v440_v7, %v2792_v1  ;;  %v461_v14 = vmul.f32 %v459_v12, %v2768_v47  ;;  %v462_v16 = vmul.f32 %v459_v12, %v2792_v1  ;;  %v480_v18 = vmul.f32 %v478_v15, %v2768_v47 }
  0xcb   : > { %v481_v19 = vmul.f32 %v478_v15, %v2792_v1  ;;  %v499_v23 = vmul.f32 %v497_v20, %v2768_v47  ;;  %v2830_v24 = vmul.f32 %v2824_v21, %v2792_v1  ;;  %v500_v27 = vmul.f32 %v497_v20, %v2792_v1 }
  0xcc   : > { %v2842_v29 = vmul.f32 %v2834_v25, %v2792_v1  ;;  %v2846_v30 = vmul.f32 %v2836_v26, %v2792_v1  ;;  %v2860_v36 = vmul.f32 %v2852_v31, %v2792_v1  ;;  %v2864_v37 = vmul.f32 %v2854_v32, %v2792_v1 }
  0xcd   : > { %337 = vrot.lane.b32.xlu1 %v332_v51, %s2617_s10  ;;  %348 = vrot.lane.b32.xlu0 %v344_v52, %s2618_s16  ;;  %v681_v28 = vrot.slane %v2830_v24, 2  ;;  %v535_v38 = vmul.f32 %v533_v33, %v2768_v47  ;;  %v2880_v45 = vmul.f32 %v2873_v39, %v2792_v1  ;;  %v536_v46 = vmul.f32 %v533_v33, %v2792_v1 }
  0xce   : > { %v705_v34 = vrot.slane %v2842_v29, 2  ;;  %v729_v35 = vrot.slane %v2846_v30, 2  ;;  %v753_v42 = vrot.slane %v2860_v36, 2  ;;  %v777_v43 = vrot.slane %v2864_v37, 2 }
  0xcf   : > { %v541_v48 = vrot.slane %v535_v38, 2  ;;  %v555_v49 = vmul.f32 %v553_v41, %v2768_v47  ;;  %v554_v51 = vmul.f32 %v553_v41, %v2764_v44  ;;  %v801_v52 = vrot.slane %v2880_v45, 2 }
  0xd0   : > { %v543_v53 = vrot.slane %v536_v46, 2  ;;  %v769_v29 = vmul.f32 %v2854_v32, %v2768_v47 }
  0xd1   : > { %350 = vrot.lane.b32.xlu1 %v345_v54, %s2618_s16  ;;  %361 = vrot.lane.b32.xlu0 %v357_v55, %s2619_s19  ;;  %v573_v54 = vstv %s2343_s25  ;;  %v542_v55 = vsel %vm523_vm4, %v540_v50, %v541_v48  ;;  %v561_v56 = vrot.slane %v555_v49, 2  ;;  %v560_v59 = vrot.slane %v554_v51, 2  ;;  %s2365_s25 = sld [smem:[#allocation4 + $0x27]] }
  0xd2   : > { %v576_v62 = vmul.f32 %v573_v54, %v2792_v1  ;;  %v673_v49 = vmul.f32 %v2824_v21, %v2768_v47  ;;  %v672_v51 = vmul.f32 %v2824_v21, %v2764_v44  ;;  %v721_v21 = vmul.f32 %v2836_v26, %v2768_v47 }
  0xd4   : > { %v583_v7 = vrot.slane %v576_v62, 2  ;;  %v696_v62 = vmul.f32 %v2834_v25, %v2764_v44 }
  0xd5   : > { %363 = vrot.lane.b32.xlu1 %v358_v57, %s2619_s19  ;;  %374 = vrot.lane.b32.xlu0 %v370_v58, %s2620_s21  ;;  %v556_v57 = vmul.f32 %v553_v41, %v2792_v1  ;;  %v575_v58 = vmul.f32 %v573_v54, %v2768_v47 }
  0xd9   : > { %376 = vrot.lane.b32.xlu1 %v371_v60, %s2620_s21  ;;  %387 = vrot.lane.b32.xlu0 %v383_v61, %s2621_s26  ;;  %v574_v60 = vmul.f32 %v573_v54, %v2764_v44  ;;  %v544_v61 = vsel %vm523_vm4, %v541_v48, %v543_v53 }
  0xdd   : > { %389 = vrot.lane.b32.xlu1 %v384_v63, %s2621_s26  ;;  %409 = vrot.lane.b32.xlu0 %v403_v0, %s2616_s8  ;;  %v593_v63 = vstv %s2344_s27  ;;  %v562_v0 = vsel %vm523_vm4, %v560_v59, %v561_v56  ;;  %s2366_s27 = sld [smem:[#allocation4 + $0x28]] }
  0xde   : > { %v595_v4 = vmul.f32 %v593_v63, %v2768_v47 }
  0xe0   : > { %v601_v12 = vrot.slane %v595_v4, 2  ;;  %v745_v4 = vmul.f32 %v2852_v31, %v2768_v47 }
  0xe1   : > { %411 = vrot.lane.b32.xlu1 %v404_v2, %s2616_s8  ;;  %413 = vrot.lane.b32.xlu0 %v405_v3, %s2616_s8  ;;  %v563_v2 = vrot.slane %v556_v57, 2  ;;  %v581_v3 = vrot.slane %v575_v58, 2  ;;  %v697_v57 = vmul.f32 %v2834_v25, %v2768_v47  ;;  %v678_v58 = vrot.slane %v672_v51, 2 }
  0xe2   : > { %v702_v25 = vrot.slane %v696_v62, 2 }
  0xe5   : > { %428 = vrot.lane.b32.xlu1 %v422_v5, %s2617_s10  ;;  %430 = vrot.lane.b32.xlu0 %v423_v6, %s2617_s10  ;;  %v580_v5 = vrot.slane %v574_v60, 2  ;;  %v594_v6 = vmul.f32 %v593_v63, %v2764_v44 }
  0xe9   : > { %432 = vrot.lane.b32.xlu1 %v424_v8, %s2617_s10  ;;  %447 = vrot.lane.b32.xlu0 %v441_v9, %s2618_s16  ;;  %v596_v8 = vmul.f32 %v593_v63, %v2792_v1  ;;  %v613_v9 = vstv %s2345_s29  ;;  %v720_v63 = vmul.f32 %v2836_v26, %v2764_v44  ;;  %s2367_s29 = sld [smem:[#allocation4 + $0x29]] }
  0xea   : > { %v614_v15 = vmul.f32 %v613_v9, %v2764_v44 }
  0xed   : > { %449 = vrot.lane.b32.xlu1 %v442_v10, %s2618_s16  ;;  %451 = vrot.lane.b32.xlu0 %v443_v11, %s2618_s16  ;;  %v564_v10 = vsel %vm523_vm4, %v561_v56, %v563_v2  ;;  %v582_v11 = vsel %vm523_vm4, %v580_v5, %v581_v3  ;;  %v679_v56 = vrot.slane %v673_v49, 2  ;;  %v726_v5 = vrot.slane %v720_v63, 2 }
  0xef   : > { %v680_v60 = vsel %vm523_vm4, %v678_v58, %v679_v56 }
  0xf1   : > { %466 = vrot.lane.b32.xlu1 %v460_v13, %s2619_s19  ;;  %468 = vrot.lane.b32.xlu0 %v461_v14, %s2619_s19  ;;  %v615_v13 = vmul.f32 %v613_v9, %v2768_v47  ;;  %v600_v14 = vrot.slane %v594_v6, 2  ;;  %v768_v6 = vmul.f32 %v2854_v32, %v2764_v44  ;;  %v832_v32 = vstv %s2355_s7  ;;  %s2370_s7 = sld [smem:[#allocation4 + $0x2c]] }
  0xf2   : > { %v834_v36 = vmul.f32 %v832_v32, %v2768_v47 }
  0xf3   : > { %v602_v20 = vsel %vm523_vm4, %v600_v14, %v601_v12 }
  0xf5   : > { %470 = vrot.lane.b32.xlu1 %v462_v16, %s2619_s19  ;;  %485 = vrot.lane.b32.xlu0 %v479_v17, %s2620_s21  ;;  %v603_v16 = vrot.slane %v596_v8, 2  ;;  %v616_v17 = vmul.f32 %v613_v9, %v2792_v1  ;;  %v775_v9 = vrot.slane %v769_v29, 2 }
  0xf7   : > { %v604_v38 = vsel %vm523_vm4, %v601_v12, %v603_v16  ;;  %v623_v40 = vrot.slane %v616_v17, 2  ;;  %v852_v16 = vstv %s2356_s22  ;;  %v778_v17 = vsel %vm523_vm4, %v775_v9, %v777_v43  ;;  %s2371_s22 = sld [smem:[#allocation4 + $0x2d]] }
  0xf8   : > { %v855_v45 = vmul.f32 %v852_v16, %v2792_v1 }
  0xf9   : > { %487 = vrot.lane.b32.xlu1 %v480_v18, %s2620_s21  ;;  %489 = vrot.lane.b32.xlu0 %v481_v19, %s2620_s21  ;;  %v633_v18 = vstv %s2346_s3  ;;  %v584_v19 = vsel %vm523_vm4, %v581_v3, %v583_v7  ;;  %v727_v3 = vrot.slane %v721_v21, 2  ;;  %s2369_s3 = sld [smem:[#allocation4 + $0x2b]] }
  0xfa   : > { %v634_v33 = vmul.f32 %v633_v18, %v2764_v44  ;;  %v636_v48 = vmul.f32 %v633_v18, %v2792_v1 }
  0xfb   : > { %v728_v24 = vsel %vm523_vm4, %v726_v5, %v727_v3  ;;  %v730_v7 = vsel %vm523_vm4, %v727_v3, %v729_v35 }
  0xfc   : > { %v640_v50 = vrot.slane %v634_v33, 2 }
  0xfd   : > { %504 = vrot.lane.b32.xlu1 %v498_v22, %s2621_s26  ;;  %506 = vrot.lane.b32.xlu0 %v499_v23, %s2621_s26  ;;  %v621_v22 = vrot.slane %v615_v13, 2  ;;  %v635_v23 = vmul.f32 %v633_v18, %v2768_v47  ;;  %v833_v13 = vmul.f32 %v832_v32, %v2764_v44 }
  0xff   : > { %v641_v46 = vrot.slane %v635_v23, 2  ;;  %v624_v53 = vsel %vm523_vm4, %v621_v22, %v623_v40  ;;  %v853_v23 = vmul.f32 %v852_v16, %v2764_v44 }
 0x101   : > { %508 = vrot.lane.b32.xlu1 %v500_v27, %s2621_s26  ;;  %687 = vrot.lane.b32.xlu0 %v681_v28, %s2616_s8  ;;  %v620_v27 = vrot.slane %v614_v15, 2  ;;  %v642_v54 = vsel %vm523_vm4, %v640_v50, %v641_v46  ;;  %v835_v15 = vmul.f32 %v832_v32, %v2792_v1 }
 0x103   : > { %v622_v41 = vsel %vm523_vm4, %v620_v27, %v621_v22  ;;  %v839_v22 = vrot.slane %v833_v13, 4 }
 0x105   : > { %711 = vrot.lane.b32.xlu1 %v705_v34, %s2617_s10  ;;  %735 = vrot.lane.b32.xlu0 %v729_v35, %s2618_s16 }
 0x109   : > { %759 = vrot.lane.b32.xlu1 %v753_v42, %s2619_s19  ;;  %783 = vrot.lane.b32.xlu0 %v777_v43, %s2620_s21  ;;  %v842_v43 = vrot.slane %v835_v15, 4 }
 0x10d   : > { %807 = vrot.lane.b32.xlu1 %v801_v52, %s2621_s26  ;;  %545 = vrot.lane.b32.xlu0 %v542_v55, %s2616_s8  ;;  %v643_v55 = vrot.slane %v636_v48, 2 }
 0x10f   : > { %v644_v59 = vsel %vm523_vm4, %v641_v46, %v643_v55  ;;  %v859_v46 = vrot.slane %v853_v23, 4 }
 0x111   : > { %547 = vrot.lane.b32.xlu1 %v544_v61, %s2616_s8  ;;  %565 = vrot.lane.b32.xlu0 %v562_v0, %s2617_s10  ;;  %v703_v61 = vrot.slane %v697_v57, 2  ;;  %v682_v0 = vsel %vm523_vm4, %v679_v56, %v681_v28  ;;  %v751_v28 = vrot.slane %v745_v4, 2 }
 0x113   : > { %v706_v2 = vsel %vm523_vm4, %v703_v61, %v705_v34  ;;  %v704_v26 = vsel %vm523_vm4, %v702_v25, %v703_v61  ;;  %v744_v34 = vmul.f32 %v2852_v31, %v2764_v44  ;;  %v754_v8 = vsel %vm523_vm4, %v751_v28, %v753_v42 }
 0x114   : > { %v792_v42 = vmul.f32 %v2873_v39, %v2764_v44 }
 0x115   : > { %567 = vrot.lane.b32.xlu1 %v564_v10, %s2617_s10  ;;  %585 = vrot.lane.b32.xlu0 %v582_v11, %s2618_s16  ;;  %v793_v10 = vmul.f32 %v2873_v39, %v2768_v47  ;;  %v750_v31 = vrot.slane %v744_v34, 2  ;;  %v774_v11 = vrot.slane %v768_v6, 2  ;;  %v932_v6 = vstv %s2360_s6  ;;  %s3188_s6 = sld [smem:[#allocation4 + $0x32]] }
 0x116   : > { %v798_v39 = vrot.slane %v792_v42, 2  ;;  %v935_v15 = vmul.f32 %v932_v6, %v2792_v1 }
 0x117   : > { %v752_v30 = vsel %vm523_vm4, %v750_v31, %v751_v28  ;;  %v776_v35 = vsel %vm523_vm4, %v774_v11, %v775_v9  ;;  %v799_v12 = vrot.slane %v793_v10, 2  ;;  %v934_v10 = vmul.f32 %v932_v6, %v2768_v47 }
 0x118   : > { %v933_v11 = vmul.f32 %v932_v6, %v2764_v44  ;;  %v942_v23 = vrot.slane %v935_v15, 4 }
 0x119   : > { %587 = vrot.lane.b32.xlu1 %v584_v19, %s2618_s16  ;;  %605 = vrot.lane.b32.xlu0 %v602_v20, %s2619_s19  ;;  %v802_v18 = vsel %vm523_vm4, %v799_v12, %v801_v52  ;;  %v840_v19 = vrot.slane %v834_v36, 4  ;;  %v854_v20 = vmul.f32 %v852_v16, %v2768_v47  ;;  %v872_v52 = vstv %s2357_s30  ;;  %s2372_s30 = sld [smem:[#allocation4 + $0x2e]] }
 0x11a   : > { %v800_v33 = vsel %vm523_vm4, %v798_v39, %v799_v12  ;;  %v873_v48 = vmul.f32 %v872_v52, %v2764_v44  ;;  %v875_v57 = vmul.f32 %v872_v52, %v2792_v1  ;;  %v970_v36 = vstv %s2362_s9  ;;  %s3200_s9 = sld [smem:[#allocation4 + $0x33]] }
 0x11b   : > { %v860_v40 = vrot.slane %v854_v20, 4  ;;  %v843_v51 = vsel %vm822_vm5, %v840_v19, %v842_v43  ;;  %v940_v13 = vrot.slane %v934_v10, 4  ;;  %v972_v16 = vmul.f32 %v970_v36, %v2768_v47 }
 0x11c   : > { %v882_v3 = vrot.slane %v875_v57, 4  ;;  %v1018_v57 = vstv %s2364_s18  ;;  %s2379_s18 = sld [smem:[#allocation4 + $0x35]] }
 0x11d   : > { %607 = vrot.lane.b32.xlu1 %v604_v38, %s2619_s19  ;;  %625 = vrot.lane.b32.xlu0 %v622_v41, %s2620_s21  ;;  %v841_v38 = vsel %vm822_vm5, %v839_v22, %v840_v19  ;;  %v874_v41 = vmul.f32 %v872_v52, %v2768_v47  ;;  %v861_v55 = vsel %vm822_vm5, %v859_v46, %v860_v40  ;;  %v978_v43 = vrot.slane %v972_v16, 4 }
 0x11e   : > { %v943_v46 = vsel %vm822_vm5, %v940_v13, %v942_v23 }
 0x11f   : > { %v880_v56 = vrot.slane %v874_v41, 4 }
 0x121   : > { %627 = vrot.lane.b32.xlu1 %v624_v53, %s2620_s21  ;;  %645 = vrot.lane.b32.xlu0 %v642_v54, %s2621_s26  ;;  %v862_v53 = vrot.slane %v855_v45, 4  ;;  %v892_v54 = vstv %s2358_s4  ;;  %v973_v45 = vmul.f32 %v970_v36, %v2792_v1  ;;  %s2373_s4 = sld [smem:[#allocation4 + $0x2f]] }
 0x122   : > { %v894_v58 = vmul.f32 %v892_v54, %v2768_v47  ;;  %v895_v63 = vmul.f32 %v892_v54, %v2792_v1 }
 0x123   : > { %v863_v62 = vsel %vm822_vm5, %v860_v40, %v862_v53 }
 0x124   : > { %v900_v4 = vrot.slane %v894_v58, 4  ;;  %v902_v29 = vrot.slane %v895_v63, 4 }
 0x125   : > { %647 = vrot.lane.b32.xlu1 %v644_v59, %s2621_s26  ;;  %683 = vrot.lane.b32.xlu0 %v680_v60, %s2616_s8  ;;  %v879_v59 = vrot.slane %v873_v48, 4  ;;  %v893_v60 = vmul.f32 %v892_v54, %v2764_v44 }
 0x127   : > { %v899_v5 = vrot.slane %v893_v60, 4 }
 0x129   : > { %685 = vrot.lane.b32.xlu1 %v682_v0, %s2616_s8  ;;  %709 = vrot.lane.b32.xlu0 %v706_v2, %s2617_s10  ;;  %v912_v0 = vstv %s2359_s5  ;;  %v881_v2 = vsel %vm822_vm5, %v879_v59, %v880_v56  ;;  %s2374_s5 = sld [smem:[#allocation4 + $0x30]] }
 0x12a   : > { %v914_v25 = vmul.f32 %v912_v0, %v2768_v47  ;;  %v915_v34 = vmul.f32 %v912_v0, %v2792_v1 }
 0x12c   : > { %v920_v9 = vrot.slane %v914_v25, 4  ;;  %v922_v12 = vrot.slane %v915_v34, 4 }
 0x12d   : > { %707 = vrot.lane.b32.xlu1 %v704_v26, %s2617_s10  ;;  %731 = vrot.lane.b32.xlu0 %v728_v24, %s2618_s16  ;;  %v913_v26 = vmul.f32 %v912_v0, %v2764_v44  ;;  %v1019_v0 = vmul.f32 %v1018_v57, %v2764_v44 }
 0x12e   : > { %v923_v39 = vsel %vm822_vm5, %v920_v9, %v922_v12 }
 0x12f   : > { %v919_v31 = vrot.slane %v913_v26, 4  ;;  %v1021_v26 = vmul.f32 %v1018_v57, %v2792_v1 }
 0x131   : > { %733 = vrot.lane.b32.xlu1 %v730_v7, %s2618_s16  ;;  %757 = vrot.lane.b32.xlu0 %v754_v8, %s2619_s19  ;;  %v883_v7 = vsel %vm822_vm5, %v880_v56, %v882_v3  ;;  %v901_v8 = vsel %vm822_vm5, %v899_v5, %v900_v4  ;;  %v921_v42 = vsel %vm822_vm5, %v919_v31, %v920_v9  ;;  %v1028_v9 = vrot.slane %v1021_v26, 4 }
 0x135   : > { %755 = vrot.lane.b32.xlu1 %v752_v30, %s2619_s19  ;;  %779 = vrot.lane.b32.xlu0 %v776_v35, %s2620_s21  ;;  %v903_v35 = vsel %vm822_vm5, %v900_v4, %v902_v29  ;;  %v1025_v29 = vrot.slane %v1019_v0, 4 }
 0x137   : > { %v2984_v14 = vpop.permute.xlu0 %322 }
 0x139   : > { %781 = vrot.lane.b32.xlu1 %v778_v17, %s2620_s21  ;;  %805 = vrot.lane.b32.xlu0 %v802_v18, %s2621_s26  ;;  %v939_v17 = vrot.slane %v933_v11, 4  ;;  %v971_v18 = vmul.f32 %v970_v36, %v2764_v44  ;;  %v1066_v36 = vstv %s2366_s27  ;;  %s2381_s27 = sld [smem:[#allocation4 + $0x37]] }
 0x13a   : > { %v1068_v16 = vmul.f32 %v1066_v36, %v2768_v47 }
 0x13b   : > { %v2997_v27 = vpop.permute.xlu1 %324  ;;  %v2999_v37 = vpop.permute.xlu0 %335  ;;  %v941_v22 = vsel %vm822_vm5, %v939_v17, %v940_v13  ;;  %v977_v52 = vrot.slane %v971_v18, 4  ;;  %v1067_v18 = vmul.f32 %v1066_v36, %v2764_v44 }
 0x13d   : > { %803 = vrot.lane.b32.xlu1 %v800_v33, %s2621_s26  ;;  %844 = vrot.lane.b32.xlu0 %v841_v38, %s2616_s8  ;;  %v994_v33 = vstv %s2363_s11  ;;  %v979_v48 = vsel %vm822_vm5, %v977_v52, %v978_v43  ;;  %v1069_v52 = vmul.f32 %v1066_v36, %v2792_v1  ;;  %s2378_s11 = sld [smem:[#allocation4 + $0x34]] }
 0x13e   : > { %v996_v41 = vmul.f32 %v994_v33, %v2768_v47  ;;  %v997_v53 = vmul.f32 %v994_v33, %v2792_v1  ;;  %v995_v54 = vmul.f32 %v994_v33, %v2764_v44  ;;  %v1073_v33 = vrot.slane %v1067_v18, 4 }
 0x13f   : > { %v3008_v49 = vpop.permute.xlu1 %337  ;;  %v3010_v50 = vpop.permute.xlu0 %348  ;;  %v1171_v18 = vstv %s2371_s22  ;;  %s2386_s22 = sld [smem:[#allocation4 + $0x3c]] }
 0x140   : > { %v1002_v59 = vrot.slane %v996_v41, 4  ;;  %v1004_v60 = vrot.slane %v997_v53, 4  ;;  %v1001_v63 = vrot.slane %v995_v54, 4  ;;  %v1076_v53 = vrot.slane %v1069_v52, 4 }
 0x141   : > { %846 = vrot.lane.b32.xlu1 %v843_v51, %s2616_s8  ;;  %864 = vrot.lane.b32.xlu0 %v861_v55, %s2617_s10  ;;  %v980_v51 = vrot.slane %v973_v45, 4  ;;  %v1074_v45 = vrot.slane %v1068_v16, 4  ;;  %v1173_v52 = vmul.f32 %v1171_v18, %v2768_v47 }
 0x142   : > { %v1003_v4 = vsel %vm822_vm5, %v1001_v63, %v1002_v59  ;;  %v1005_v25 = vsel %vm822_vm5, %v1002_v59, %v1004_v60 }
 0x143   : > { %v3019_v61 = vpop.permute.xlu1 %350  ;;  %v3021_v21 = vpop.permute.xlu0 %361  ;;  %v981_v58 = vsel %vm822_vm5, %v978_v43, %v980_v51  ;;  %v1077_v63 = vsel %vm822_vm5, %v1074_v45, %v1076_v53 }
 0x145   : > { %866 = vrot.lane.b32.xlu1 %v863_v62, %s2617_s10  ;;  %884 = vrot.lane.b32.xlu0 %v881_v2, %s2618_s16  ;;  %v1020_v62 = vmul.f32 %v1018_v57, %v2768_v47 }
 0x147   : > { %v3030_v24 = vpop.permute.xlu1 %363  ;;  %v3032_v28 = vpop.permute.xlu0 %374  ;;  %v1026_v5 = vrot.slane %v1020_v62, 4  ;;  %v1131_v62 = vstv %s2369_s3  ;;  %s2384_s3 = sld [smem:[#allocation4 + $0x3a]] }
 0x148   : > { %v1132_v26 = vmul.f32 %v1131_v62, %v2764_v44 }
 0x149   : > { %886 = vrot.lane.b32.xlu1 %v883_v7, %s2618_s16  ;;  %904 = vrot.lane.b32.xlu0 %v901_v8, %s2619_s19  ;;  %v1042_v7 = vstv %s2365_s25  ;;  %v1027_v8 = vsel %vm822_vm5, %v1025_v29, %v1026_v5  ;;  %s2380_s25 = sld [smem:[#allocation4 + $0x36]] }
 0x14a   : > { %v1044_v10 = vmul.f32 %v1042_v7, %v2768_v47  ;;  %v1045_v31 = vmul.f32 %v1042_v7, %v2792_v1  ;;  %v1043_v11 = vmul.f32 %v1042_v7, %v2764_v44 }
 0x14b   : > { %v3041_v32 = vpop.permute.xlu1 %376  ;;  %v3043_v30 = vpop.permute.xlu0 %387 }
 0x14c   : > { %v1050_v13 = vrot.slane %v1044_v10, 4  ;;  %v1052_v15 = vrot.slane %v1045_v31, 4  ;;  %v1049_v17 = vrot.slane %v1043_v11, 4 }
 0x14d   : > { %906 = vrot.lane.b32.xlu1 %v903_v35, %s2619_s19  ;;  %924 = vrot.lane.b32.xlu0 %v921_v42, %s2620_s21  ;;  %v1029_v42 = vsel %vm822_vm5, %v1026_v5, %v1028_v9 }
 0x14e   : > { %v1051_v23 = vsel %vm822_vm5, %v1049_v17, %v1050_v13  ;;  %v1053_v43 = vsel %vm822_vm5, %v1050_v13, %v1052_v15 }
 0x14f   : > { %v3052_v19 = vpop.permute.xlu1 %389  ;;  %v3054_v20 = vpop.permute.xlu0 %409 }
 0x151   : > { %926 = vrot.lane.b32.xlu1 %v923_v39, %s2620_s21  ;;  %944 = vrot.lane.b32.xlu0 %v941_v22, %s2621_s26 }
 0x153   : > { %v3061_v38 = vpop.permute.xlu1 %411  ;;  %v3063_v40 = vpop.permute.xlu0 %413 }
 0x155   : > { %946 = vrot.lane.b32.xlu1 %v943_v46, %s2621_s26  ;;  %982 = vrot.lane.b32.xlu0 %v979_v48, %s2616_s8  ;;  %v1090_v48 = vstv %s2367_s29  ;;  %s2383_s29 = sld [smem:[#allocation4 + $0x39]] }
 0x156   : > { %v1092_v54 = vmul.f32 %v1090_v48, %v2768_v47  ;;  %v1093_v57 = vmul.f32 %v1090_v48, %v2792_v1 }
 0x157   : > { %v3072_v55 = vpop.permute.xlu1 %428  ;;  %v3074_v56 = vpop.permute.xlu0 %430 }
 0x158   : > { %v1098_v0 = vrot.slane %v1092_v54, 4 }
 0x159   : > { %984 = vrot.lane.b32.xlu1 %v981_v58, %s2616_s8  ;;  %986 = vrot.lane.b32.xlu0 %v980_v51, %s2616_s8  ;;  %v1075_v51 = vsel %vm822_vm5, %v1073_v33, %v1074_v45  ;;  %v1091_v58 = vmul.f32 %v1090_v48, %v2764_v44  ;;  %v1172_v48 = vmul.f32 %v1171_v18, %v2764_v44 }
 0x15b   : > { %v3081_v2 = vpop.permute.xlu1 %432  ;;  %v3083_v3 = vpop.permute.xlu0 %447  ;;  %v1097_v5 = vrot.slane %v1091_v58, 4  ;;  %v1191_v58 = vstv %s2372_s30  ;;  %s2387_s30 = sld [smem:[#allocation4 + $0x3d]] }
 0x15d   : > { %1006 = vrot.lane.b32.xlu1 %v1003_v4, %s2617_s10  ;;  %1008 = vrot.lane.b32.xlu0 %v1005_v25, %s2617_s10  ;;  %v1100_v4 = vrot.slane %v1093_v57, 4  ;;  %v1133_v25 = vmul.f32 %v1131_v62, %v2768_v47  ;;  %v1099_v10 = vsel %vm822_vm5, %v1097_v5, %v1098_v0  ;;  %v1174_v57 = vmul.f32 %v1171_v18, %v2792_v1 }
 0x15e   : > { %v1192_v5 = vmul.f32 %v1191_v58, %v2764_v44 }
 0x15f   : > { %v3090_v34 = vpop.permute.xlu1 %449  ;;  %v3092_v6 = vpop.permute.xlu0 %451  ;;  %v1101_v31 = vsel %vm822_vm5, %v1098_v0, %v1100_v4  ;;  %v1139_v11 = vrot.slane %v1133_v25, 6  ;;  %v1179_v0 = vrot.slane %v1173_v52, 6  ;;  %v1178_v25 = vrot.slane %v1172_v48, 6 }
 0x161   : > { %1010 = vrot.lane.b32.xlu1 %v1004_v60, %s2617_s10  ;;  %1030 = vrot.lane.b32.xlu0 %v1027_v8, %s2618_s16  ;;  %v1134_v8 = vmul.f32 %v1131_v62, %v2792_v1 }
 0x163   : > { %v3100_v35 = vpop.permute.xlu1 %466  ;;  %v3102_v12 = vpop.permute.xlu0 %468  ;;  %v1141_v17 = vrot.slane %v1134_v8, 6 }
 0x165   : > { %1032 = vrot.lane.b32.xlu1 %v1029_v42, %s2618_s16  ;;  %1034 = vrot.lane.b32.xlu0 %v1028_v9, %s2618_s16  ;;  %v1151_v9 = vstv %s2370_s7  ;;  %v1138_v42 = vrot.slane %v1132_v26, 6  ;;  %v1142_v54 = vsel %vm1121_vm6, %v1139_v11, %v1141_v17  ;;  %v1198_v17 = vrot.slane %v1192_v5, 6  ;;  %s2385_s7 = sld [smem:[#allocation4 + $0x3b]] }
 0x166   : > { %v1153_v36 = vmul.f32 %v1151_v9, %v2768_v47  ;;  %v1152_v13 = vmul.f32 %v1151_v9, %v2764_v44  ;;  %v1154_v45 = vmul.f32 %v1151_v9, %v2792_v1  ;;  %v1181_v9 = vrot.slane %v1174_v57, 6 }
 0x167   : > { %v3109_v39 = vpop.permute.xlu1 %470  ;;  %v3111_v22 = vpop.permute.xlu0 %485 }
 0x168   : > { %v1158_v33 = vrot.slane %v1152_v13, 6  ;;  %v1182_v52 = vsel %vm1121_vm6, %v1179_v0, %v1181_v9 }
 0x169   : > { %1054 = vrot.lane.b32.xlu1 %v1051_v23, %s2619_s19  ;;  %1056 = vrot.lane.b32.xlu0 %v1053_v43, %s2619_s19  ;;  %v1140_v23 = vsel %vm1121_vm6, %v1138_v42, %v1139_v11  ;;  %v1159_v43 = vrot.slane %v1153_v36, 6  ;;  %v1180_v36 = vsel %vm1121_vm6, %v1178_v25, %v1179_v0 }
 0x16b   : > { %v3118_v41 = vpop.permute.xlu1 %487  ;;  %v3120_v46 = vpop.permute.xlu0 %489  ;;  %v1160_v62 = vsel %vm1121_vm6, %v1158_v33, %v1159_v43 }
 0x16d   : > { %1058 = vrot.lane.b32.xlu1 %v1052_v15, %s2619_s19  ;;  %1078 = vrot.lane.b32.xlu0 %v1075_v51, %s2620_s21 }
 0x16f   : > { %v3128_v59 = vpop.permute.xlu1 %504  ;;  %v3130_v60 = vpop.permute.xlu0 %506 }
 0x170   : > { %4042 = vst [vmem:[#allocation12_spill] sm:$0xff] %v3128_v59 }
 0x171   : > { %1080 = vrot.lane.b32.xlu1 %v1077_v63, %s2620_s21  ;;  %1082 = vrot.lane.b32.xlu0 %v1076_v53, %s2620_s21  ;;  %v1161_v63 = vrot.slane %v1154_v45, 6 }
 0x173   : > { %v3137_v29 = vpop.permute.xlu1 %508  ;;  %v3139_v7 = vpop.permute.xlu0 %687  ;;  %v1162_v11 = vsel %vm1121_vm6, %v1159_v43, %v1161_v63  ;;  %v1231_v43 = vstv %s2374_s5  ;;  %s2388_s5 = sld [smem:[#allocation4 + $0x3e]] }
 0x174   : > { %4043 = vst [vmem:[#allocation13_spill] sm:$0xff] %v3139_v7  ;;  %v1232_v63 = vmul.f32 %v1231_v43, %v2764_v44  ;;  %v1234_v25 = vmul.f32 %v1231_v43, %v2792_v1 }
 0x175   : > { %1102 = vrot.lane.b32.xlu1 %v1099_v10, %s2621_s26  ;;  %1104 = vrot.lane.b32.xlu0 %v1101_v31, %s2621_s26  ;;  %v1194_v10 = vmul.f32 %v1191_v58, %v2792_v1  ;;  %v1211_v31 = vstv %s2373_s4  ;;  %s2390_s4 = sld [smem:[#allocation4 + $0x40]] }
 0x176   : > { %v1213_v13 = vmul.f32 %v1211_v31, %v2768_v47  ;;  %v1212_v18 = vmul.f32 %v1211_v31, %v2764_v44  ;;  %v1214_v57 = vmul.f32 %v1211_v31, %v2792_v1  ;;  %v1238_v44 = vrot.slane %v1232_v63, 6 }
 0x177   : > { %v3148_v15 = vpop.permute.xlu1 %711  ;;  %v3150_v16 = vpop.permute.xlu0 %735  ;;  %v1201_v33 = vrot.slane %v1194_v10, 6 }
 0x178   : > { %4044 = vst [vmem:[#allocation14_spill] sm:$0xff] %v3148_v15  ;;  %4045 = vst [vmem:[#allocation15_spill] sm:$0xff] %v3150_v16  ;;  %v1221_v9 = vrot.slane %v1214_v57, 6 }
 0x179   : > { %1106 = vrot.lane.b32.xlu1 %v1100_v4, %s2621_s26  ;;  %1143 = vrot.lane.b32.xlu0 %v1140_v23, %s2616_s8  ;;  %v1193_v4 = vmul.f32 %v1191_v58, %v2768_v47  ;;  %v1233_v58 = vmul.f32 %v1231_v43, %v2768_v47  ;;  %v3220_v43 = vld [vmem:[#allocation2 + $0x20] sm:$0xff] }
 0x17b   : > { %v3158_v51 = vpop.permute.xlu1 %759  ;;  %v3160_v53 = vpop.permute.xlu0 %783  ;;  %v1199_v42 = vrot.slane %v1193_v4, 6  ;;  %v1239_v10 = vrot.slane %v1233_v58, 6 }
 0x17c   : > { %4046 = vst [vmem:[#allocation16_spill] sm:$0xff] %v3158_v51  ;;  %4047 = vst [vmem:[#allocation17_spill] sm:$0xff] %v3160_v53 }
 0x17d   : > { %1145 = vrot.lane.b32.xlu1 %v1142_v54, %s2616_s8  ;;  %1163 = vrot.lane.b32.xlu0 %v1160_v62, %s2617_s10  ;;  %v1200_v48 = vsel %vm1121_vm6, %v1198_v17, %v1199_v42  ;;  %v1219_v54 = vrot.slane %v1213_v13, 6  ;;  %v1218_v62 = vrot.slane %v1212_v18, 6  ;;  %v1202_v5 = vsel %vm1121_vm6, %v1199_v42, %v1201_v33 }
 0x17e   : > { %v1240_v42 = vsel %vm1121_vm6, %v1238_v44, %v1239_v10  ;;  %v1241_v13 = vrot.slane %v1234_v25, 6  ;;  %v1259_v17 = vstv %s3188_s6  ;;  %v1285_v25 = vstv %s2378_s11  ;;  %s2391_s6 = sld [smem:[#allocation4 + $0x41]] }
 0x17f   : > { %v3169_v26 = vpop.permute.xlu1 %807  ;;  %v3171_v8 = vpop.permute.xlu0 %545  ;;  %v1220_v47 = vsel %vm1121_vm6, %v1218_v62, %v1219_v54  ;;  %v1222_v1 = vsel %vm1121_vm6, %v1219_v54, %v1221_v9  ;;  %v1272_v54 = vstv %s3200_s9  ;;  %v1261_v62 = vmul.f32 %v1259_v17, %v3220_v43  ;;  %s2392_s9 = sld [smem:[#allocation4 + $0x42]] }
 0x180   : > { %4048 = vst [vmem:[#allocation18_spill] sm:$0xff] %v3169_v26  ;;  %v1274_v9 = vmul.f32 %v1272_v54, %v3220_v43  ;;  %v1298_v44 = vstv %s2379_s18  ;;  %v1344_v26 = vstv %s2383_s29  ;;  %s2393_s11 = sld [smem:[#allocation4 + $0x43]] }
 0x181   : > { %1165 = vrot.lane.b32.xlu1 %v1162_v11, %s2617_s10  ;;  %1183 = vrot.lane.b32.xlu0 %v1180_v36, %s2618_s16  ;;  %v3208_v36 = vld [vmem:[#allocation2 + $0x18] sm:$0xff]  ;;  %s2394_s18 = sld [smem:[#allocation4 + $0x44]] }
 0x182   : > { %v1260_v33 = vmul.f32 %v1259_v17, %v3208_v36  ;;  %v1273_v63 = vmul.f32 %v1272_v54, %v3208_v36  ;;  %v1299_v17 = vmul.f32 %v1298_v44, %v3208_v36  ;;  %s2398_s29 = sld [smem:[#allocation4 + $0x48]] }
 0x183   : > { %v3180_v23 = vpop.permute.xlu1 %547  ;;  %v3182_v45 = vpop.permute.xlu0 %565 }
 0x184   : > { %4049 = vst [vmem:[#allocation19_spill] sm:$0xff] %v3180_v23 }
 0x185   : > { %1185 = vrot.lane.b32.xlu1 %v1182_v52, %s2618_s16  ;;  %1203 = vrot.lane.b32.xlu0 %v1200_v48, %s2619_s19  ;;  %v1242_v48 = vsel %vm1121_vm6, %v1239_v10, %v1241_v13  ;;  %v1286_v10 = vmul.f32 %v1285_v25, %v3208_v36  ;;  %v1287_v13 = vmul.f32 %v1285_v25, %v3220_v43 }
 0x187   : > { %v3193_v4 = vpop.permute.xlu1 %567  ;;  %v3195_v0 = vpop.permute.xlu0 %585 }
 0x188   : > { %4050 = vst [vmem:[#allocation20_spill] sm:$0xff] %v3193_v4  ;;  %4051 = vst [vmem:[#allocation21_spill] sm:$0xff] %v3195_v0 }
 0x189   : > { %1205 = vrot.lane.b32.xlu1 %v1202_v5, %s2619_s19  ;;  %1223 = vrot.lane.b32.xlu0 %v1220_v47, %s2620_s21 }
 0x18b   : > { %v3204_v31 = vpop.permute.xlu1 %587  ;;  %v3206_v11 = vpop.permute.xlu0 %605 }
 0x18c   : > { %4052 = vst [vmem:[#allocation22_spill] sm:$0xff] %v3204_v31  ;;  %4053 = vst [vmem:[#allocation23_spill] sm:$0xff] %v3206_v11 }
 0x18d   : > { %1225 = vrot.lane.b32.xlu1 %v1222_v1, %s2620_s21  ;;  %1243 = vrot.lane.b32.xlu0 %v1240_v42, %s2621_s26 }
 0x18f   : > { %v3215_v18 = vpop.permute.xlu1 %607  ;;  %v3217_v52 = vpop.permute.xlu0 %625 }
 0x190   : > { %4054 = vst [vmem:[#allocation24_spill] sm:$0xff] %v3215_v18  ;;  %4055 = vst [vmem:[#allocation25_spill] sm:$0xff] %v3217_v52 }
 0x191   : > { %1245 = vrot.lane.b32.xlu1 %v1242_v48, %s2621_s26  ;;  %1264 = vrot.lane.b32.xlu0 %v1260_v33, %s2616_s8  ;;  %v1311_v33 = vstv %s2380_s25  ;;  %s2395_s25 = sld [smem:[#allocation4 + $0x45]] }
 0x193   : > { %v3226_v57 = vpop.permute.xlu1 %627  ;;  %v3228_v58 = vpop.permute.xlu0 %645 }
 0x194   : > { %4056 = vst [vmem:[#allocation26_spill] sm:$0xff] %v3226_v57  ;;  %4057 = vst [vmem:[#allocation27_spill] sm:$0xff] %v3228_v58 }
 0x195   : > { %1266 = vrot.lane.b32.xlu1 %v1261_v62, %s2616_s8  ;;  %1277 = vrot.lane.b32.xlu0 %v1273_v63, %s2617_s10  ;;  %v1300_v62 = vmul.f32 %v1298_v44, %v3220_v43  ;;  %v1312_v63 = vmul.f32 %v1311_v33, %v3208_v36 }
 0x197   : > { %v3234_v5 = vpop.permute.xlu1 %647  ;;  %v3236_v47 = vpop.permute.xlu0 %683 }
 0x198   : > { %4058 = vst [vmem:[#allocation28_spill] sm:$0xff] %v3234_v5  ;;  %4059 = vst [vmem:[#allocation29_spill] sm:$0xff] %v3236_v47  ;;  %v1514_v5 = vstv %s2392_s9  ;;  %s2407_s9 = sld [smem:[#allocation4 + $0x51]] }
 0x199   : > { %1279 = vrot.lane.b32.xlu1 %v1274_v9, %s2617_s10  ;;  %1290 = vrot.lane.b32.xlu0 %v1286_v10, %s2618_s16  ;;  %v1324_v9 = vstv %s2381_s27  ;;  %s2397_s27 = sld [smem:[#allocation4 + $0x47]] }
 0x19b   : > { %v3242_v1 = vpop.permute.xlu1 %685  ;;  %v3244_v42 = vpop.permute.xlu0 %709 }
 0x19c   : > { %4060 = vst [vmem:[#allocation30_spill] sm:$0xff] %v3242_v1  ;;  %4061 = vst [vmem:[#allocation31_spill] sm:$0xff] %v3244_v42 }
 0x19d   : > { %1292 = vrot.lane.b32.xlu1 %v1287_v13, %s2618_s16  ;;  %1303 = vrot.lane.b32.xlu0 %v1299_v17, %s2619_s19  ;;  %v1313_v13 = vmul.f32 %v1311_v33, %v3220_v43  ;;  %v1325_v17 = vmul.f32 %v1324_v9, %v3208_v36  ;;  %v3274_v33 = vld [vmem:[#allocation2 + $0x28] sm:$0x3f] }
 0x19f   : > { %v3250_v48 = vpop.permute.xlu1 %707  ;;  %v3252_v54 = vpop.permute.xlu0 %731 }
 0x1a0   : > { %4062 = vst [vmem:[#allocation32_spill] sm:$0xff] %v3250_v48  ;;  %4063 = vst [vmem:[#allocation33_spill] sm:$0xff] %v3252_v54 }
 0x1a1   : > { %1305 = vrot.lane.b32.xlu1 %v1300_v62, %s2619_s19  ;;  %1316 = vrot.lane.b32.xlu0 %v1312_v63, %s2620_s21  ;;  %v1326_v62 = vmul.f32 %v1324_v9, %v3220_v43  ;;  %v1345_v63 = vmul.f32 %v1344_v26, %v3208_v36 }
 0x1a3   : > { %v3258_v25 = vpop.permute.xlu1 %733  ;;  %v3260_v10 = vpop.permute.xlu0 %757 }
 0x1a4   : > { %4064 = vst [vmem:[#allocation34_spill] sm:$0xff] %v3258_v25  ;;  %4065 = vst [vmem:[#allocation35_spill] sm:$0xff] %v3260_v10 }
 0x1a5   : > { %1318 = vrot.lane.b32.xlu1 %v1313_v13, %s2620_s21  ;;  %1329 = vrot.lane.b32.xlu0 %v1325_v17, %s2621_s26  ;;  %v1346_v17 = vmul.f32 %v1344_v26, %v3220_v43 }
 0x1a7   : > { %v3266_v44 = vpop.permute.xlu1 %755  ;;  %v3268_v53 = vpop.permute.xlu0 %779 }
 0x1a8   : > { %4066 = vst [vmem:[#allocation36_spill] sm:$0xff] %v3266_v44  ;;  %4067 = vst [vmem:[#allocation37_spill] sm:$0xff] %v3268_v53  ;;  %v1347_v44 = vmul.f32 %v1344_v26, %v3274_v33  ;;  %v1363_v53 = vstv %s2384_s3  ;;  %s2404_s3 = sld [smem:[#allocation4 + $0x4e]] }
 0x1a9   : > { %1331 = vrot.lane.b32.xlu1 %v1326_v62, %s2621_s26  ;;  %1351 = vrot.lane.b32.xlu0 %v1345_v63, %s2616_s8  ;;  %v1364_v63 = vmul.f32 %v1363_v53, %v3208_v36  ;;  %v1365_v54 = vmul.f32 %v1363_v53, %v3220_v43 }
 0x1ab   : > { %v3276_v10 = vpop.permute.xlu1 %781  ;;  %v3278_v13 = vpop.permute.xlu0 %805 }
 0x1ac   : > { %4068 = vst [vmem:[#allocation38_spill] sm:$0xff] %v3276_v10  ;;  %4069 = vst [vmem:[#allocation39_spill] sm:$0xff] %v3278_v13  ;;  %v1382_v10 = vstv %s2385_s7  ;;  %s2399_s7 = sld [smem:[#allocation4 + $0x49]] }
 0x1ad   : > { %1353 = vrot.lane.b32.xlu1 %v1346_v17, %s2616_s8  ;;  %1355 = vrot.lane.b32.xlu0 %v1347_v44, %s2616_s8  ;;  %v1366_v44 = vmul.f32 %v1363_v53, %v3274_v33  ;;  %v1383_v17 = vmul.f32 %v1382_v10, %v3208_v36 }
 0x1af   : > { %v3284_v9 = vpop.permute.xlu1 %803  ;;  %v3286_v62 = vpop.permute.xlu0 %844 }
 0x1b0   : > { %4070 = vst [vmem:[#allocation40_spill] sm:$0xff] %v3284_v9  ;;  %4071 = vst [vmem:[#allocation41_spill] sm:$0xff] %v3286_v62 }
 0x1b1   : > { %1370 = vrot.lane.b32.xlu1 %v1364_v63, %s2617_s10  ;;  %1372 = vrot.lane.b32.xlu0 %v1365_v54, %s2617_s10  ;;  %v1384_v63 = vmul.f32 %v1382_v10, %v3220_v43  ;;  %v1385_v54 = vmul.f32 %v1382_v10, %v3274_v33 }
 0x1b3   : > { %v3292_v26 = vpop.permute.xlu1 %846  ;;  %v3294_v13 = vpop.permute.xlu0 %864 }
 0x1b4   : > { %4072 = vst [vmem:[#allocation42_spill] sm:$0xff] %v3292_v26  ;;  %4073 = vst [vmem:[#allocation43_spill] sm:$0xff] %v3294_v13  ;;  %v1401_v26 = vstv %s2386_s22  ;;  %s2405_s22 = sld [smem:[#allocation4 + $0x4f]] }
 0x1b5   : > { %1374 = vrot.lane.b32.xlu1 %v1366_v44, %s2617_s10  ;;  %1389 = vrot.lane.b32.xlu0 %v1383_v17, %s2618_s16  ;;  %v1402_v44 = vmul.f32 %v1401_v26, %v3208_v36  ;;  %v1403_v17 = vmul.f32 %v1401_v26, %v3220_v43 }
 0x1b7   : > { %v3300_v9 = vpop.permute.xlu1 %866  ;;  %v3302_v62 = vpop.permute.xlu0 %884 }
 0x1b8   : > { %4074 = vst [vmem:[#allocation44_spill] sm:$0xff] %v3300_v9  ;;  %4075 = vst [vmem:[#allocation45_spill] sm:$0xff] %v3302_v62  ;;  %v1420_v9 = vstv %s2387_s30  ;;  %s2400_s30 = sld [smem:[#allocation4 + $0x4a]] }
 0x1b9   : > { %1391 = vrot.lane.b32.xlu1 %v1384_v63, %s2618_s16  ;;  %1393 = vrot.lane.b32.xlu0 %v1385_v54, %s2618_s16  ;;  %v1404_v54 = vmul.f32 %v1401_v26, %v3274_v33 }
 0x1bb   : > { %v3308_v53 = vpop.permute.xlu1 %886  ;;  %v3310_v13 = vpop.permute.xlu0 %904 }
 0x1bc   : > { %4076 = vst [vmem:[#allocation46_spill] sm:$0xff] %v3308_v53  ;;  %4077 = vst [vmem:[#allocation47_spill] sm:$0xff] %v3310_v13  ;;  %v1421_v53 = vmul.f32 %v1420_v9, %v3208_v36  ;;  %v1474_v13 = vstv %s2390_s4  ;;  %s2406_s4 = sld [smem:[#allocation4 + $0x50]] }
 0x1bd   : > { %1408 = vrot.lane.b32.xlu1 %v1402_v44, %s2619_s19  ;;  %1410 = vrot.lane.b32.xlu0 %v1403_v17, %s2619_s19  ;;  %v1422_v17 = vmul.f32 %v1420_v9, %v3220_v43  ;;  %v1475_v26 = vmul.f32 %v1474_v13, %v3208_v36  ;;  %v1476_v51 = vmul.f32 %v1474_v13, %v3220_v43 }
 0x1bf   : > { %v3316_v10 = vpop.permute.xlu1 %906  ;;  %v3318_v63 = vpop.permute.xlu0 %924  ;;  %v1481_v48 = vrot.slane %v1475_v26, 2  ;;  %v1482_v42 = vrot.slane %v1476_v51, 2  ;;  %v1515_v51 = vmul.f32 %v1514_v5, %v3208_v36  ;;  %v1534_v26 = vstv %s2393_s11  ;;  %s2402_s11 = sld [smem:[#allocation4 + $0x4c]] }
 0x1c0   : > { %4078 = vst [vmem:[#allocation48_spill] sm:$0xff] %v3316_v10  ;;  %4079 = vst [vmem:[#allocation49_spill] sm:$0xff] %v3318_v63  ;;  %v1423_v10 = vmul.f32 %v1420_v9, %v3274_v33  ;;  %v1439_v63 = vstv %s2388_s5  ;;  %v1477_v9 = vmul.f32 %v1474_v13, %v3274_v33  ;;  %v1537_v52 = vmul.f32 %v1534_v26, %v3274_v33  ;;  %s2401_s5 = sld [smem:[#allocation4 + $0x4b]] }
 0x1c1   : > { %1412 = vrot.lane.b32.xlu1 %v1404_v54, %s2619_s19  ;;  %1427 = vrot.lane.b32.xlu0 %v1421_v53, %s2620_s21  ;;  %v1494_v53 = vstv %s2391_s6  ;;  %v1441_v25 = vmul.f32 %v1439_v63, %v3220_v43  ;;  %v1483_v58 = vsel %vm523_vm4, %v1481_v48, %v1482_v42  ;;  %s3469_s6 = sld [smem:[#allocation4 + $0x31]] }
 0x1c2   : > { %v1495_v57 = vmul.f32 %v1494_v53, %v3208_v36  ;;  %v1484_v16 = vrot.slane %v1477_v9, 2  ;;  %v1497_v13 = vmul.f32 %v1494_v53, %v3274_v33 }
 0x1c3   : > { %v3324_v62 = vpop.permute.xlu1 %926  ;;  %v3326_v44 = vpop.permute.xlu0 %944 }
 0x1c4   : > { %4080 = vst [vmem:[#allocation50_spill] sm:$0xff] %v3324_v62  ;;  %4081 = vst [vmem:[#allocation51_spill] sm:$0xff] %v3326_v44  ;;  %v1440_v44 = vmul.f32 %v1439_v63, %v3208_v36  ;;  %v1501_v47 = vrot.slane %v1495_v57, 2  ;;  %v1536_v57 = vmul.f32 %v1534_v26, %v3220_v43 }
 0x1c5   : > { %1429 = vrot.lane.b32.xlu1 %v1422_v17, %s2620_s21  ;;  %1431 = vrot.lane.b32.xlu0 %v1423_v10, %s2620_s21  ;;  %v1496_v17 = vmul.f32 %v1494_v53, %v3220_v43  ;;  %v1442_v10 = vmul.f32 %v1439_v63, %v3274_v33  ;;  %v1485_v53 = vsel %vm523_vm4, %v1482_v42, %v1484_v16 }
 0x1c6   : > { %v1542_v42 = vrot.slane %v1536_v57, 2 }
 0x1c7   : > { %v3334_v54 = vpop.permute.xlu1 %946  ;;  %v3336_v62 = vpop.permute.xlu0 %982  ;;  %v1502_v18 = vrot.slane %v1496_v17, 2  ;;  %v1504_v17 = vrot.slane %v1497_v13, 2 }
 0x1c8   : > { %4082 = vst [vmem:[#allocation52_spill] sm:$0xff] %v3334_v54  ;;  %4083 = vst [vmem:[#allocation53_spill] sm:$0xff] %v3336_v62 }
 0x1c9   : > { %1446 = vrot.lane.b32.xlu1 %v1440_v44, %s2621_s26  ;;  %1448 = vrot.lane.b32.xlu0 %v1441_v25, %s2621_s26  ;;  %v1516_v44 = vmul.f32 %v1514_v5, %v3220_v43  ;;  %v1517_v25 = vmul.f32 %v1514_v5, %v3274_v33  ;;  %v1503_v48 = vsel %vm523_vm4, %v1501_v47, %v1502_v18 }
 0x1ca   : > { %v1505_v1 = vsel %vm523_vm4, %v1502_v18, %v1504_v17  ;;  %v1544_v18 = vrot.slane %v1537_v52, 2 }
 0x1cb   : > { %v3346_v62 = vpop.permute.xlu1 %984  ;;  %v3348_v54 = vpop.permute.xlu0 %986  ;;  %v1524_v5 = vrot.slane %v1517_v25, 2 }
 0x1cc   : > { %4084 = vst [vmem:[#allocation54_spill] sm:$0xff] %v3346_v62  ;;  %4085 = vst [vmem:[#allocation55_spill] sm:$0xff] %v3348_v54  ;;  %v1535_v54 = vmul.f32 %v1534_v26, %v3208_v36  ;;  %v1522_v62 = vrot.slane %v1516_v44, 2  ;;  %v1574_v44 = vstv %s2395_s25  ;;  %v1545_v52 = vsel %vm523_vm4, %v1542_v42, %v1544_v18  ;;  %s3505_s25 = sld [smem:[#allocation4 + $0x53]] }
 0x1cd   : > { %1450 = vrot.lane.b32.xlu1 %v1442_v10, %s2621_s26  ;;  %1486 = vrot.lane.b32.xlu0 %v1483_v58, %s2616_s8  ;;  %v1521_v10 = vrot.slane %v1515_v51, 2  ;;  %v1554_v58 = vstv %s2394_s18  ;;  %s2408_s18 = sld [smem:[#allocation4 + $0x52]] }
 0x1ce   : > { %v1541_v16 = vrot.slane %v1535_v54, 2  ;;  %v1555_v13 = vmul.f32 %v1554_v58, %v3208_v36  ;;  %v1556_v51 = vmul.f32 %v1554_v58, %v3220_v43  ;;  %v1525_v25 = vsel %vm523_vm4, %v1522_v62, %v1524_v5 }
 0x1cf   : > { %v3357_v63 = vpop.permute.xlu1 %1006  ;;  %v3359_v9 = vpop.permute.xlu0 %1008  ;;  %v1523_v47 = vsel %vm523_vm4, %v1521_v10, %v1522_v62  ;;  %v1557_v57 = vmul.f32 %v1554_v58, %v3274_v33  ;;  %v1577_v58 = vmul.f32 %v1574_v44, %v3274_v33 }
 0x1d0   : > { %4086 = vst [vmem:[#allocation56_spill] sm:$0xff] %v3357_v63  ;;  %4087 = vst [vmem:[#allocation57_spill] sm:$0xff] %v3359_v9  ;;  %v1543_v26 = vsel %vm523_vm4, %v1541_v16, %v1542_v42  ;;  %v1561_v17 = vrot.slane %v1555_v13, 2  ;;  %v1562_v10 = vrot.slane %v1556_v51, 2 }
 0x1d1   : > { %1488 = vrot.lane.b32.xlu1 %v1485_v53, %s2616_s8  ;;  %1506 = vrot.lane.b32.xlu0 %v1503_v48, %s2617_s10  ;;  %v1612_v48 = vstv %s2397_s27  ;;  %v1564_v51 = vrot.slane %v1557_v57, 2  ;;  %v1584_v42 = vrot.slane %v1577_v58, 2  ;;  %s3516_s27 = sld [smem:[#allocation4 + $0x55]] }
 0x1d2   : > { %v1613_v16 = vmul.f32 %v1612_v48, %v3208_v36  ;;  %v1563_v13 = vsel %vm523_vm4, %v1561_v17, %v1562_v10 }
 0x1d3   : > { %v3367_v63 = vpop.permute.xlu1 %1010  ;;  %v3369_v9 = vpop.permute.xlu0 %1030 }
 0x1d4   : > { %4088 = vst [vmem:[#allocation58_spill] sm:$0xff] %v3367_v63  ;;  %4089 = vst [vmem:[#allocation59_spill] sm:$0xff] %v3369_v9  ;;  %v1575_v9 = vmul.f32 %v1574_v44, %v3208_v36 }
 0x1d5   : > { %1508 = vrot.lane.b32.xlu1 %v1505_v1, %s2617_s10  ;;  %1526 = vrot.lane.b32.xlu0 %v1523_v47, %s2618_s16  ;;  %v1576_v1 = vmul.f32 %v1574_v44, %v3220_v43  ;;  %v1614_v47 = vmul.f32 %v1612_v48, %v3220_v43  ;;  %v1619_v44 = vrot.slane %v1613_v16, 2 }
 0x1d7   : > { %v3379_v53 = vpop.permute.xlu1 %1032  ;;  %v3381_v54 = vpop.permute.xlu0 %1034  ;;  %v1620_v18 = vrot.slane %v1614_v47, 2 }
 0x1d8   : > { %4090 = vst [vmem:[#allocation60_spill] sm:$0xff] %v3379_v53  ;;  %4091 = vst [vmem:[#allocation61_spill] sm:$0xff] %v3381_v54  ;;  %v1581_v54 = vrot.slane %v1575_v9, 2  ;;  %v1565_v53 = vsel %vm523_vm4, %v1562_v10, %v1564_v51  ;;  %v1636_v9 = vstv %s2398_s29  ;;  %s3525_s29 = sld [smem:[#allocation4 + $0x38]] }
 0x1d9   : > { %1528 = vrot.lane.b32.xlu1 %v1525_v25, %s2618_s16  ;;  %1546 = vrot.lane.b32.xlu0 %v1543_v26, %s2619_s19  ;;  %v1582_v25 = vrot.slane %v1576_v1, 2  ;;  %v1621_v58 = vsel %vm523_vm4, %v1619_v44, %v1620_v18  ;;  %v1638_v10 = vmul.f32 %v1636_v9, %v3220_v43 }
 0x1db   : > { %v3389_v62 = vpop.permute.xlu1 %1054  ;;  %v3391_v5 = vpop.permute.xlu0 %1056  ;;  %v1583_v57 = vsel %vm523_vm4, %v1581_v54, %v1582_v25  ;;  %v1639_v54 = vmul.f32 %v1636_v9, %v3274_v33  ;;  %v1644_v44 = vrot.slane %v1638_v10, 2 }
 0x1dc   : > { %4092 = vst [vmem:[#allocation62_spill] sm:$0xff] %v3389_v62  ;;  %4093 = vst [vmem:[#allocation63_spill] sm:$0xff] %v3391_v5  ;;  %v1615_v62 = vmul.f32 %v1612_v48, %v3274_v33  ;;  %v1637_v48 = vmul.f32 %v1636_v9, %v3208_v36  ;;  %v1660_v9 = vstv %s2399_s7  ;;  %s2418_s7 = sld [smem:[#allocation4 + $0x5c]] }
 0x1dd   : > { %1548 = vrot.lane.b32.xlu1 %v1545_v52, %s2619_s19  ;;  %1566 = vrot.lane.b32.xlu0 %v1563_v13, %s2620_s21  ;;  %v1585_v52 = vsel %vm523_vm4, %v1582_v25, %v1584_v42  ;;  %v1662_v10 = vmul.f32 %v1660_v9, %v3220_v43 }
 0x1de   : > { %v1622_v16 = vrot.slane %v1615_v62, 2  ;;  %v1643_v42 = vrot.slane %v1637_v48, 2  ;;  %v1661_v48 = vmul.f32 %v1660_v9, %v3208_v36 }
 0x1df   : > { %v3400_v26 = vpop.permute.xlu1 %1058  ;;  %v3402_v5 = vpop.permute.xlu0 %1078 }
 0x1e0   : > { %4094 = vst [vmem:[#allocation64_spill] sm:$0xff] %v3400_v26  ;;  %4095 = vst [vmem:[#allocation65_spill] sm:$0xff] %v3402_v5  ;;  %v1623_v62 = vsel %vm523_vm4, %v1620_v18, %v1622_v16 }
 0x1e1   : > { %1568 = vrot.lane.b32.xlu1 %v1565_v53, %s2620_s21  ;;  %1586 = vrot.lane.b32.xlu0 %v1583_v57, %s2621_s26  ;;  %v1772_v53 = vstv %s2404_s3  ;;  %v1646_v57 = vrot.slane %v1639_v54, 2  ;;  %s2412_s3 = sld [smem:[#allocation4 + $0x56]] }
 0x1e2   : > { %v1773_v51 = vmul.f32 %v1772_v53, %v3208_v36  ;;  %v1774_v25 = vmul.f32 %v1772_v53, %v3220_v43 }
 0x1e3   : > { %v3409_v17 = vpop.permute.xlu1 %1080  ;;  %v3411_v1 = vpop.permute.xlu0 %1082  ;;  %v1647_v18 = vsel %vm523_vm4, %v1644_v44, %v1646_v57 }
 0x1e4   : > { %4096 = vst [vmem:[#allocation66_spill] sm:$0xff] %v3409_v17  ;;  %4097 = vst [vmem:[#allocation67_spill] sm:$0xff] %v3411_v1  ;;  %v1779_v1 = vrot.slane %v1773_v51, 4  ;;  %v1645_v17 = vsel %vm523_vm4, %v1643_v42, %v1644_v44  ;;  %v1668_v42 = vrot.slane %v1662_v10, 2  ;;  %v1663_v44 = vmul.f32 %v1660_v9, %v3274_v33 }
 0x1e5   : > { %1588 = vrot.lane.b32.xlu1 %v1585_v52, %s2621_s26  ;;  %1624 = vrot.lane.b32.xlu0 %v1621_v58, %s2616_s8 }
 0x1e7   : > { %v3420_v47 = vpop.permute.xlu1 %1102  ;;  %v3422_v13 = vpop.permute.xlu0 %1104 }
 0x1e8   : > { %4098 = vst [vmem:[#allocation68_spill] sm:$0xff] %v3420_v47  ;;  %4099 = vst [vmem:[#allocation69_spill] sm:$0xff] %v3422_v13  ;;  %v1780_v13 = vrot.slane %v1774_v25, 4  ;;  %v1775_v47 = vmul.f32 %v1772_v53, %v3274_v33  ;;  %v1792_v25 = vstv %s2405_s22  ;;  %s3551_s22 = sld [smem:[#allocation4 + $0x57]] }
 0x1e9   : > { %1626 = vrot.lane.b32.xlu1 %v1623_v62, %s2616_s8  ;;  %1628 = vrot.lane.b32.xlu0 %v1622_v16, %s2616_s8  ;;  %v1667_v62 = vrot.slane %v1661_v48, 2  ;;  %v1670_v48 = vrot.slane %v1663_v44, 2  ;;  %v1794_v10 = vmul.f32 %v1792_v25, %v3220_v43  ;;  %v1795_v9 = vmul.f32 %v1792_v25, %v3274_v33 }
 0x1ea   : > { %v1782_v51 = vrot.slane %v1775_v47, 4  ;;  %v1781_v53 = vsel %vm822_vm5, %v1779_v1, %v1780_v13  ;;  %v1793_v47 = vmul.f32 %v1792_v25, %v3208_v36 }
 0x1eb   : > { %v3429_v52 = vpop.permute.xlu1 %1106  ;;  %v3431_v58 = vpop.permute.xlu0 %1143  ;;  %v1669_v1 = vsel %vm523_vm4, %v1667_v62, %v1668_v42  ;;  %v1671_v44 = vsel %vm523_vm4, %v1668_v42, %v1670_v48  ;;  %v1802_v25 = vrot.slane %v1795_v9, 4 }
 0x1ec   : > { %4100 = vst [vmem:[#allocation70_spill] sm:$0xff] %v3429_v52  ;;  %4101 = vst [vmem:[#allocation71_spill] sm:$0xff] %v3431_v58  ;;  %v1783_v52 = vsel %vm822_vm5, %v1780_v13, %v1782_v51 }
 0x1ed   : > { %1648 = vrot.lane.b32.xlu1 %v1645_v17, %s2617_s10  ;;  %1650 = vrot.lane.b32.xlu0 %v1647_v18, %s2617_s10 }
 0x1ef   : > { %v3440_v16 = vpop.permute.xlu1 %1145  ;;  %v3442_v54 = vpop.permute.xlu0 %1163 }
 0x1f0   : > { %4102 = vst [vmem:[#allocation72_spill] sm:$0xff] %v3440_v16  ;;  %4103 = vst [vmem:[#allocation73_spill] sm:$0xff] %v3442_v54  ;;  %v1684_v16 = vstv %s2400_s30  ;;  %s2419_s30 = sld [smem:[#allocation4 + $0x5d]] }
 0x1f1   : > { %1652 = vrot.lane.b32.xlu1 %v1646_v57, %s2617_s10  ;;  %1784 = vrot.lane.b32.xlu0 %v1781_v53, %s2616_s8  ;;  %v1685_v13 = vmul.f32 %v1684_v16, %v3208_v36  ;;  %v1686_v51 = vmul.f32 %v1684_v16, %v3220_v43  ;;  %v1687_v62 = vmul.f32 %v1684_v16, %v3274_v33 }
 0x1f3   : > { %v3448_v17 = vpop.permute.xlu1 %1165  ;;  %v3450_v18 = vpop.permute.xlu0 %1183  ;;  %v1692_v54 = vrot.slane %v1686_v51, 2  ;;  %v1694_v5 = vrot.slane %v1687_v62, 2 }
 0x1f4   : > { %4104 = vst [vmem:[#allocation74_spill] sm:$0xff] %v3448_v17  ;;  %4105 = vst [vmem:[#allocation75_spill] sm:$0xff] %v3450_v18  ;;  %v1799_v17 = vrot.slane %v1793_v47, 4  ;;  %v1800_v18 = vrot.slane %v1794_v10, 4 }
 0x1f5   : > { %1786 = vrot.lane.b32.xlu1 %v1783_v52, %s2616_s8  ;;  %1672 = vrot.lane.b32.xlu0 %v1669_v1, %s2618_s16  ;;  %v1812_v52 = vstv %s2406_s4  ;;  %s2414_s4 = sld [smem:[#allocation4 + $0x58]] }
 0x1f6   : > { %v1801_v16 = vsel %vm822_vm5, %v1799_v17, %v1800_v18  ;;  %v1803_v42 = vsel %vm822_vm5, %v1800_v18, %v1802_v25  ;;  %v1813_v47 = vmul.f32 %v1812_v52, %v3208_v36  ;;  %v1814_v10 = vmul.f32 %v1812_v52, %v3220_v43 }
 0x1f7   : > { %v3459_v57 = vpop.permute.xlu1 %1185  ;;  %v3461_v53 = vpop.permute.xlu0 %1203  ;;  %v1695_v17 = vsel %vm523_vm4, %v1692_v54, %v1694_v5  ;;  %v1815_v18 = vmul.f32 %v1812_v52, %v3274_v33 }
 0x1f8   : > { %4106 = vst [vmem:[#allocation76_spill] sm:$0xff] %v3459_v57  ;;  %4107 = vst [vmem:[#allocation77_spill] sm:$0xff] %v3461_v53  ;;  %v1691_v53 = vrot.slane %v1685_v13, 2  ;;  %v1819_v62 = vrot.slane %v1813_v47, 4 }
 0x1f9   : > { %1674 = vrot.lane.b32.xlu1 %v1671_v44, %s2618_s16  ;;  %1676 = vrot.lane.b32.xlu0 %v1670_v48, %s2618_s16  ;;  %v1708_v48 = vstv %s2401_s5  ;;  %v1820_v44 = vrot.slane %v1814_v10, 4  ;;  %s2389_s5 = sld [smem:[#allocation4 + $0x3f]] }
 0x1fa   : > { %v1693_v51 = vsel %vm523_vm4, %v1691_v53, %v1692_v54  ;;  %v1709_v25 = vmul.f32 %v1708_v48, %v3208_v36  ;;  %v1711_v53 = vmul.f32 %v1708_v48, %v3274_v33  ;;  %v1832_v54 = vstv %s2407_s9  ;;  %s3585_s9 = sld [smem:[#allocation4 + $0x59]] }
 0x1fb   : > { %v3471_v1 = vpop.permute.xlu1 %1205  ;;  %v3473_v57 = vpop.permute.xlu0 %1223  ;;  %v1821_v52 = vsel %vm822_vm5, %v1819_v62, %v1820_v44 }
 0x1fc   : > { %4108 = vst [vmem:[#allocation78_spill] sm:$0xff] %v3471_v1  ;;  %4109 = vst [vmem:[#allocation79_spill] sm:$0xff] %v3473_v57  ;;  %v1822_v1 = vrot.slane %v1815_v18, 4  ;;  %v1715_v47 = vrot.slane %v1709_v25, 2  ;;  %v1718_v62 = vrot.slane %v1711_v53, 2  ;;  %v1835_v25 = vmul.f32 %v1832_v54, %v3274_v33 }
 0x1fd   : > { %1804 = vrot.lane.b32.xlu1 %v1801_v16, %s2617_s10  ;;  %1806 = vrot.lane.b32.xlu0 %v1803_v42, %s2617_s10  ;;  %v1710_v16 = vmul.f32 %v1708_v48, %v3220_v43  ;;  %v1732_v48 = vstv %s2402_s11  ;;  %s3608_s11 = sld [smem:[#allocation4 + $0x5a]] }
 0x1fe   : > { %v1823_v58 = vsel %vm822_vm5, %v1820_v44, %v1822_v1  ;;  %v1733_v63 = vmul.f32 %v1732_v48, %v3208_v36  ;;  %v1734_v44 = vmul.f32 %v1732_v48, %v3220_v43  ;;  %v1735_v53 = vmul.f32 %v1732_v48, %v3274_v33 }
 0x1ff   : > { %v3481_v9 = vpop.permute.xlu1 %1225  ;;  %v3483_v13 = vpop.permute.xlu0 %1243  ;;  %v1716_v10 = vrot.slane %v1710_v16, 2  ;;  %v1842_v11 = vrot.slane %v1835_v25, 4 }
 0x200   : > { %4110 = vst [vmem:[#allocation80_spill] sm:$0xff] %v3481_v9  ;;  %4111 = vst [vmem:[#allocation81_spill] sm:$0xff] %v3483_v13  ;;  %v1254_v9 = vstv %s3469_s6  ;;  %v1740_v48 = vrot.slane %v1734_v44, 2  ;;  %s2420_s6 = sld [smem:[#allocation4 + $0x5e]] }
 0x201   : > { %1696 = vrot.lane.b32.xlu1 %v1693_v51, %s2619_s19  ;;  %1698 = vrot.lane.b32.xlu0 %v1695_v17, %s2619_s19  ;;  %v1833_v51 = vmul.f32 %v1832_v54, %v3208_v36  ;;  %v1834_v17 = vmul.f32 %v1832_v54, %v3220_v43  ;;  %v1717_v18 = vsel %vm523_vm4, %v1715_v47, %v1716_v10 }
 0x202   : > { %v1256_v31 = vmul.f32 %v1254_v9, %v3220_v43  ;;  %v1719_v47 = vsel %vm523_vm4, %v1716_v10, %v1718_v62 }
 0x203   : > { %v3492_v42 = vpop.permute.xlu1 %1245  ;;  %v1265_v13 = vpop.permute.xlu0 %1264  ;;  %v1839_v16 = vrot.slane %v1833_v51, 4  ;;  %v1739_v51 = vrot.slane %v1733_v63, 2 }
 0x204   : > { %4112 = vst [vmem:[#allocation82_spill] sm:$0xff] %v3492_v42  ;;  %v1255_v42 = vmul.f32 %v1254_v9, %v3208_v36 }
 0x205   : > { %1700 = vrot.lane.b32.xlu1 %v1694_v5, %s2619_s19  ;;  %1824 = vrot.lane.b32.xlu0 %v1821_v52, %s2618_s16  ;;  %v1840_v52 = vrot.slane %v1834_v17, 4 }
 0x206   : > { %v1270_v5 = vadd.f32 %v1265_v13, %v1255_v42 }
 0x207   : > { %v1267_v57 = vpop.permute.xlu1 %1266  ;;  %v1278_v26 = vpop.permute.xlu0 %1277  ;;  %v1841_v42 = vsel %vm822_vm5, %v1839_v16, %v1840_v52  ;;  %v1843_v4 = vsel %vm822_vm5, %v1840_v52, %v1842_v11 }
 0x208   : > { %v1283_v54 = vadd.f32 %v1278_v26, %v1270_v5  ;;  %v1271_v13 = vadd.f32 %v1267_v57, %v1256_v31  ;;  %v1742_v26 = vrot.slane %v1735_v53, 2 }
 0x209   : > { %1826 = vrot.lane.b32.xlu1 %v1823_v58, %s2618_s16  ;;  %1720 = vrot.lane.b32.xlu0 %v1717_v18, %s2620_s21  ;;  %v1852_v58 = vstv %s2408_s18  ;;  %s2396_s18 = sld [smem:[#allocation4 + $0x46]] }
 0x20a   : > { %v1853_v10 = vmul.f32 %v1852_v58, %v3208_v36  ;;  %v1854_v25 = vmul.f32 %v1852_v58, %v3220_v43  ;;  %v1855_v63 = vmul.f32 %v1852_v58, %v3274_v33  ;;  %v1910_v58 = vstv %s3516_s27  ;;  %s2347_s27 = sld [smem:[#allocation4 + $0x15]] }
 0x20b   : > { %v1280_v15 = vpop.permute.xlu1 %1279  ;;  %v1291_v1 = vpop.permute.xlu0 %1290 }
 0x20c   : > { %v1296_v9 = vadd.f32 %v1291_v1, %v1283_v54  ;;  %v1284_v5 = vadd.f32 %v1280_v15, %v1271_v13  ;;  %v1859_v1 = vrot.slane %v1853_v10, 4  ;;  %v1860_v44 = vrot.slane %v1854_v25, 4 }
 0x20d   : > { %1722 = vrot.lane.b32.xlu1 %v1719_v47, %s2620_s21  ;;  %1724 = vrot.lane.b32.xlu0 %v1718_v62, %s2620_s21  ;;  %v1872_v62 = vstv %s3505_s25  ;;  %v1741_v54 = vsel %vm523_vm4, %v1739_v51, %v1740_v48  ;;  %v1862_v13 = vrot.slane %v1855_v63, 4  ;;  %v1911_v51 = vmul.f32 %v1910_v58, %v3208_v36  ;;  %s3645_s25 = sld [smem:[#allocation4 + $0x61]] }
 0x20e   : > { %v1873_v15 = vmul.f32 %v1872_v62, %v3208_v36  ;;  %v1874_v53 = vmul.f32 %v1872_v62, %v3220_v43  ;;  %v1875_v25 = vmul.f32 %v1872_v62, %v3274_v33  ;;  %v1913_v62 = vmul.f32 %v1910_v58, %v3274_v33 }
 0x20f   : > { %v1293_v17 = vpop.permute.xlu1 %1292  ;;  %v1304_v18 = vpop.permute.xlu0 %1303 }
 0x210   : > { %v1309_v47 = vadd.f32 %v1304_v18, %v1296_v9  ;;  %v1297_v31 = vadd.f32 %v1293_v17, %v1284_v5  ;;  %v1861_v17 = vsel %vm822_vm5, %v1859_v1, %v1860_v44  ;;  %v1879_v18 = vrot.slane %v1873_v15, 4 }
 0x211   : > { %1844 = vrot.lane.b32.xlu1 %v1841_v42, %s2619_s19  ;;  %1846 = vrot.lane.b32.xlu0 %v1843_v4, %s2619_s19  ;;  %v1743_v4 = vsel %vm523_vm4, %v1740_v48, %v1742_v26  ;;  %v1880_v10 = vrot.slane %v1874_v53, 4  ;;  %v1912_v48 = vmul.f32 %v1910_v58, %v3220_v43  ;;  %v1882_v1 = vrot.slane %v1875_v25, 4 }
 0x212   : > { %v1934_v15 = vstv %s2412_s3  ;;  %v1920_v25 = vrot.slane %v1913_v62, 4  ;;  %s3767_s3 = sld [smem:[#allocation4 + $0x23]] }
 0x213   : > { %v1306_v57 = vpop.permute.xlu1 %1305  ;;  %v1317_v16 = vpop.permute.xlu0 %1316 }
 0x214   : > { %v1310_v11 = vadd.f32 %v1306_v57, %v1297_v31  ;;  %v1322_v52 = vadd.f32 %v1317_v16, %v1309_v47  ;;  %v1337_v31 = vstv %s3525_s29  ;;  %v1863_v16 = vsel %vm822_vm5, %v1860_v44, %v1862_v13  ;;  %s3764_s29 = sld [smem:[#allocation4 + $0x1c]] }
 0x215   : > { %1744 = vrot.lane.b32.xlu1 %v1741_v54, %s2621_s26  ;;  %1746 = vrot.lane.b32.xlu0 %v1743_v4, %s2621_s26  ;;  %v1918_v54 = vrot.slane %v1912_v48, 4  ;;  %v1936_v44 = vmul.f32 %v1934_v15, %v3220_v43  ;;  %v1338_v4 = vmul.f32 %v1337_v31, %v3208_v36  ;;  %v1339_v58 = vmul.f32 %v1337_v31, %v3220_v43 }
 0x217   : > { %v1319_v9 = vpop.permute.xlu1 %1318  ;;  %v1330_v42 = vpop.permute.xlu0 %1329 }
 0x218   : > { %v1323_v5 = vadd.f32 %v1319_v9, %v1310_v11  ;;  %v3537_v47 = vadd.f32 %v1330_v42, %v1322_v52  ;;  %v1881_v11 = vsel %vm822_vm5, %v1879_v18, %v1880_v10  ;;  %v1917_v52 = vrot.slane %v1911_v51, 4 }
 0x219   : > { %1748 = vrot.lane.b32.xlu1 %v1742_v26, %s2621_s26  ;;  %1864 = vrot.lane.b32.xlu0 %v1861_v17, %s2620_s21  ;;  %v1935_v26 = vmul.f32 %v1934_v15, %v3208_v36  ;;  %v1937_v42 = vmul.f32 %v1934_v15, %v3274_v33  ;;  %v1883_v17 = vsel %vm822_vm5, %v1880_v10, %v1882_v1 }
 0x21a   : > { %v1919_v18 = vsel %vm822_vm5, %v1917_v52, %v1918_v54  ;;  %v1340_v1 = vmul.f32 %v1337_v31, %v3274_v33 }
 0x21b   : > { %v1332_v63 = vpop.permute.xlu1 %1331  ;;  %v1352_v57 = vpop.permute.xlu0 %1351  ;;  %v1944_v23 = vrot.slane %v1937_v42, 4 }
 0x21c   : > { %v3546_v53 = vadd.f32 %v1332_v63, %v1323_v5  ;;  %v2070_v5 = vstv %s2418_s7  ;;  %v1360_v51 = vadd.f32 %v1352_v57, %v1338_v4  ;;  %v1941_v63 = vrot.slane %v1935_v26, 4  ;;  %s3793_s7 = sld [smem:[#allocation4 + $0x2a]] }
 0x21d   : > { %1866 = vrot.lane.b32.xlu1 %v1863_v16, %s2620_s21  ;;  %1884 = vrot.lane.b32.xlu0 %v1881_v11, %s2621_s26  ;;  %v1942_v16 = vrot.slane %v1936_v44, 4  ;;  %v2071_v15 = vmul.f32 %v2070_v5, %v3208_v36  ;;  %v2072_v10 = vmul.f32 %v2070_v5, %v3220_v43  ;;  %v1958_v57 = vstv %s3551_s22  ;;  %s3809_s22 = sld [smem:[#allocation4 + $0x54]] }
 0x21e   : > { %v2073_v31 = vmul.f32 %v2070_v5, %v3274_v33 }
 0x21f   : > { %v1354_v13 = vpop.permute.xlu1 %1353  ;;  %v1356_v9 = vpop.permute.xlu0 %1355  ;;  %v1943_v44 = vsel %vm822_vm5, %v1941_v63, %v1942_v16  ;;  %v2077_v42 = vrot.slane %v2071_v15, 6  ;;  %v2090_v15 = vstv %s2419_s30  ;;  %s3814_s30 = sld [smem:[#allocation4 + $0x5b]] }
 0x220   : > { %v1361_v48 = vadd.f32 %v1354_v13, %v1339_v58  ;;  %v1362_v26 = vadd.f32 %v1356_v9, %v1340_v1  ;;  %v1945_v13 = vsel %vm822_vm5, %v1942_v16, %v1944_v23  ;;  %v2080_v16 = vrot.slane %v2073_v31, 6 }
 0x221   : > { %1886 = vrot.lane.b32.xlu1 %v1883_v17, %s2621_s26  ;;  %1922 = vrot.lane.b32.xlu0 %v1919_v18, %s2616_s8  ;;  %v1921_v17 = vsel %vm822_vm5, %v1918_v54, %v1920_v25  ;;  %v2078_v18 = vrot.slane %v2072_v10, 6  ;;  %v1959_v54 = vmul.f32 %v1958_v57, %v3208_v36 }
 0x223   : > { %v1371_v11 = vpop.permute.xlu1 %1370  ;;  %v1373_v0 = vpop.permute.xlu0 %1372  ;;  %v2079_v63 = vsel %vm1121_vm6, %v2077_v42, %v2078_v18  ;;  %v1965_v1 = vrot.slane %v1959_v54, 4  ;;  %v1458_v54 = vstv %s2389_s5  ;;  %s2432_s5 = sshll.u32 %s2664_s0, 8 }
 0x224   : > { %v1379_v62 = vadd.f32 %v1371_v11, %v1360_v51  ;;  %v1380_v52 = vadd.f32 %v1373_v0, %v1361_v48  ;;  %v1960_v48 = vmul.f32 %v1958_v57, %v3220_v43  ;;  %v1961_v11 = vmul.f32 %v1958_v57, %v3274_v33 }
 0x225   : > { %1924 = vrot.lane.b32.xlu1 %v1921_v17, %s2616_s8  ;;  %1926 = vrot.lane.b32.xlu0 %v1920_v25, %s2616_s8  ;;  %v1982_v17 = vstv %s2414_s4  ;;  %v2093_v57 = vmul.f32 %v2090_v15, %v3274_v33  ;;  %s2326_s4 = sshll.u32 %s2740_s28, 4 }
 0x227   : > { %v1375_v4 = vpop.permute.xlu1 %1374  ;;  %v1390_v58 = vpop.permute.xlu0 %1389 }
 0x228   : > { %v1381_v0 = vadd.f32 %v1375_v4, %v1362_v26  ;;  %v1398_v51 = vadd.f32 %v1390_v58, %v1379_v62  ;;  %v1966_v62 = vrot.slane %v1960_v48, 4  ;;  %v2081_v4 = vsel %vm1121_vm6, %v2078_v18, %v2080_v16 }
 0x229   : > { %1946 = vrot.lane.b32.xlu1 %v1943_v44, %s2617_s10  ;;  %1948 = vrot.lane.b32.xlu0 %v1945_v13, %s2617_s10  ;;  %v2091_v58 = vmul.f32 %v2090_v15, %v3208_v36  ;;  %v2092_v13 = vmul.f32 %v2090_v15, %v3220_v43  ;;  %v1984_v18 = vmul.f32 %v1982_v17, %v3220_v43 }
 0x22a   : > { %v1967_v31 = vsel %vm822_vm5, %v1965_v1, %v1966_v62  ;;  %v1985_v16 = vmul.f32 %v1982_v17, %v3274_v33  ;;  %v2110_v1 = vstv %s2420_s6  ;;  %s139_s6 = scalar_lea.vmem [#allocation8], %s2326_s4 }
 0x22b   : > { %v1392_v9 = vpop.permute.xlu1 %1391  ;;  %v1394_v25 = vpop.permute.xlu0 %1393 }
 0x22c   : > { %v1399_v5 = vadd.f32 %v1392_v9, %v1380_v52  ;;  %v1400_v10 = vadd.f32 %v1394_v25, %v1381_v0  ;;  %v1968_v0 = vrot.slane %v1961_v11, 4  ;;  %v2097_v25 = vrot.slane %v2091_v58, 6 }
 0x22d   : > { %1950 = vrot.lane.b32.xlu1 %v1944_v23, %s2617_s10  ;;  %2082 = vrot.lane.b32.xlu0 %v2079_v63, %s2616_s8  ;;  %v1983_v23 = vmul.f32 %v1982_v17, %v3208_v36  ;;  %v2098_v63 = vrot.slane %v2092_v13, 6  ;;  %v1990_v58 = vrot.slane %v1984_v18, 4 }
 0x22f   : > { %v1409_v26 = vpop.permute.xlu1 %1408  ;;  %v1411_v44 = vpop.permute.xlu0 %1410  ;;  %v2099_v17 = vsel %vm1121_vm6, %v2097_v25, %v2098_v63  ;;  %v1461_v25 = vmul.f32 %v1458_v54, %v3274_v33 }
 0x230   : > { %v1417_v52 = vadd.f32 %v1409_v26, %v1398_v51  ;;  %v1418_v42 = vadd.f32 %v1411_v44, %v1399_v5  ;;  %v2100_v51 = vrot.slane %v2093_v57, 6  ;;  %v1969_v5 = vsel %vm822_vm5, %v1966_v62, %v1968_v0 }
 0x231   : > { %2084 = vrot.lane.b32.xlu1 %v2081_v4, %s2616_s8  ;;  %1970 = vrot.lane.b32.xlu0 %v1967_v31, %s2618_s16  ;;  %v1459_v26 = vmul.f32 %v1458_v54, %v3208_v36  ;;  %v1460_v44 = vmul.f32 %v1458_v54, %v3220_v43  ;;  %v1989_v4 = vrot.slane %v1983_v23, 4  ;;  %v2111_v62 = vmul.f32 %v2110_v1, %v3208_v36  ;;  %s3602_s8 = sld [smem:[#allocation4 + $0x5f]] }
 0x233   : > { %v1413_v48 = vpop.permute.xlu1 %1412  ;;  %v1428_v9 = vpop.permute.xlu0 %1427  ;;  %v1465_v23 = vrot.slane %v1459_v26, 2  ;;  %v1466_v18 = vrot.slane %v1460_v44, 2 }
 0x234   : > { %v1419_v15 = vadd.f32 %v1413_v48, %v1400_v10  ;;  %v1436_v11 = vadd.f32 %v1428_v9, %v1417_v52  ;;  %v2101_v10 = vsel %vm1121_vm6, %v2098_v63, %v2100_v51  ;;  %v1992_v52 = vrot.slane %v1985_v16, 4  ;;  %v3612_v16 = vld [vmem:[#allocation2 + $0x18] sm:$0xff] }
 0x235   : > { %1972 = vrot.lane.b32.xlu1 %v1969_v5, %s2618_s16  ;;  %1974 = vrot.lane.b32.xlu0 %v1968_v0, %s2618_s16  ;;  %v2112_v9 = vmul.f32 %v2110_v1, %v3220_v43  ;;  %v2006_v0 = vstv %s3585_s9  ;;  %v1991_v63 = vsel %vm822_vm5, %v1989_v4, %v1990_v58  ;;  %v2113_v43 = vmul.f32 %v2110_v1, %v3274_v33  ;;  %v3615_v5 = vld [vmem:[#allocation2 + $0x20] sm:$0xff]  ;;  %s2245_s9 = sshll.u32 %s139_s6, 4  ;;  %s3986_s9 = int_to_ptr.vmem [resolvable:$true] %s2245_s9 }
 0x236   : > { %v1993_v51 = vsel %vm822_vm5, %v1990_v58, %v1992_v52  ;;  %v2008_v26 = vmul.f32 %v3615_v5, %v2006_v0  ;;  %v2117_v4 = vrot.slane %v2111_v62, 6  ;;  %v1467_v1 = vsel %vm523_vm4, %v1465_v23, %v1466_v18  ;;  %s2542_s0 = scalar_lea.vmem %s3986_s9, 256 }
 0x237   : > { %v1430_v13 = vpop.permute.xlu1 %1429  ;;  %v1432_v57 = vpop.permute.xlu0 %1431  ;;  %v1468_v58 = vrot.slane %v1461_v25, 2  ;;  %v2120_v7 = vrot.slane %v2113_v43, 6  ;;  %v2030_v25 = vstv %s3608_s11  ;;  %p2543_p11 = scmp.ne.s32.totalorder %s3986_s9, %s2542_s0 }
 0x238   : > { %v1437_v31 = vadd.f32 %v1430_v13, %v1418_v42  ;;  %v1438_v48 = vadd.f32 %v1432_v57, %v1419_v15  ;;  %v2007_v15 = vmul.f32 %v3612_v16, %v2006_v0  ;;  %v2118_v13 = vrot.slane %v2112_v9, 6 }
 0x239   : > { %2102 = vrot.lane.b32.xlu1 %v2099_v17, %s2617_s10  ;;  %2104 = vrot.lane.b32.xlu0 %v2101_v10, %s2617_s10  ;;  %v1472_v57 = vadd.f32 %v1467_v1, %v3537_v47  ;;  %s3627_s10 = sld [smem:[#allocation4 + $0x60]]  ;;  %v1469_v47 = vsel %vm523_vm4, %v1466_v18, %v1468_v58  ;;  %p2544_p13 = pnand %p2543_p11, %p4193_p12 }
 0x23a   : > { %v1473_v23 = vadd.f32 %v1469_v47, %v3546_v53  ;;  %v2121_v43 = vsel %vm1121_vm6, %v2118_v13, %v2120_v7  ;;  %v2031_v7 = vmul.f32 %v3612_v16, %v2030_v25  ;;  %v2032_v53 = vmul.f32 %v3615_v5, %v2030_v25 }
 0x23b   : > { %v1447_v36 = vpop.permute.xlu1 %1446  ;;  %v1449_v42 = vpop.permute.xlu0 %1448  ;;  %p2545_p4 = pneg %p2544_p13 }
 0x23c   : > { %v3618_v44 = vadd.f32 %v1447_v36, %v1436_v11  ;;  %v3620_v54 = vadd.f32 %v1449_v42, %v1437_v31  ;;  %v2013_v11 = vrot.slane %v2007_v15, 4  ;;  %v2014_v36 = vrot.slane %v2008_v26, 4 }
 0x23d   : > { %1994 = vrot.lane.b32.xlu1 %v1991_v63, %s2619_s19  ;;  %1996 = vrot.lane.b32.xlu0 %v1993_v51, %s2619_s19  ;;  %v2009_v31 = vmul.f32 %v2006_v0, %v3274_v33  ;;  %v2119_v63 = vsel %vm1121_vm6, %v2117_v4, %v2118_v13  ;;  %v2130_v42 = vstv %s3602_s8  ;;  %v2037_v47 = vrot.slane %v2031_v7, 4 }
 0x23e   : > { %v2131_v26 = vmul.f32 %v3612_v16, %v2130_v42  ;;  %v2132_v1 = vmul.f32 %v3615_v5, %v2130_v42  ;;  %v2133_v18 = vmul.f32 %v2130_v42, %v3274_v33 }
 0x23f   : > { %v1451_v17 = vpop.permute.xlu1 %1450  ;;  %v1487_v10 = vpop.permute.xlu0 %1486  ;;  %v2016_v15 = vrot.slane %v2009_v31, 4 }
 0x240   : > { %v3629_v62 = vadd.f32 %v1451_v17, %v1438_v48  ;;  %v1492_v9 = vadd.f32 %v1487_v10, %v1472_v57  ;;  %v2015_v48 = vsel %vm822_vm5, %v2013_v11, %v2014_v36  ;;  %v2137_v17 = vrot.slane %v2131_v26, 6 }
 0x241   : > { %1998 = vrot.lane.b32.xlu1 %v1992_v52, %s2619_s19  ;;  %2122 = vrot.lane.b32.xlu0 %v2119_v63, %s2618_s16  ;;  %v2017_v57 = vsel %vm822_vm5, %v2014_v36, %v2016_v15  ;;  %v2033_v10 = vmul.f32 %v2030_v25, %v3274_v33  ;;  %v2150_v11 = vstv %s3627_s10  ;;  %v2138_v63 = vrot.slane %v2132_v1, 6  ;;  %s3984_s10 = scalar_lea.hbm %s4032_s2, %s2432_s5 }
 0x242   : > { %v2140_v42 = vrot.slane %v2133_v18, 6  ;;  %v2151_v36 = vmul.f32 %v3612_v16, %v2150_v11  ;;  %v2152_v33 = vmul.f32 %v3615_v5, %v2150_v11  ;;  %v2170_v18 = vstv %s3645_s25  ;;  %s2622_s25 = smov [#allocation8]  }
 0x243   : > { %v1489_v51 = vpop.permute.xlu1 %1488  ;;  %v1507_v0 = vpop.permute.xlu0 %1506 }
 0x244   : > { %v1493_v4 = vadd.f32 %v1489_v51, %v1473_v23  ;;  %v1512_v52 = vadd.f32 %v1507_v0, %v1492_v9  ;;  %v2038_v23 = vrot.slane %v2032_v53, 4  ;;  %v1594_v51 = vstv %s2396_s18  ;;  %s2232_s18 = scalar_lea.sflag [#allocation7], %s2740_s28 }
 0x245   : > { %2124 = vrot.lane.b32.xlu1 %v2121_v43, %s2618_s16  ;;  %2018 = vrot.lane.b32.xlu0 %v2015_v48, %s2620_s21  ;;  %v2040_v48 = vrot.slane %v2033_v10, 4  ;;  %v1596_v1 = vmul.f32 %v3615_v5, %v1594_v51  ;;  %s3664_s16 = sld [smem:[#allocation4 + $0x4d]]  ;;  %v3667_v10 = vld [vmem:[#allocation2 + $0x28] sm:$0x3f] }
 0x246   : > { %v2039_v7 = vsel %vm822_vm5, %v2037_v47, %v2038_v23 }
 0x247   : > { %v1509_v13 = vpop.permute.xlu1 %1508  ;;  %v1527_v58 = vpop.permute.xlu0 %1526 }
 0x248   : > { %v1513_v31 = vadd.f32 %v1509_v13, %v1493_v4  ;;  %v1532_v9 = vadd.f32 %v1527_v58, %v1512_v52  ;;  %v2139_v4 = vsel %vm1121_vm6, %v2137_v17, %v2138_v63  ;;  %v2141_v52 = vsel %vm1121_vm6, %v2138_v63, %v2140_v42 }
 0x249   : > { %2020 = vrot.lane.b32.xlu1 %v2017_v57, %s2620_s21  ;;  %2022 = vrot.lane.b32.xlu0 %v2016_v15, %s2620_s21  ;;  %v1595_v15 = vmul.f32 %v3612_v16, %v1594_v51  ;;  %v2041_v58 = vsel %vm822_vm5, %v2038_v23, %v2040_v48  ;;  %v2157_v57 = vrot.slane %v2151_v36, 6  ;;  %v2158_v17 = vrot.slane %v2152_v33, 6 }
 0x24a   : > { %v2171_v42 = vmul.f32 %v3612_v16, %v2170_v18  ;;  %v1597_v23 = vmul.f32 %v3667_v10, %v1594_v51 }
 0x24b   : > { %v1529_v0 = vpop.permute.xlu1 %1528  ;;  %v1547_v43 = vpop.permute.xlu0 %1546  ;;  %v1601_v47 = vrot.slane %v1595_v15, 2 }
 0x24c   : > { %v1533_v25 = vadd.f32 %v1529_v0, %v1513_v31  ;;  %v1552_v26 = vadd.f32 %v1547_v43, %v1532_v9  ;;  %v2153_v31 = vmul.f32 %v3667_v10, %v2150_v11  ;;  %v2172_v0 = vmul.f32 %v3615_v5, %v2170_v18 }
 0x24d   : > { %2142 = vrot.lane.b32.xlu1 %v2139_v4, %s2619_s19  ;;  %2144 = vrot.lane.b32.xlu0 %v2141_v52, %s2619_s19  ;;  %v1602_v43 = vrot.slane %v1596_v1, 2  ;;  %v2159_v4 = vsel %vm1121_vm6, %v2157_v57, %v2158_v17  ;;  %v1604_v1 = vrot.slane %v1597_v23, 2  ;;  %s140_s19 = sld [smem:[#allocation4]] }
 0x24e   : > { %v2160_v11 = vrot.slane %v2153_v31, 6 }
 0x24f   : > { %v1549_v53 = vpop.permute.xlu1 %1548  ;;  %v1567_v13 = vpop.permute.xlu0 %1566  ;;  %v1603_v15 = vsel %vm523_vm4, %v1601_v47, %v1602_v43  ;;  %v1611_v47 = vadd.f32 %v1604_v1, %v3629_v62 }
 0x250   : > { %v1553_v9 = vadd.f32 %v1549_v53, %v1533_v25  ;;  %v1572_v63 = vadd.f32 %v1567_v13, %v1552_v26  ;;  %v2173_v25 = vmul.f32 %v3667_v10, %v2170_v18  ;;  %v2177_v53 = vrot.slane %v2171_v42, 6 }
 0x251   : > { %2042 = vrot.lane.b32.xlu1 %v2039_v7, %s2621_s26  ;;  %2044 = vrot.lane.b32.xlu0 %v2041_v58, %s2621_s26  ;;  %v2178_v13 = vrot.slane %v2172_v0, 6  ;;  %v1609_v51 = vadd.f32 %v1603_v15, %v3618_v44  ;;  %v1756_v7 = vstv %s3664_s16  ;;  %v2161_v57 = vsel %vm1121_vm6, %v2158_v17, %v2160_v11  ;;  %s2546_s16 = sshll.u32 %s2622_s25, 4  ;;  %s2547_s16 = int_to_ptr.vmem [resolvable:$false] %s2546_s16 }
 0x252   : > { %v1757_v42 = vmul.f32 %v3612_v16, %v1756_v7  ;;  %v1758_v44 = vmul.f32 %v3615_v5, %v1756_v7  ;;  %p2549_p5 = scmp.lt.s32.totalorder %s3986_s9, %s2547_s16 }
 0x253   : > { %v1569_v36 = vpop.permute.xlu1 %1568  ;;  %v1587_v33 = vpop.permute.xlu0 %1586 }
 0x254   : > { %v1573_v26 = vadd.f32 %v1569_v36, %v1553_v9  ;;  %v1592_v52 = vadd.f32 %v1587_v33, %v1572_v63  ;;  %v2179_v9 = vsel %vm1121_vm6, %v2177_v53, %v2178_v13  ;;  %v2180_v63 = vrot.slane %v2173_v25, 6 }
 0x255   : > { %2046 = vrot.lane.b32.xlu1 %v2040_v48, %s2621_s26  ;;  %2162 = vrot.lane.b32.xlu0 %v2159_v4, %s2620_s21  ;;  %v1605_v48 = vsel %vm523_vm4, %v1602_v43, %v1604_v1  ;;  %v1763_v4 = vrot.slane %v1757_v42, 4  ;;  %v1764_v11 = vrot.slane %v1758_v44, 4  ;;  %v1759_v43 = vmul.f32 %v3667_v10, %v1756_v7 }
 0x256   : > { %v1610_v0 = vadd.f32 %v1605_v48, %v3620_v54  ;;  %v2181_v33 = vsel %vm1121_vm6, %v2178_v13, %v2180_v63 }
 0x257   : > { %v1589_v58 = vpop.permute.xlu1 %1588  ;;  %v1625_v59 = vpop.permute.xlu0 %1624  ;;  %v1765_v54 = vsel %vm822_vm5, %v1763_v4, %v1764_v11 }
 0x258   : > { %v1593_v31 = vadd.f32 %v1589_v58, %v1573_v26  ;;  %v1633_v18 = vadd.f32 %v1625_v59, %v1609_v51  ;;  %v1766_v51 = vrot.slane %v1759_v43, 4  ;;  %v1770_v62 = vadd.f32 %v1765_v54, %v1592_v52 }
 0x259   : > { %2164 = vrot.lane.b32.xlu1 %v2161_v57, %s2620_s21  ;;  %2182 = vrot.lane.b32.xlu0 %v2179_v9, %s2621_s26  ;;  %s2333_s21 = sld [smem:[#allocation4 + $0x7]] }
 0x25a   : > { %v1767_v13 = vsel %vm822_vm5, %v1764_v11, %v1766_v51 }
 0x25b   : > { %v1627_v17 = vpop.permute.xlu1 %1626  ;;  %v1629_v23 = vpop.permute.xlu0 %1628  ;;  %v1771_v63 = vadd.f32 %v1767_v13, %v1593_v31 }
 0x25c   : > { %v1634_v59 = vadd.f32 %v1627_v17, %v1610_v0  ;;  %v1635_v36 = vadd.f32 %v1629_v23, %v1611_v47 }
 0x25d   : > { %2184 = vrot.lane.b32.xlu1 %v2181_v33, %s2621_s26  ;;  %s2340_s26 = sld [smem:[#allocation4 + $0xe]] }
 0x25f   : > { %v1649_v25 = vpop.permute.xlu1 %1648  ;;  %v1651_v26 = vpop.permute.xlu0 %1650 }
 0x260   : > { %v1657_v53 = vadd.f32 %v1649_v25, %v1633_v18  ;;  %v1658_v15 = vadd.f32 %v1651_v26, %v1634_v59 }
 0x263   : > { %v1653_v1 = vpop.permute.xlu1 %1652  ;;  %v1785_v58 = vpop.permute.xlu0 %1784 }
 0x264   : > { %v1659_v57 = vadd.f32 %v1653_v1, %v1635_v36  ;;  %v1790_v9 = vadd.f32 %v1785_v58, %v1770_v62 }
 0x267   : > { %v1787_v48 = vpop.permute.xlu1 %1786  ;;  %v1673_v42 = vpop.permute.xlu0 %1672 }
 0x268   : > { %v1791_v44 = vadd.f32 %v1787_v48, %v1771_v63  ;;  %v1681_v0 = vadd.f32 %v1673_v42, %v1657_v53  ;;  %v3720_v48 = vld [vmem:[#allocation2] sm:$0xff] }
 0x26b   : > { %v1675_v7 = vpop.permute.xlu1 %1674  ;;  %v1677_v47 = vpop.permute.xlu0 %1676 }
 0x26c   : > { %v1682_v17 = vadd.f32 %v1675_v7, %v1658_v15  ;;  %v1683_v18 = vadd.f32 %v1677_v47, %v1659_v57 }
 0x26f   : > { %v1805_v23 = vpop.permute.xlu1 %1804  ;;  %v1807_v59 = vpop.permute.xlu0 %1806 }
 0x270   : > { %v1810_v33 = vadd.f32 %v1805_v23, %v1790_v9  ;;  %v1811_v4 = vadd.f32 %v1807_v59, %v1791_v44  ;;  %v312_v9 = vstv %s140_s19  ;;  %v395_v44 = vstv %s2333_s21  ;;  %v3731_v23 = vld [vmem:[#allocation2 + $0x8] sm:$0xff]  ;;  %s2548_s19 = scalar_lea.vmem %s2547_s16, 512 }
 0x271   : > { %v313_v42 = vmul.f32 %v3720_v48, %v312_v9  ;;  %v314_v59 = vmul.f32 %v3731_v23, %v312_v9  ;;  %v397_v9 = vmul.f32 %v3731_v23, %v395_v44  ;;  %p2550_p7 = scmp.lt.s32.totalorder %s2548_s19, %s2542_s0 }
 0x273   : > { %v1697_v52 = vpop.permute.xlu1 %1696  ;;  %v1699_v43 = vpop.permute.xlu0 %1698  ;;  %p2551_p8 = por %p2550_p7, %p2549_p5 }
 0x274   : > { %v3696_v25 = vadd.f32 %v1697_v52, %v1681_v0  ;;  %v3698_v36 = vadd.f32 %v1699_v43, %v1682_v17  ;;  %v3723_v0 = vld [vmem:[#allocation2 + $0x10] sm:$0x3f]  ;;  %v329_v52 = vadd.f32 %v2997_v27, %v314_v59  ;;  %v653_v27 = vstv %s2347_s27 }
 0x275   : > { %v398_v7 = vmul.f32 %v3723_v0, %v395_v44  ;;  %v419_v59 = vadd.f32 %v3061_v38, %v397_v9  ;;  %v655_v9 = vmul.f32 %v3731_v23, %v653_v27  ;;  %p2552_p10 = pnand %p2551_p8, %p2545_p4 }
 0x277   : > { %v1701_v11 = vpop.permute.xlu1 %1700  ;;  %v1825_v31 = vpop.permute.xlu0 %1824 }
 0x278   : > { %v3700_v26 = vadd.f32 %v1701_v11, %v1683_v18  ;;  %v3702_v54 = vadd.f32 %v1825_v31, %v1810_v33  ;;  %v328_v18 = vadd.f32 %v2984_v14, %v313_v42  ;;  %v420_v33 = vadd.f32 %v3063_v40, %v398_v7 }
 0x279   : > { %v516_v11 = vstv %s2340_s26  ;;  %v342_v42 = vadd.f32 %v3008_v49, %v329_v52 }
 0x27a   : > { %v439_v43 = vadd.f32 %v3081_v2, %v420_v33  ;;  %v518_v14 = vmul.f32 %v3731_v23, %v516_v11  ;;  %v517_v2 = vmul.f32 %v3720_v48, %v516_v11 }
 0x27b   : > { %v1827_v53 = vpop.permute.xlu1 %1826  ;;  %v3704_v51 = vpop.permute.xlu0 %1720  ;;  %v355_v7 = vadd.f32 %v3019_v61, %v342_v42 }
 0x27c   : > { %v3706_v15 = vadd.f32 %v1827_v53, %v1811_v4  ;;  %v341_v4 = vadd.f32 %v2999_v37, %v328_v18  ;;  %v458_v40 = vadd.f32 %v3092_v6, %v439_v43  ;;  %v396_v18 = vmul.f32 %v3720_v48, %v395_v44 }
 0x27d   : > { %v656_v6 = vmul.f32 %v3723_v0, %v653_v27  ;;  %v368_v52 = vadd.f32 %v3030_v24, %v355_v7  ;;  %v438_v44 = vadd.f32 %v3074_v56, %v419_v59  ;;  %v524_v43 = vrot.slane %v517_v2, 2 }
 0x27e   : > { %v418_v61 = vadd.f32 %v3054_v20, %v396_v18  ;;  %v654_v7 = vmul.f32 %v3720_v48, %v653_v27  ;;  %v952_v27 = vstv %s3767_s3 }
 0x27f   : > { %v3708_v62 = vpop.permute.xlu1 %1722  ;;  %v3710_v1 = vpop.permute.xlu0 %1724 }
 0x283   : > { %v3712_v58 = vpop.permute.xlu1 %1844  ;;  %v3714_v57 = vpop.permute.xlu0 %1846 }
 0x284   : > { %4113 = vst [vmem:[#allocation83_spill] sm:$0xff] %v3714_v57  ;;  %v354_v57 = vadd.f32 %v3010_v50, %v341_v4  ;;  %v477_v50 = vadd.f32 %v3109_v39, %v458_v40 }
 0x286   : > { %v367_v37 = vadd.f32 %v3021_v21, %v354_v57  ;;  %v525_v21 = vrot.slane %v518_v14, 2  ;;  %v519_v57 = vmul.f32 %v3723_v0, %v516_v11  ;;  %v496_v38 = vadd.f32 %v3120_v46, %v477_v50 }
 0x287   : > { %v3716_v13 = vpop.permute.xlu1 %1744  ;;  %v3718_v63 = vpop.permute.xlu0 %1746  ;;  %v437_v14 = vadd.f32 %v3072_v55, %v418_v61  ;;  %v457_v11 = vadd.f32 %v3090_v34, %v438_v44  ;;  %v663_v46 = vrot.slane %v656_v6, 2  ;;  %v4115_v61 = vld [vmem:[#allocation13_spill] sm:$0xff] }
 0x288   : > { %v380_v4 = vadd.f32 %v3032_v28, %v367_v37  ;;  %v381_v28 = vadd.f32 %v3041_v32, %v368_v52  ;;  %v515_v24 = vadd.f32 %v3137_v29, %v496_v38  ;;  %v527_v42 = vrot.slane %v519_v57, 2  ;;  %v4114_v57 = vld [vmem:[#allocation12_spill] sm:$0xff]  ;;  %v4116_v38 = vld [vmem:[#allocation19_spill] sm:$0xff] }
 0x289   : > { %v456_v40 = vadd.f32 %v3083_v3, %v437_v14  ;;  %v476_v32 = vadd.f32 %v3102_v12, %v457_v11  ;;  %v526_v55 = vsel %vm523_vm4, %v524_v43, %v525_v21  ;;  %v661_v12 = vrot.slane %v655_v9, 2  ;;  %v4118_v11 = vld [vmem:[#allocation20_spill] sm:$0xff] }
 0x28a   : > { %v393_v39 = vadd.f32 %v3043_v30, %v380_v4  ;;  %v394_v30 = vadd.f32 %v3052_v19, %v381_v28  ;;  %v670_v2 = vadd.f32 %v663_v46, %v515_v24  ;;  %v528_v3 = vsel %vm523_vm4, %v525_v21, %v527_v42 }
 0x28b   : > { %v3726_v47 = vpop.permute.xlu1 %1748  ;;  %v3728_v17 = vpop.permute.xlu0 %1864  ;;  %v475_v29 = vadd.f32 %v3100_v35, %v456_v40  ;;  %v495_v37 = vadd.f32 %v3118_v41, %v476_v32  ;;  %v815_v41 = vstv %s3764_s29  ;;  %v664_v28 = vsel %vm523_vm4, %v661_v12, %v663_v46  ;;  %v4119_v40 = vld [vmem:[#allocation23_spill] sm:$0xff] }
 0x28c   : > { %v531_v34 = vadd.f32 %v526_v55, %v393_v39  ;;  %v532_v6 = vadd.f32 %v528_v3, %v394_v30  ;;  %v694_v44 = vadd.f32 %v4115_v61, %v670_v2  ;;  %v660_v39 = vrot.slane %v654_v7, 2  ;;  %v4121_v2 = vld [vmem:[#allocation22_spill] sm:$0xff]  ;;  %v4125_v61 = vld [vmem:[#allocation24_spill] sm:$0xff] }
 0x28d   : > { %v494_v50 = vadd.f32 %v3111_v22, %v475_v29  ;;  %v514_v4 = vadd.f32 %v3130_v60, %v495_v37  ;;  %v4117_v22 = vld [vmem:[#allocation21_spill] sm:$0xff]  ;;  %v817_v14 = vmul.f32 %v3731_v23, %v815_v41  ;;  %v954_v30 = vmul.f32 %v3731_v23, %v952_v27  ;;  %v4120_v29 = vld [vmem:[#allocation14_spill] sm:$0xff] }
 0x28e   : > { %v551_v19 = vadd.f32 %v3171_v8, %v531_v34  ;;  %v552_v8 = vadd.f32 %v4116_v38, %v532_v6  ;;  %v662_v42 = vsel %vm523_vm4, %v660_v39, %v661_v12  ;;  %v816_v46 = vmul.f32 %v3720_v48, %v815_v41  ;;  %v4122_v3 = vld [vmem:[#allocation30_spill] sm:$0xff]  ;;  %v4124_v6 = vld [vmem:[#allocation25_spill] sm:$0xff] }
 0x28f   : > { %v3738_v31 = vpop.permute.xlu1 %1866  ;;  %v3740_v53 = vpop.permute.xlu0 %1884  ;;  %v513_v52 = vadd.f32 %v4114_v57, %v494_v50  ;;  %v669_v9 = vadd.f32 %v664_v28, %v514_v4  ;;  %v953_v55 = vmul.f32 %v3720_v48, %v952_v27  ;;  %v3820_v34 = vmul.f32 %v3723_v0, %v952_v27 }
 0x290   : > { %v571_v35 = vadd.f32 %v3182_v45, %v551_v19  ;;  %v818_v45 = vmul.f32 %v3723_v0, %v815_v41  ;;  %v572_v24 = vadd.f32 %v4118_v11, %v552_v8  ;;  %v718_v37 = vadd.f32 %v4120_v29, %v694_v44  ;;  %v4126_v8 = vld [vmem:[#allocation29_spill] sm:$0xff] }
 0x291   : > { %v668_v19 = vadd.f32 %v662_v42, %v513_v52  ;;  %v693_v12 = vadd.f32 %v4122_v3, %v669_v9  ;;  %v824_v57 = vrot.slane %v817_v14, 4  ;;  %v960_v39 = vrot.slane %v954_v30, 4  ;;  %v4129_v9 = vld [vmem:[#allocation26_spill] sm:$0xff]  ;;  %v4130_v14 = vld [vmem:[#allocation31_spill] sm:$0xff] }
 0x292   : > { %v591_v60 = vadd.f32 %v4117_v22, %v571_v35  ;;  %v592_v7 = vadd.f32 %v4121_v2, %v572_v24  ;;  %v826_v41 = vrot.slane %v818_v45, 4  ;;  %v1114_v44 = vstv %s3793_s7  ;;  %v4127_v22 = vld [vmem:[#allocation27_spill] sm:$0xff] }
 0x293   : > { %v3753_v33 = vpop.permute.xlu1 %1886  ;;  %v3755_v49 = vpop.permute.xlu0 %1922  ;;  %v692_v27 = vadd.f32 %v4126_v8, %v668_v19  ;;  %v823_v52 = vrot.slane %v816_v46, 4  ;;  %v959_v28 = vrot.slane %v953_v55, 4  ;;  %v4035_v11 = vrot.slane %v3820_v34, 4  ;;  %v4128_v24 = vld [vmem:[#allocation15_spill] sm:$0xff]  ;;  %v4132_v55 = vld [vmem:[#allocation28_spill] sm:$0xff] }
 0x294   : > { %v611_v32 = vadd.f32 %v4119_v40, %v591_v60  ;;  %v612_v38 = vadd.f32 %v4125_v61, %v592_v7  ;;  %v742_v42 = vadd.f32 %v4128_v24, %v718_v37  ;;  %v717_v45 = vadd.f32 %v4130_v14, %v693_v12 }
 0x295   : > { %v825_v30 = vsel %vm822_vm5, %v823_v52, %v824_v57  ;;  %v827_v19 = vsel %vm822_vm5, %v824_v57, %v826_v41  ;;  %v1892_v46 = vstv %s3809_s22  ;;  %v961_v37 = vsel %vm822_vm5, %v959_v28, %v960_v39  ;;  %v4135_v57 = vld [vmem:[#allocation33_spill] sm:$0xff] }
 0x296   : > { %v631_v35 = vadd.f32 %v4124_v6, %v611_v32  ;;  %v632_v40 = vadd.f32 %v4129_v9, %v612_v38  ;;  %v4131_v32 = vld [vmem:[#allocation32_spill] sm:$0xff]  ;;  %v4133_v6 = vld [vmem:[#allocation34_spill] sm:$0xff]  ;;  %v2054_v61 = vstv %s3814_s30  ;;  %v963_v12 = vsel %vm822_vm5, %v960_v39, %v4035_v11 }
 0x297   : > { %v3773_v20 = vpop.permute.xlu1 %1924  ;;  %v3775_v56 = vpop.permute.xlu0 %1926  ;;  %v716_v29 = vadd.f32 %v4131_v32, %v692_v27  ;;  %v1115_v8 = vmul.f32 %v3720_v48, %v1114_v44  ;;  %v1116_v27 = vmul.f32 %v3731_v23, %v1114_v44  ;;  %v1117_v24 = vmul.f32 %v3723_v0, %v1114_v44  ;;  %v4140_v32 = vld [vmem:[#allocation36_spill] sm:$0xff]  ;;  %v4143_v11 = vld [vmem:[#allocation38_spill] sm:$0xff] }
 0x298   : > { %v651_v60 = vadd.f32 %v4127_v22, %v631_v35  ;;  %v652_v3 = vadd.f32 %v4132_v55, %v632_v40  ;;  %v741_v35 = vadd.f32 %v4133_v6, %v717_v45  ;;  %v4134_v22 = vld [vmem:[#allocation16_spill] sm:$0xff]  ;;  %v1893_v9 = vmul.f32 %v3612_v16, %v1892_v46 }
 0x299   : > { %v766_v52 = vadd.f32 %v4134_v22, %v742_v42  ;;  %v740_v41 = vadd.f32 %v4135_v57, %v716_v29  ;;  %v1894_v39 = vmul.f32 %v3615_v5, %v1892_v46  ;;  %v3866_v48 = vmul.f32 %v3667_v10, %v1892_v46  ;;  %v4139_v42 = vld [vmem:[#allocation35_spill] sm:$0xff]  ;;  %v4142_v57 = vld [vmem:[#allocation17_spill] sm:$0xff] }
 0x29a   : > { %v830_v38 = vadd.f32 %v825_v30, %v651_v60  ;;  %v4138_v60 = vld [vmem:[#allocation41_spill] sm:$0xff]  ;;  %v2055_v23 = vmul.f32 %v3612_v16, %v2054_v61  ;;  %v765_v45 = vadd.f32 %v4139_v42, %v741_v35  ;;  %v831_v0 = vadd.f32 %v827_v19, %v652_v3  ;;  %v4141_v30 = vld [vmem:[#allocation43_spill] sm:$0xff] }
 0x29b   : > { %v3785_v18 = vpop.permute.xlu1 %1946  ;;  %v3787_v59 = vpop.permute.xlu0 %1948  ;;  %v764_v29 = vadd.f32 %v4140_v32, %v740_v41  ;;  %v2056_v44 = vmul.f32 %v3615_v5, %v2054_v61  ;;  %v1122_v6 = vrot.slane %v1115_v8, 6  ;;  %v1123_v22 = vrot.slane %v1116_v27, 6  ;;  %v4145_v19 = vld [vmem:[#allocation45_spill] sm:$0xff] }
 0x29c   : > { %v850_v14 = vadd.f32 %v4138_v60, %v830_v38  ;;  %v2057_v38 = vmul.f32 %v3667_v10, %v2054_v61  ;;  %v790_v60 = vadd.f32 %v4142_v57, %v766_v52  ;;  %v789_v46 = vadd.f32 %v4143_v11, %v765_v45  ;;  %v4146_v27 = vld [vmem:[#allocation37_spill] sm:$0xff]  ;;  %v4147_v10 = vld [vmem:[#allocation44_spill] sm:$0xff]  ;;  %v4148_v11 = vld [vmem:[#allocation47_spill] sm:$0xff] }
 0x29d   : > { %v1125_v16 = vrot.slane %v1117_v24, 6  ;;  %v1899_v5 = vrot.slane %v1893_v9, 4  ;;  %v1900_v41 = vrot.slane %v1894_v39, 4  ;;  %v1902_v8 = vrot.slane %v3866_v48, 4  ;;  %v4150_v39 = vld [vmem:[#allocation39_spill] sm:$0xff]  ;;  %v4151_v48 = vld [vmem:[#allocation40_spill] sm:$0xff] }
 0x29e   : > { %v870_v55 = vadd.f32 %v4141_v30, %v850_v14  ;;  %v788_v14 = vadd.f32 %v4146_v27, %v764_v29  ;;  %v2061_v52 = vrot.slane %v2055_v23, 6  ;;  %v2062_v42 = vrot.slane %v2056_v44, 6  ;;  %v4152_v29 = vld [vmem:[#allocation46_spill] sm:$0xff]  ;;  %v4153_v44 = vld [vmem:[#allocation49_spill] sm:$0xff]  ;;  %v4155_v27 = vld [vmem:[#allocation51_spill] sm:$0xff] }
 0x29f   : > { %v3801_v21 = vpop.permute.xlu1 %1950  ;;  %v3803_v43 = vpop.permute.xlu0 %2082  ;;  %v1729_v24 = vadd.f32 %v3704_v51, %v3696_v25  ;;  %v2064_v32 = vrot.slane %v2057_v38, 6  ;;  %v813_v30 = vadd.f32 %v4150_v39, %v789_v46  ;;  %v1124_v25 = vsel %vm1121_vm6, %v1122_v6, %v1123_v22  ;;  %v4160_v39 = vld [vmem:[#allocation54_spill] sm:$0xff] }
 0x2a0   : > { %v890_v3 = vadd.f32 %v4145_v19, %v870_v55  ;;  %v812_v55 = vadd.f32 %v4151_v48, %v788_v14  ;;  %v1901_v46 = vsel %vm822_vm5, %v1899_v5, %v1900_v41 }
 0x2a1   : > { %v1753_v51 = vadd.f32 %v3716_v13, %v1729_v24  ;;  %v2065_v6 = vsel %vm1121_vm6, %v2062_v42, %v2064_v32  ;;  %v4156_v13 = vld [vmem:[#allocation50_spill] sm:$0xff]  ;;  %v4157_v24 = vrot.slane %v3820_v34, 4 }
 0x2a2   : > { %v910_v45 = vadd.f32 %v4148_v11, %v890_v3  ;;  %v1903_v3 = vsel %vm822_vm5, %v1900_v41, %v1902_v8  ;;  %v1850_v41 = vadd.f32 %v3712_v58, %v3702_v54  ;;  %v4162_v54 = vld [vmem:[#allocation56_spill] sm:$0xff] }
 0x2a3   : > { %v3825_v50 = vpop.permute.xlu1 %2084  ;;  %v3827_v4 = vpop.permute.xlu0 %1970 }
 0x2a4   : > { %4123 = vst [vmem:[#allocation12_spill] sm:$0xff] %v3825_v50  ;;  %v930_v19 = vadd.f32 %v4153_v44, %v910_v45  ;;  %v968_v45 = vadd.f32 %v963_v12, %v813_v30  ;;  %v4161_v12 = vld [vmem:[#allocation55_spill] sm:$0xff] }
 0x2a6   : > { %v950_v14 = vadd.f32 %v4155_v27, %v930_v19  ;;  %v4165_v19 = vld [vmem:[#allocation83_spill] sm:$0xff] }
 0x2a7   : > { %v3839_v2 = vpop.permute.xlu1 %1972  ;;  %v3841_v7 = vpop.permute.xlu0 %1974 }
 0x2a8   : > { %v1129_v34 = vadd.f32 %v1124_v25, %v950_v14 }
 0x2ab   : > { %v3859_v40 = vpop.permute.xlu1 %2102  ;;  %v3861_v28 = vpop.permute.xlu0 %2104 }
 0x2ac   : > { %4136 = vst [vmem:[#allocation13_spill] sm:$0xff] %v3859_v40  ;;  %4137 = vst [vmem:[#allocation19_spill] sm:$0xff] %v3861_v28  ;;  %v4144_v28 = vld [vmem:[#allocation42_spill] sm:$0xff] }
 0x2ad   : > { %v851_v50 = vadd.f32 %v4144_v28, %v831_v0  ;;  %v1730_v28 = vadd.f32 %v3708_v62, %v3698_v36  ;;  %v4149_v0 = vld [vmem:[#allocation18_spill] sm:$0xff]  ;;  %v4154_v62 = vld [vmem:[#allocation48_spill] sm:$0xff] }
 0x2ae   : > { %v814_v9 = vadd.f32 %v4149_v0, %v790_v60  ;;  %v1126_v60 = vsel %vm1121_vm6, %v1123_v22, %v1125_v16 }
 0x2af   : > { %v3877_v40 = vpop.permute.xlu1 %1994  ;;  %v3879_v35 = vpop.permute.xlu0 %1996  ;;  %v871_v61 = vadd.f32 %v4147_v10, %v851_v50  ;;  %v1754_v36 = vadd.f32 %v3718_v63, %v1730_v28  ;;  %v1731_v10 = vadd.f32 %v3710_v1, %v3700_v26  ;;  %v967_v63 = vadd.f32 %v961_v37, %v812_v55 }
 0x2b0   : > { %v969_v22 = vadd.f32 %v4157_v24, %v814_v9  ;;  %v1907_v26 = vadd.f32 %v1901_v46, %v1753_v51  ;;  %v992_v37 = vadd.f32 %v4160_v39, %v968_v45  ;;  %v1870_v9 = vadd.f32 %v3728_v17, %v1850_v41  ;;  %v4166_v46 = vld [vmem:[#allocation59_spill] sm:$0xff]  ;;  %v4175_v39 = vld [vmem:[#allocation73_spill] sm:$0xff] }
 0x2b1   : > { %v891_v57 = vadd.f32 %v4152_v29, %v871_v61  ;;  %v2063_v61 = vsel %vm1121_vm6, %v2061_v52, %v2062_v42  ;;  %v1755_v28 = vadd.f32 %v3726_v47, %v1731_v10  ;;  %v1908_v1 = vadd.f32 %v1903_v3, %v1754_v36  ;;  %v4158_v52 = vld [vmem:[#allocation52_spill] sm:$0xff]  ;;  %v4159_v42 = vld [vmem:[#allocation53_spill] sm:$0xff] }
 0x2b2   : > { %v991_v32 = vadd.f32 %v4159_v42, %v967_v63  ;;  %v993_v30 = vadd.f32 %v4161_v12, %v969_v22  ;;  %v1931_v48 = vadd.f32 %v3755_v49, %v1907_v26  ;;  %v4163_v47 = vld [vmem:[#allocation57_spill] sm:$0xff]  ;;  %v1851_v51 = vadd.f32 %v4165_v19, %v3706_v15  ;;  %v4167_v3 = vld [vmem:[#allocation60_spill] sm:$0xff]  ;;  %v4174_v42 = vld [vmem:[#allocation66_spill] sm:$0xff] }
 0x2b3   : > { %v3894_v50 = vpop.permute.xlu1 %1998  ;;  %v3896_v23 = vpop.permute.xlu0 %2122  ;;  %v911_v38 = vadd.f32 %v4154_v62, %v891_v57  ;;  %v1932_v55 = vadd.f32 %v3773_v20, %v1908_v1  ;;  %v1016_v29 = vadd.f32 %v4163_v47, %v992_v37  ;;  %v4164_v57 = vld [vmem:[#allocation58_spill] sm:$0xff]  ;;  %v1909_v25 = vadd.f32 %v1902_v8, %v1755_v28  ;;  %v4179_v47 = vld [vmem:[#allocation13_spill] sm:$0xff] }
 0x2b4   : > { %v1015_v58 = vadd.f32 %v4162_v54, %v991_v32  ;;  %v1017_v44 = vadd.f32 %v4164_v57, %v993_v30  ;;  %v1955_v17 = vadd.f32 %v3785_v18, %v1931_v48  ;;  %v1871_v10 = vadd.f32 %v3738_v31, %v1851_v51  ;;  %v4169_v8 = vld [vmem:[#allocation62_spill] sm:$0xff]  ;;  %v4170_v18 = vld [vmem:[#allocation63_spill] sm:$0xff] }
 0x2b5   : > { %v931_v11 = vadd.f32 %v4156_v13, %v911_v38  ;;  %v1890_v38 = vadd.f32 %v3740_v53, %v1870_v9  ;;  %v1956_v49 = vadd.f32 %v3787_v59, %v1932_v55  ;;  %v1040_v27 = vadd.f32 %v4167_v3, %v1016_v29  ;;  %v4168_v13 = vld [vmem:[#allocation61_spill] sm:$0xff]  ;;  %v4171_v59 = vld [vmem:[#allocation71_spill] sm:$0xff]  ;;  %v4177_v9 = vld [vmem:[#allocation72_spill] sm:$0xff] }
 0x2b6   : > { %v1039_v20 = vadd.f32 %v4166_v46, %v1015_v58  ;;  %v1933_v15 = vadd.f32 %v3775_v56, %v1909_v25  ;;  %v1979_v63 = vadd.f32 %v3827_v4, %v1955_v17  ;;  %v1149_v22 = vadd.f32 %v4171_v59, %v1129_v34  ;;  %v4172_v4 = vld [vmem:[#allocation64_spill] sm:$0xff]  ;;  %v4178_v48 = vld [vmem:[#allocation75_spill] sm:$0xff] }
 0x2b7   : > { %v3914_v16 = vpop.permute.xlu1 %2124  ;;  %v2019_v5 = vpop.permute.xlu0 %2018  ;;  %v951_v0 = vadd.f32 %v4158_v52, %v931_v11  ;;  %v1041_v11 = vadd.f32 %v4168_v13, %v1017_v44  ;;  %v1980_v53 = vadd.f32 %v3839_v2, %v1956_v49  ;;  %v1064_v24 = vadd.f32 %v4170_v18, %v1040_v27  ;;  %v4173_v2 = vld [vmem:[#allocation65_spill] sm:$0xff]  ;;  %v4183_v25 = vld [vmem:[#allocation12_spill] sm:$0xff]  ;;  %v4184_v3 = vld [vmem:[#allocation67_spill] sm:$0xff] }
 0x2b8   : > { %v1063_v45 = vadd.f32 %v4169_v8, %v1039_v20  ;;  %v1891_v41 = vadd.f32 %v3753_v33, %v1871_v10  ;;  %v1957_v31 = vadd.f32 %v3801_v21, %v1933_v15  ;;  %v2068_v26 = vadd.f32 %v2063_v61, %v1890_v38  ;;  %v4176_v21 = vld [vmem:[#allocation68_spill] sm:$0xff] }
 0x2b9   : > { %v1130_v14 = vadd.f32 %v1126_v60, %v951_v0  ;;  %v2003_v1 = vadd.f32 %v3877_v40, %v1979_v63  ;;  %v2004_v56 = vadd.f32 %v3879_v35, %v1980_v53  ;;  %v1065_v52 = vadd.f32 %v4172_v4, %v1041_v11  ;;  %v4187_v63 = vld [vmem:[#allocation19_spill] sm:$0xff] }
 0x2ba   : > { %v1087_v0 = vadd.f32 %v4173_v2, %v1063_v45  ;;  %v1088_v32 = vadd.f32 %v4174_v42, %v1064_v24  ;;  %v1169_v37 = vadd.f32 %v4175_v39, %v1149_v22  ;;  %v2088_v12 = vadd.f32 %v3803_v43, %v2068_v26  ;;  %v4180_v43 = vld [vmem:[#allocation69_spill] sm:$0xff]  ;;  %v4189_v22 = vld [vmem:[#allocation78_spill] sm:$0xff] }
 0x2bb   : > { %v2021_v36 = vpop.permute.xlu1 %2020  ;;  %v2023_v62 = vpop.permute.xlu0 %2022  ;;  %v1981_v33 = vadd.f32 %v3841_v7, %v1957_v31  ;;  %v2027_v30 = vadd.f32 %v2019_v5, %v2003_v1  ;;  %v1150_v40 = vadd.f32 %v4177_v9, %v1130_v14  ;;  %v2069_v55 = vadd.f32 %v2065_v6, %v1891_v41  ;;  %v4181_v7 = vld [vmem:[#allocation74_spill] sm:$0xff]  ;;  %v4185_v14 = vld [vmem:[#allocation76_spill] sm:$0xff]  ;;  %v4190_v31 = vld [vmem:[#allocation81_spill] sm:$0xff] }
 0x2bc   : > { %v2028_v34 = vadd.f32 %v2021_v36, %v2004_v56  ;;  %v1111_v61 = vadd.f32 %v4176_v21, %v1087_v0  ;;  %v1189_v35 = vadd.f32 %v4178_v48, %v1169_v37  ;;  %v2108_v29 = vadd.f32 %v4179_v47, %v2088_v12  ;;  %v4182_v36 = vld [vmem:[#allocation77_spill] sm:$0xff]  ;;  %v4191_v0 = vld [vmem:[#allocation80_spill] sm:$0xff] }
 0x2bd   : > { %v2005_v57 = vadd.f32 %v3894_v50, %v1981_v33  ;;  %v1112_v51 = vadd.f32 %v4180_v43, %v1088_v32  ;;  %v1170_v5 = vadd.f32 %v4181_v7, %v1150_v40  ;;  %v2089_v17 = vadd.f32 %v4183_v25, %v2069_v55  ;;  %v4186_v50 = vld [vmem:[#allocation79_spill] sm:$0xff] }
 0x2be   : > { %v1209_v38 = vadd.f32 %v4182_v36, %v1189_v35  ;;  %v2128_v49 = vadd.f32 %v3896_v23, %v2108_v29  ;;  %v1089_v27 = vadd.f32 %v4184_v3, %v1065_v52  ;;  %v2194_v24 = vrot.slane %v1111_v61, 1 }
 0x2bf   : > { %v2143_v28 = vpop.permute.xlu1 %2142  ;;  %v2145_v60 = vpop.permute.xlu0 %2144  ;;  %v2029_v46 = vadd.f32 %v2023_v62, %v2005_v57  ;;  %v1190_v10 = vadd.f32 %v4185_v14, %v1170_v5  ;;  %v2109_v53 = vadd.f32 %v4187_v63, %v2089_v17  ;;  %v2195_v23 = vrot.slane %v1112_v51, 1  ;;  %v4188_v62 = vld [vmem:[#allocation70_spill] sm:$0xff] }
 0x2c0   : > { %v1229_v13 = vadd.f32 %v4186_v50, %v1209_v38  ;;  %v2148_v8 = vadd.f32 %v2143_v28, %v2128_v49  ;;  %v1113_v59 = vadd.f32 %v4188_v62, %v1089_v27 }
 0x2c1   : > { %v1210_v41 = vadd.f32 %v4189_v22, %v1190_v10  ;;  %v2129_v1 = vadd.f32 %v3914_v16, %v2109_v53  ;;  %v2196_v12 = vsel %vm2193_vm7, %v2194_v24, %v2195_v23 }
 0x2c2   : > { %v1249_v26 = vadd.f32 %v4190_v31, %v1229_v13  ;;  %v2197_v37 = vrot.slane %v1113_v59, 1 }
 0x2c3   : > { %v2043_v54 = vpop.permute.xlu1 %2042  ;;  %v2045_v58 = vpop.permute.xlu0 %2044  ;;  %v1230_v42 = vadd.f32 %v4191_v0, %v1210_v41  ;;  %v2149_v28 = vadd.f32 %v2145_v60, %v2129_v1 }
 0x2c4   : > { %v2051_v44 = vadd.f32 %v2043_v54, %v2027_v30  ;;  %v2052_v19 = vadd.f32 %v2045_v58, %v2028_v34  ;;  %v2201_v33 = vadd.f32 %v2196_v12, %v1249_v26  ;;  %v4192_v30 = vld [vmem:[#allocation82_spill] sm:$0xff]  ;;  %v2198_v48 = vsel %vm2193_vm7, %v2195_v23, %v2197_v37 }
 0x2c5   : > { %v1250_v34 = vadd.f32 %v4192_v30, %v1230_v42 }
 0x2c6   : > { %v2206_v6 = vrot.slane %v2051_v44, 1  ;;  %v2207_v20 = vrot.slane %v2052_v19, 1 }
 0x2c7   : > { %v2047_v11 = vpop.permute.xlu1 %2046  ;;  %v2163_v15 = vpop.permute.xlu0 %2162  ;;  %v2202_v35 = vadd.f32 %v2198_v48, %v1250_v34 }
 0x2c8   : > { %v2053_v45 = vadd.f32 %v2047_v11, %v2029_v46  ;;  %v2208_v18 = vsel %vm2193_vm7, %v2206_v6, %v2207_v20  ;;  %v2168_v4 = vadd.f32 %v2163_v15, %v2148_v8 }
 0x2ca   : > { %v2209_v56 = vrot.slane %v2053_v45, 1 }
 0x2cb   : > { %v2165_v52 = vpop.permute.xlu1 %2164  ;;  %v2183_v2 = vpop.permute.xlu0 %2182 }
 0x2cc   : > { %v2188_v32 = vadd.f32 %v2183_v2, %v2168_v4  ;;  %v2210_v39 = vsel %vm2193_vm7, %v2207_v20, %v2209_v56  ;;  %v2169_v21 = vadd.f32 %v2165_v52, %v2149_v28 }
 0x2ce   : > { %v2213_v61 = vadd.f32 %v2208_v18, %v2188_v32 }
 0x2cf   : > { %v2185_v9 = vpop.permute.xlu1 %2184 }
 0x2d0   : > { %v2215_v16 = vadd.f32 %v2213_v61, %v2201_v33  ;;  %v2189_v40 = vadd.f32 %v2185_v9, %v2169_v21 }
 0x2d2   : > { %v2424_v60 = vmul.f32 -1.442695, %v2215_v16  ;;  %v2214_v55 = vadd.f32 %v2210_v39, %v2189_v40 }
 0x2d4   : > { %2492 = vpow2.f32 %v2424_v60  ;;  %v2216_v54 = vadd.f32 %v2214_v55, %v2202_v35 }
 0x2d6   : > { %v2425_v58 = vmul.f32 -1.442695, %v2216_v54 }
 0x2d8   : > { %2494 = vpow2.f32 %v2425_v58 }
 0x2e1   : > { %v2493_v47 = vpop.eup %2492 }
 0x2e2   : > { %v2223_v29 = vadd.f32 1.0, %v2493_v47 }
 0x2e4   : > { %2496 = vrcp.f32 %v2223_v29 }
 0x2e5   : > { %v2495_v57 = vpop.eup %2494 }
 0x2e6   : > { %v2224_v44 = vadd.f32 1.0, %v2495_v57 }
 0x2e8   : > { %2498 = vrcp.f32 %v2224_v44 }
 0x2f1   : > { %v2497_v19 = vpop.eup %2496 }
 0x2f2   : > { %2229 = vst.msk [vmem:[%s139_s6] sm:$0xff] %vm254_vm1, %v2497_v19 }
 0x2f5   : > { %v2499_v43 = vpop.eup %2498 }
 0x2f6   : > { %2230 = vst.msk [vmem:[%s139_s6 + $0x8] sm:$0xff] %vm254_vm1, %v2499_v43 }
 0x2f7   : > { %2555 = shalt.err (!%p2552_p10)
}
 0x2f8   : > { %s2556_s21 = scalar_lea.hbm %s3984_s10, 256  ;;  %s2560_s29 = scalar_lea.hbm %s4032_s2, 512 }
 0x2f9   : > { %p2557_p0 = scmp.ne.s32.totalorder %s3984_s10, %s2556_s21  ;;  %p2561_p1 = scmp.lt.s32.totalorder %s3984_s10, %s4032_s2 }
 0x2fa   : > { %p2562_p3 = scmp.lt.s32.totalorder %s2560_s29, %s2556_s21 }
 0x2fb   : > { %p2558_p2 = pnand %p2557_p0, %p4193_p12 }
 0x2fc   : > { %p2563_p6 = por %p2562_p3, %p2561_p1 }
 0x2fd   : > { %p2559_p9 = pneg %p2558_p2 }
 0x2ff   : > { %p2564_p11 = pnand %p2563_p6, %p2559_p9 }
 0x301   : > { %2567 = shalt.err (!%p2564_p11)
}
 0x302   : > { %s2623_s22 = smov 128   ;;  %s2624_s30 = smov 8  }
 0x303   : > { %2435 = dma.vmem_to_hbm [thread:$0]  (%p4193_p12), %s3986_s9, 256, %s3984_s10, %s2232_s18, %s2623_s22, %s2623_s22, %s2624_s30  }
 0x304 PF: > { %s2260_s4 = sand.u32 1, %s2596_s12   ;;  %p4194_p13 = scmp.ne.s32.totalorder %s4039_s24, 0 }
 0x305   : > { %p4195_p4 = scmp.ge.s32.totalorder %s2608_s15, 2  ;;  %s2261_s5 = scalar_lea.sflag [#allocation7], %s2260_s4 }
 0x307   : > { %p2442_p5 = pnand %p4195_p4, %p4194_p13 }
 0x309   : > { %p2443_p7 = pneg %p2442_p5 }
 0x30b   : > { %2591 = dma.done.wait (%p2443_p7), %s2261_s5, 256  }
 0x30c   : > { %2593 = vsyncadd (%p2443_p7), %s2261_s5, 4294967040  ;;  %p19_p8 = scmp.ge.s32.totalorder %s2668_s17, 4   ;;  %s4196_s12 = smov %s2600_s13 }
 0x30d   : > { %s4197_s13 = smov %s2604_s14  ;;  %s4198_s14 = smov %s2680_s20 }
 0x30e   : > { %s4199_s15 = smov %s2668_s17  ;;  %21 = sbr.rel (!%p19_p8) target bundleno = 10 (0xa), region = 70 }
 0x313   :  { %2266 = vsyncpa [#allocation6], 1 }
 0x314   :  { %2268 = vsyncpa [#allocation6 + $0x1], 1 }
 0x315   :  { %2269 = vsyncpa [#allocation7], 1 }
 0x316   :  { %2271 = vsyncpa [#allocation7 + $0x1], 1 }

</bundles_post_ra>
